<compile_context>
chip_gen: v6e
topology: v6e:2x2x1
jax: 0.10.0
libtpu: 0.0.40
codegen_flags: <defaults>
</compile_context>

<pallas_src>
import math
import functools

import jax
import jax.numpy as jnp
from jax import lax
from jax.experimental import pallas as pl
from jax.experimental.pallas import tpu as pltpu

LN_EPS = 1e-12  # BERT default


def _layer_norm(x, gamma, beta):
    mu = jnp.mean(x, axis=-1, keepdims=True)
    var = jnp.mean((x - mu) ** 2, axis=-1, keepdims=True)
    return (x - mu) * lax.rsqrt(var + LN_EPS) * gamma + beta


def _attention_kernel(num_heads, head_dim, hidden,
                      x_ref, mask_ref,
                      wqkv_ref, bqkv_ref, wo_ref, bo_ref,
                      g1_ref, b1_ref, g2_ref, b2_ref,
                      out_ref,
                      qkv_ref, ctx_ref, h_ref):
    H = hidden
    x = x_ref[0].astype(jnp.float32)       # (S, H): bf16 embedding sum -> f32
    mask = mask_ref[0]                     # (1, S) f32 additive mask

    # --- embedding LayerNorm (f32 elementwise); keep result in VMEM scratch ---
    h = _layer_norm(x, g1_ref[0], b1_ref[0])                         # (S, H) f32
    h_ref[...] = h                                                    # residual later

    # --- fused QKV projection: one (S,H) x (H,3H) bf16 MXU matmul, f32 accum ---
    # 1/sqrt(head_dim) is already folded into the Q third of wqkv/bqkv (glue).
    qkv = jnp.dot(h.astype(jnp.bfloat16), wqkv_ref[...],
                  preferred_element_type=jnp.float32) + bqkv_ref[0]   # (S, 3H) f32
    qkv_ref[...] = qkv.astype(jnp.bfloat16)                           # to scratch

    # --- per-head attention; contexts packed into an (S, H) bf16 scratch ---
    # Ref slicing (not value slicing) -> plain vector loads, no relayout copies.
    for hd in range(num_heads):
        off = hd * head_dim
        q_h = qkv_ref[:, off:off + head_dim]                          # (S, dh) bf16
        k_h = qkv_ref[:, H + off:H + off + head_dim]
        v_h = qkv_ref[:, 2 * H + off:2 * H + off + head_dim]

        # scores (already scaled), bf16 MXU operands / f32 accumulation
        s = lax.dot_general(q_h, k_h, (((1,), (1,)), ((), ())),
                            preferred_element_type=jnp.float32)        # (S, S)
        s = s + mask

        # numerically stable softmax, f32 elementwise, EUP reciprocal
        m = jnp.max(s, axis=-1, keepdims=True)
        p = jnp.exp(s - m)
        p = p * pl.reciprocal(jnp.sum(p, axis=-1, keepdims=True), approx=True)

        ctx = jnp.dot(p.astype(jnp.bfloat16), v_h,
                      preferred_element_type=jnp.float32)              # (S, dh)
        # TODO(synk): on v5e, pair heads so these column stores stay 128-lane
        # wide / unmasked; negligible vs MXU work at these sizes.
        ctx_ref[:, off:off + head_dim] = ctx.astype(jnp.bfloat16)

    # --- fused output projection: single full-depth (S,H) x (H,H) matmul ---
    o = jnp.dot(ctx_ref[...], wo_ref[...], preferred_element_type=jnp.float32)

    # --- output bias + residual + LayerNorm (BertSelfOutput) ---
    y = _layer_norm(o + bo_ref[0] + h_ref[...], g2_ref[0], b2_ref[0])
    out_ref[0] = y.astype(out_ref.dtype)


def embedding_and_attention(input_ids, attention_mask, params, *, num_heads):
    """input_ids: (B, S) int32; attention_mask: (B, S) {0,1} float32."""
    B, S = input_ids.shape
    H = params["word_emb"].shape[1]
    head_dim = H // num_heads
    scale = 1.0 / math.sqrt(head_dim)

    # ---- glue: embedding gathers stay in XLA ----
    # TODO(synk): embedding-table gather has no clean tiled Pallas equivalent at
    # this size; done with jnp.take and the (bf16) sum fed to the kernel.
    word = jnp.take(params["word_emb"], input_ids, axis=0)              # (B, S, H)
    pos = jnp.take(params["pos_emb"], jnp.arange(S), axis=0)[None]      # (1, S, H)
    ttype = params["type_emb"][0][None, None]                           # (1, 1, H)
    # bf16 halves the extra HBM round trip; LN math stays f32 inside the kernel.
    x_sum = (word + pos + ttype).astype(jnp.bfloat16)                   # (B, S, H)

    # compact additive mask (B, 1, S) — broadcast happens inside the kernel
    add_mask = ((1.0 - attention_mask.astype(jnp.float32)) * -10000.0)[:, None, :]

    # fused QKV weight/bias, with the softmax scale folded into the Q third
    wqkv = jnp.concatenate([params["wq"] * scale, params["wk"], params["wv"]],
                           axis=1).astype(jnp.bfloat16)                 # (H, 3H) bf16
    bqkv = jnp.concatenate([params["bq"] * scale, params["bk"], params["bv"]],
                           axis=1).astype(jnp.float32)                  # (1, 3H) f32

    wo = params["wo"].astype(jnp.bfloat16)                              # (H, H) bf16

    kernel = functools.partial(_attention_kernel, num_heads, head_dim, H)

    full2d = lambda b: (0, 0)
    spec_vec = pl.BlockSpec((1, H), full2d)            # biases / LN params

    out = pl.pallas_call(
        kernel,
        out_shape=jax.ShapeDtypeStruct((B, S, H), jnp.float32),
        grid_spec=pltpu.PrefetchScalarGridSpec(
            num_scalar_prefetch=0,
            grid=(B,),
            in_specs=[
                pl.BlockSpec((1, S, H), lambda b: (b, 0, 0)),           # x_sum (bf16)
                pl.BlockSpec((1, 1, S), lambda b: (b, 0, 0)),           # additive mask
                pl.BlockSpec((H, 3 * H), full2d),                       # Wqkv (bf16)
                pl.BlockSpec((1, 3 * H), full2d),                       # bqkv
                pl.BlockSpec((H, H), full2d),                           # Wo (bf16)
                spec_vec,                                               # bo
                spec_vec, spec_vec,                                     # LN1 gamma/beta
                spec_vec, spec_vec,                                     # LN2 gamma/beta
            ],
            out_specs=pl.BlockSpec((1, S, H), lambda b: (b, 0, 0)),
            scratch_shapes=[
                pltpu.VMEM((S, 3 * H), jnp.bfloat16),   # fused QKV result
                pltpu.VMEM((S, H), jnp.bfloat16),       # packed per-head contexts
                pltpu.VMEM((S, H), jnp.float32),        # post-LN1 embeddings (residual)
            ],
        ),
        compiler_params=pltpu.CompilerParams(
            dimension_semantics=("parallel",),
            vmem_limit_bytes=32 * 1024 * 1024),
    )(x_sum, add_mask, wqkv, bqkv, wo, params["bo"],
      params["ln1_g"], params["ln1_b"], params["ln2_g"], params["ln2_b"])
    return out


def _reference(input_ids, attention_mask, params, *, num_heads):
    """Pure-JAX f32 reference of the same forward, for the correctness check."""
    B, S = input_ids.shape
    H = params["word_emb"].shape[1]
    dh = H // num_heads
    word = jnp.take(params["word_emb"], input_ids, axis=0)
    pos = jnp.take(params["pos_emb"], jnp.arange(S), axis=0)[None]
    ttype = params["type_emb"][0][None, None]
    x = word + pos + ttype
    h = _layer_norm(x, params["ln1_g"][0], params["ln1_b"][0])
    q = h @ params["wq"] + params["bq"][0]
    k = h @ params["wk"] + params["bk"][0]
    v = h @ params["wv"] + params["bv"][0]
    qh = q.reshape(B, S, num_heads, dh).transpose(0, 2, 1, 3)
    kh = k.reshape(B, S, num_heads, dh).transpose(0, 2, 1, 3)
    vh = v.reshape(B, S, num_heads, dh).transpose(0, 2, 1, 3)
    scores = jnp.einsum("bhqd,bhkd->bhqk", qh, kh) / math.sqrt(dh)
    add_mask = (1.0 - attention_mask.astype(jnp.float32)) * -10000.0
    scores = scores + add_mask[:, None, None, :]
    probs = jax.nn.softmax(scores, axis=-1)
    ctx = jnp.einsum("bhqk,bhkd->bhqd", probs, vh)
    ctx = ctx.transpose(0, 2, 1, 3).reshape(B, S, H)
    o = ctx @ params["wo"] + params["bo"][0]
    return _layer_norm(o + h, params["ln2_g"][0], params["ln2_b"][0])


def _init_params(key, vocab, max_pos, n_types, H):
    ks = jax.random.split(key, 10)
    scale = 0.02
    return {
        "word_emb": scale * jax.random.normal(ks[0], (vocab, H), jnp.float32),
        "pos_emb":  scale * jax.random.normal(ks[1], (max_pos, H), jnp.float32),
        "type_emb": scale * jax.random.normal(ks[2], (n_types, H), jnp.float32),
        "wq": scale * jax.random.normal(ks[3], (H, H), jnp.float32),
        "wk": scale * jax.random.normal(ks[4], (H, H), jnp.float32),
        "wv": scale * jax.random.normal(ks[5], (H, H), jnp.float32),
        "wo": scale * jax.random.normal(ks[6], (H, H), jnp.float32),
        "bq": scale * jax.random.normal(ks[7], (1, H), jnp.float32),
        "bk": scale * jax.random.normal(ks[8], (1, H), jnp.float32),
        "bv": scale * jax.random.normal(ks[9], (1, H), jnp.float32),
        "bo": jnp.zeros((1, H), jnp.float32),
        "ln1_g": jnp.ones((1, H), jnp.float32),
        "ln1_b": jnp.zeros((1, H), jnp.float32),
        "ln2_g": jnp.ones((1, H), jnp.float32),
        "ln2_b": jnp.zeros((1, H), jnp.float32),
    }


if __name__ == "__main__":
    # Lane-dense shapes (H, S multiples of 128) so the test exercises the real
    # (8,128) tiling path, while staying small.
    B, S, H = 2, 128, 128
    NUM_HEADS = 4
    VOCAB, MAX_POS, N_TYPES = 64, 256, 2

    key = jax.random.PRNGKey(0)
    k_param, k_ids = jax.random.split(key)
    params = _init_params(k_param, VOCAB, MAX_POS, N_TYPES, H)

    input_ids = jax.random.randint(k_ids, (B, S), 0, VOCAB, dtype=jnp.int32)
    attention_mask = jnp.ones((B, S), jnp.float32).at[1, S - 16:].set(0.0)

    out = embedding_and_attention(input_ids, attention_mask, params,
                                  num_heads=NUM_HEADS)
    out = jax.block_until_ready(out)

    ref = _reference(input_ids, attention_mask, params, num_heads=NUM_HEADS)
    assert out.shape == (B, S, H)
    # bf16 embedding-sum input + bf16 MXU operands (f32 accumulation / f32
    # softmax & LayerNorm) vs the pure-f32 reference -> small relative error.
    assert jnp.allclose(out, ref, atol=5e-2, rtol=5e-2), float(
        jnp.max(jnp.abs(out - ref)))

    print("KERNEL_OK")
</pallas_src>

<mosaic_0001>
module attributes {stable_mosaic.version = 11 : i64} {
  func.func @_attention_kernel(%arg0: i32, %arg1: memref<1x128x128xbf16, #tpu.memory_space<vmem>>, %arg2: memref<1x1x128xf32, #tpu.memory_space<vmem>>, %arg3: memref<128x384xbf16, #tpu.memory_space<vmem>>, %arg4: memref<1x384xf32, #tpu.memory_space<vmem>>, %arg5: memref<128x128xbf16, #tpu.memory_space<vmem>>, %arg6: memref<1x128xf32, #tpu.memory_space<vmem>>, %arg7: memref<1x128xf32, #tpu.memory_space<vmem>>, %arg8: memref<1x128xf32, #tpu.memory_space<vmem>>, %arg9: memref<1x128xf32, #tpu.memory_space<vmem>>, %arg10: memref<1x128xf32, #tpu.memory_space<vmem>>, %arg11: memref<1x128x128xf32, #tpu.memory_space<vmem>>, %arg12: memref<128x384xbf16, #tpu.memory_space<vmem>>, %arg13: memref<128x128xbf16, #tpu.memory_space<vmem>>, %arg14: memref<128x128xf32, #tpu.memory_space<vmem>>) attributes {dimension_semantics = [#tpu.dimension_semantics<parallel>], iteration_bounds = array<i64: 2>, scalar_prefetch = 0 : i64, scratch_operands = 3 : i64, tpu.core_type = #tpu.core_type<tc>, window_params = [{transform_indices = @transform_0, window_bounds = array<i64: 1, 128, 128>}, {transform_indices = @transform_1, window_bounds = array<i64: 1, 1, 128>}, {pipeline_mode = #tpu.pipeline_mode<synchronous>, transform_indices = @transform_2, window_bounds = array<i64: 128, 384>}, {pipeline_mode = #tpu.pipeline_mode<synchronous>, transform_indices = @transform_3, window_bounds = array<i64: 1, 384>}, {pipeline_mode = #tpu.pipeline_mode<synchronous>, transform_indices = @transform_4, window_bounds = array<i64: 128, 128>}, {pipeline_mode = #tpu.pipeline_mode<synchronous>, transform_indices = @transform_5, window_bounds = array<i64: 1, 128>}, {pipeline_mode = #tpu.pipeline_mode<synchronous>, transform_indices = @transform_6, window_bounds = array<i64: 1, 128>}, {pipeline_mode = #tpu.pipeline_mode<synchronous>, transform_indices = @transform_7, window_bounds = array<i64: 1, 128>}, {pipeline_mode = #tpu.pipeline_mode<synchronous>, transform_indices = @transform_8, window_bounds = array<i64: 1, 128>}, {pipeline_mode = #tpu.pipeline_mode<synchronous>, transform_indices = @transform_9, window_bounds = array<i64: 1, 128>}, {transform_indices = @transform_10, window_bounds = array<i64: 1, 128, 128>}]} {
    %c0 = arith.constant 0 : index
    %c0_0 = arith.constant 0 : index
    %c0_1 = arith.constant 0 : index
    %0 = vector.load %arg1[%c0, %c0_0, %c0_1] : memref<1x128x128xbf16, #tpu.memory_space<vmem>>, vector<1x128x128xbf16>
    %1 = vector.shape_cast %0 : vector<1x128x128xbf16> to vector<128x128xbf16>
    %2 = arith.extf %1 : vector<128x128xbf16> to vector<128x128xf32>
    %c0_2 = arith.constant 0 : index
    %c0_3 = arith.constant 0 : index
    %c0_4 = arith.constant 0 : index
    %3 = vector.load %arg2[%c0_2, %c0_3, %c0_4] : memref<1x1x128xf32, #tpu.memory_space<vmem>>, vector<1x1x128xf32>
    %4 = vector.shape_cast %3 : vector<1x1x128xf32> to vector<1x128xf32>
    %c0_5 = arith.constant 0 : index
    %c0_6 = arith.constant 0 : index
    %5 = vector.load %arg7[%c0_5, %c0_6] : memref<1x128xf32, #tpu.memory_space<vmem>>, vector<1x128xf32>
    %6 = vector.shape_cast %5 : vector<1x128xf32> to vector<128xf32>
    %c0_7 = arith.constant 0 : index
    %c0_8 = arith.constant 0 : index
    %7 = vector.load %arg8[%c0_7, %c0_8] : memref<1x128xf32, #tpu.memory_space<vmem>>, vector<1x128xf32>
    %8 = vector.shape_cast %7 : vector<1x128xf32> to vector<128xf32>
    %cst = arith.constant dense<0.000000e+00> : vector<128xf32>
    %9 = vector.multi_reduction <add>, %2, %cst [1] : vector<128x128xf32> to vector<128xf32>
    %10 = vector.shape_cast %9 : vector<128xf32> to vector<128x1xf32>
    %cst_9 = arith.constant 1.280000e+02 : f32
    %11 = vector.broadcast %cst_9 : f32 to vector<128x1xf32>
    %12 = arith.divf %10, %11 : vector<128x1xf32>
    %13 = vector.broadcast %12 : vector<128x1xf32> to vector<128x128xf32>
    %14 = arith.subf %2, %13 : vector<128x128xf32>
    %15 = arith.mulf %14, %14 : vector<128x128xf32>
    %cst_10 = arith.constant dense<0.000000e+00> : vector<128xf32>
    %16 = vector.multi_reduction <add>, %15, %cst_10 [1] : vector<128x128xf32> to vector<128xf32>
    %17 = vector.shape_cast %16 : vector<128xf32> to vector<128x1xf32>
    %cst_11 = arith.constant 1.280000e+02 : f32
    %18 = vector.broadcast %cst_11 : f32 to vector<128x1xf32>
    %19 = arith.divf %17, %18 : vector<128x1xf32>
    %20 = vector.broadcast %12 : vector<128x1xf32> to vector<128x128xf32>
    %21 = arith.subf %2, %20 : vector<128x128xf32>
    %cst_12 = arith.constant 9.99999996E-13 : f32
    %22 = vector.broadcast %cst_12 : f32 to vector<128x1xf32>
    %23 = arith.addf %19, %22 : vector<128x1xf32>
    %24 = math.rsqrt %23 : vector<128x1xf32>
    %25 = vector.broadcast %24 : vector<128x1xf32> to vector<128x128xf32>
    %26 = arith.mulf %21, %25 : vector<128x128xf32>
    %27 = vector.shape_cast %6 : vector<128xf32> to vector<1x128xf32>
    %28 = vector.broadcast %27 : vector<1x128xf32> to vector<128x128xf32>
    %29 = arith.mulf %26, %28 : vector<128x128xf32>
    %30 = vector.shape_cast %8 : vector<128xf32> to vector<1x128xf32>
    %31 = vector.broadcast %30 : vector<1x128xf32> to vector<128x128xf32>
    %32 = arith.addf %29, %31 : vector<128x128xf32>
    %c0_13 = arith.constant 0 : index
    %c0_14 = arith.constant 0 : index
    %33 = vector.load %arg14[%c0_13, %c0_14] : memref<128x128xf32, #tpu.memory_space<vmem>>, vector<128x128xf32>
    tpu.vector_store %arg14[%c0_13, %c0_14], %32 {strides = array<i32>} : memref<128x128xf32, #tpu.memory_space<vmem>>, vector<128x128xf32>,
    %34 = arith.truncf %32 : vector<128x128xf32> to vector<128x128xbf16>
    %c0_15 = arith.constant 0 : index
    %c0_16 = arith.constant 0 : index
    %35 = vector.load %arg3[%c0_15, %c0_16] : memref<128x384xbf16, #tpu.memory_space<vmem>>, vector<128x384xbf16>
    %cst_17 = arith.constant dense<0.000000e+00> : vector<128x384xf32>
    %36 = tpu.matmul %34, %35, %cst_17 {dimension_numbers = #tpu.dot_dimension_numbers<[1], [0], [0], [1], [0, 0, 1, 1], [], []>} : vector<128x128xbf16>, vector<128x384xbf16>, vector<128x384xf32> -> vector<128x384xf32>
    %c0_18 = arith.constant 0 : index
    %c0_19 = arith.constant 0 : index
    %37 = vector.load %arg4[%c0_18, %c0_19] : memref<1x384xf32, #tpu.memory_space<vmem>>, vector<1x384xf32>
    %38 = vector.shape_cast %37 : vector<1x384xf32> to vector<384xf32>
    %39 = vector.shape_cast %38 : vector<384xf32> to vector<1x384xf32>
    %40 = vector.broadcast %39 : vector<1x384xf32> to vector<128x384xf32>
    %41 = arith.addf %36, %40 : vector<128x384xf32>
    %42 = arith.truncf %41 : vector<128x384xf32> to vector<128x384xbf16>
    %c0_20 = arith.constant 0 : index
    %c0_21 = arith.constant 0 : index
    %43 = vector.load %arg12[%c0_20, %c0_21] : memref<128x384xbf16, #tpu.memory_space<vmem>>, vector<128x384xbf16>
    tpu.vector_store %arg12[%c0_20, %c0_21], %42 {strides = array<i32>} : memref<128x384xbf16, #tpu.memory_space<vmem>>, vector<128x384xbf16>,
    %c0_22 = arith.constant 0 : index
    %c0_23 = arith.constant 0 : index
    %44 = vector.load %arg12[%c0_22, %c0_23] : memref<128x384xbf16, #tpu.memory_space<vmem>>, vector<128x32xbf16>
    %c0_24 = arith.constant 0 : index
    %c128 = arith.constant 128 : index
    %45 = vector.load %arg12[%c0_24, %c128] : memref<128x384xbf16, #tpu.memory_space<vmem>>, vector<128x32xbf16>
    %c0_25 = arith.constant 0 : index
    %c256 = arith.constant 256 : index
    %46 = vector.load %arg12[%c0_25, %c256] : memref<128x384xbf16, #tpu.memory_space<vmem>>, vector<128x32xbf16>
    %cst_26 = arith.constant dense<0.000000e+00> : vector<128x128xf32>
    %47 = tpu.matmul %44, %45, %cst_26 {dimension_numbers = #tpu.dot_dimension_numbers<[1], [1], [0], [0], [0, 0, 1, 0], [], []>} : vector<128x32xbf16>, vector<128x32xbf16>, vector<128x128xf32> -> vector<128x128xf32>
    %48 = vector.broadcast %4 : vector<1x128xf32> to vector<128x128xf32>
    %49 = arith.addf %47, %48 : vector<128x128xf32>
    %cst_27 = arith.constant dense<0xFF800000> : vector<128xf32>
    %50 = vector.multi_reduction <maximumf>, %49, %cst_27 [1] : vector<128x128xf32> to vector<128xf32>
    %51 = vector.shape_cast %50 : vector<128xf32> to vector<128x1xf32>
    %52 = vector.broadcast %51 : vector<128x1xf32> to vector<128x128xf32>
    %53 = arith.subf %49, %52 : vector<128x128xf32>
    %54 = math.exp %53 : vector<128x128xf32>
    %cst_28 = arith.constant dense<0.000000e+00> : vector<128xf32>
    %55 = vector.multi_reduction <add>, %54, %cst_28 [1] : vector<128x128xf32> to vector<128xf32>
    %56 = vector.shape_cast %55 : vector<128xf32> to vector<128x1xf32>
    %57 = tpu.reciprocal %56 {approx = true} : vector<128x1xf32> -> vector<128x1xf32>
    %58 = vector.broadcast %57 : vector<128x1xf32> to vector<128x128xf32>
    %59 = arith.mulf %54, %58 : vector<128x128xf32>
    %60 = arith.truncf %59 : vector<128x128xf32> to vector<128x128xbf16>
    %cst_29 = arith.constant dense<0.000000e+00> : vector<128x32xf32>
    %61 = tpu.matmul %60, %46, %cst_29 {dimension_numbers = #tpu.dot_dimension_numbers<[1], [0], [0], [1], [0, 0, 1, 1], [], []>} : vector<128x128xbf16>, vector<128x32xbf16>, vector<128x32xf32> -> vector<128x32xf32>
    %62 = arith.truncf %61 : vector<128x32xf32> to vector<128x32xbf16>
    %c0_30 = arith.constant 0 : index
    %c0_31 = arith.constant 0 : index
    %63 = vector.load %arg13[%c0_30, %c0_31] : memref<128x128xbf16, #tpu.memory_space<vmem>>, vector<128x32xbf16>
    tpu.vector_store %arg13[%c0_30, %c0_31], %62 {strides = array<i32>} : memref<128x128xbf16, #tpu.memory_space<vmem>>, vector<128x32xbf16>,
    %c0_32 = arith.constant 0 : index
    %c32 = arith.constant 32 : index
    %64 = vector.load %arg12[%c0_32, %c32] : memref<128x384xbf16, #tpu.memory_space<vmem>>, vector<128x32xbf16>
    %c0_33 = arith.constant 0 : index
    %c160 = arith.constant 160 : index
    %65 = vector.load %arg12[%c0_33, %c160] : memref<128x384xbf16, #tpu.memory_space<vmem>>, vector<128x32xbf16>
    %c0_34 = arith.constant 0 : index
    %c288 = arith.constant 288 : index
    %66 = vector.load %arg12[%c0_34, %c288] : memref<128x384xbf16, #tpu.memory_space<vmem>>, vector<128x32xbf16>
    %cst_35 = arith.constant dense<0.000000e+00> : vector<128x128xf32>
    %67 = tpu.matmul %64, %65, %cst_35 {dimension_numbers = #tpu.dot_dimension_numbers<[1], [1], [0], [0], [0, 0, 1, 0], [], []>} : vector<128x32xbf16>, vector<128x32xbf16>, vector<128x128xf32> -> vector<128x128xf32>
    %68 = vector.broadcast %4 : vector<1x128xf32> to vector<128x128xf32>
    %69 = arith.addf %67, %68 : vector<128x128xf32>
    %cst_36 = arith.constant dense<0xFF800000> : vector<128xf32>
    %70 = vector.multi_reduction <maximumf>, %69, %cst_36 [1] : vector<128x128xf32> to vector<128xf32>
    %71 = vector.shape_cast %70 : vector<128xf32> to vector<128x1xf32>
    %72 = vector.broadcast %71 : vector<128x1xf32> to vector<128x128xf32>
    %73 = arith.subf %69, %72 : vector<128x128xf32>
    %74 = math.exp %73 : vector<128x128xf32>
    %cst_37 = arith.constant dense<0.000000e+00> : vector<128xf32>
    %75 = vector.multi_reduction <add>, %74, %cst_37 [1] : vector<128x128xf32> to vector<128xf32>
    %76 = vector.shape_cast %75 : vector<128xf32> to vector<128x1xf32>
    %77 = tpu.reciprocal %76 {approx = true} : vector<128x1xf32> -> vector<128x1xf32>
    %78 = vector.broadcast %77 : vector<128x1xf32> to vector<128x128xf32>
    %79 = arith.mulf %74, %78 : vector<128x128xf32>
    %80 = arith.truncf %79 : vector<128x128xf32> to vector<128x128xbf16>
    %cst_38 = arith.constant dense<0.000000e+00> : vector<128x32xf32>
    %81 = tpu.matmul %80, %66, %cst_38 {dimension_numbers = #tpu.dot_dimension_numbers<[1], [0], [0], [1], [0, 0, 1, 1], [], []>} : vector<128x128xbf16>, vector<128x32xbf16>, vector<128x32xf32> -> vector<128x32xf32>
    %82 = arith.truncf %81 : vector<128x32xf32> to vector<128x32xbf16>
    %c0_39 = arith.constant 0 : index
    %c32_40 = arith.constant 32 : index
    %83 = vector.load %arg13[%c0_39, %c32_40] : memref<128x128xbf16, #tpu.memory_space<vmem>>, vector<128x32xbf16>
    tpu.vector_store %arg13[%c0_39, %c32_40], %82 {strides = array<i32>} : memref<128x128xbf16, #tpu.memory_space<vmem>>, vector<128x32xbf16>,
    %c0_41 = arith.constant 0 : index
    %c64 = arith.constant 64 : index
    %84 = vector.load %arg12[%c0_41, %c64] : memref<128x384xbf16, #tpu.memory_space<vmem>>, vector<128x32xbf16>
    %c0_42 = arith.constant 0 : index
    %c192 = arith.constant 192 : index
    %85 = vector.load %arg12[%c0_42, %c192] : memref<128x384xbf16, #tpu.memory_space<vmem>>, vector<128x32xbf16>
    %c0_43 = arith.constant 0 : index
    %c320 = arith.constant 320 : index
    %86 = vector.load %arg12[%c0_43, %c320] : memref<128x384xbf16, #tpu.memory_space<vmem>>, vector<128x32xbf16>
    %cst_44 = arith.constant dense<0.000000e+00> : vector<128x128xf32>
    %87 = tpu.matmul %84, %85, %cst_44 {dimension_numbers = #tpu.dot_dimension_numbers<[1], [1], [0], [0], [0, 0, 1, 0], [], []>} : vector<128x32xbf16>, vector<128x32xbf16>, vector<128x128xf32> -> vector<128x128xf32>
    %88 = vector.broadcast %4 : vector<1x128xf32> to vector<128x128xf32>
    %89 = arith.addf %87, %88 : vector<128x128xf32>
    %cst_45 = arith.constant dense<0xFF800000> : vector<128xf32>
    %90 = vector.multi_reduction <maximumf>, %89, %cst_45 [1] : vector<128x128xf32> to vector<128xf32>
    %91 = vector.shape_cast %90 : vector<128xf32> to vector<128x1xf32>
    %92 = vector.broadcast %91 : vector<128x1xf32> to vector<128x128xf32>
    %93 = arith.subf %89, %92 : vector<128x128xf32>
    %94 = math.exp %93 : vector<128x128xf32>
    %cst_46 = arith.constant dense<0.000000e+00> : vector<128xf32>
    %95 = vector.multi_reduction <add>, %94, %cst_46 [1] : vector<128x128xf32> to vector<128xf32>
    %96 = vector.shape_cast %95 : vector<128xf32> to vector<128x1xf32>
    %97 = tpu.reciprocal %96 {approx = true} : vector<128x1xf32> -> vector<128x1xf32>
    %98 = vector.broadcast %97 : vector<128x1xf32> to vector<128x128xf32>
    %99 = arith.mulf %94, %98 : vector<128x128xf32>
    %100 = arith.truncf %99 : vector<128x128xf32> to vector<128x128xbf16>
    %cst_47 = arith.constant dense<0.000000e+00> : vector<128x32xf32>
    %101 = tpu.matmul %100, %86, %cst_47 {dimension_numbers = #tpu.dot_dimension_numbers<[1], [0], [0], [1], [0, 0, 1, 1], [], []>} : vector<128x128xbf16>, vector<128x32xbf16>, vector<128x32xf32> -> vector<128x32xf32>
    %102 = arith.truncf %101 : vector<128x32xf32> to vector<128x32xbf16>
    %c0_48 = arith.constant 0 : index
    %c64_49 = arith.constant 64 : index
    %103 = vector.load %arg13[%c0_48, %c64_49] : memref<128x128xbf16, #tpu.memory_space<vmem>>, vector<128x32xbf16>
    tpu.vector_store %arg13[%c0_48, %c64_49], %102 {strides = array<i32>} : memref<128x128xbf16, #tpu.memory_space<vmem>>, vector<128x32xbf16>,
    %c0_50 = arith.constant 0 : index
    %c96 = arith.constant 96 : index
    %104 = vector.load %arg12[%c0_50, %c96] : memref<128x384xbf16, #tpu.memory_space<vmem>>, vector<128x32xbf16>
    %c0_51 = arith.constant 0 : index
    %c224 = arith.constant 224 : index
    %105 = vector.load %arg12[%c0_51, %c224] : memref<128x384xbf16, #tpu.memory_space<vmem>>, vector<128x32xbf16>
    %c0_52 = arith.constant 0 : index
    %c352 = arith.constant 352 : index
    %106 = vector.load %arg12[%c0_52, %c352] : memref<128x384xbf16, #tpu.memory_space<vmem>>, vector<128x32xbf16>
    %cst_53 = arith.constant dense<0.000000e+00> : vector<128x128xf32>
    %107 = tpu.matmul %104, %105, %cst_53 {dimension_numbers = #tpu.dot_dimension_numbers<[1], [1], [0], [0], [0, 0, 1, 0], [], []>} : vector<128x32xbf16>, vector<128x32xbf16>, vector<128x128xf32> -> vector<128x128xf32>
    %108 = vector.broadcast %4 : vector<1x128xf32> to vector<128x128xf32>
    %109 = arith.addf %107, %108 : vector<128x128xf32>
    %cst_54 = arith.constant dense<0xFF800000> : vector<128xf32>
    %110 = vector.multi_reduction <maximumf>, %109, %cst_54 [1] : vector<128x128xf32> to vector<128xf32>
    %111 = vector.shape_cast %110 : vector<128xf32> to vector<128x1xf32>
    %112 = vector.broadcast %111 : vector<128x1xf32> to vector<128x128xf32>
    %113 = arith.subf %109, %112 : vector<128x128xf32>
    %114 = math.exp %113 : vector<128x128xf32>
    %cst_55 = arith.constant dense<0.000000e+00> : vector<128xf32>
    %115 = vector.multi_reduction <add>, %114, %cst_55 [1] : vector<128x128xf32> to vector<128xf32>
    %116 = vector.shape_cast %115 : vector<128xf32> to vector<128x1xf32>
    %117 = tpu.reciprocal %116 {approx = true} : vector<128x1xf32> -> vector<128x1xf32>
    %118 = vector.broadcast %117 : vector<128x1xf32> to vector<128x128xf32>
    %119 = arith.mulf %114, %118 : vector<128x128xf32>
    %120 = arith.truncf %119 : vector<128x128xf32> to vector<128x128xbf16>
    %cst_56 = arith.constant dense<0.000000e+00> : vector<128x32xf32>
    %121 = tpu.matmul %120, %106, %cst_56 {dimension_numbers = #tpu.dot_dimension_numbers<[1], [0], [0], [1], [0, 0, 1, 1], [], []>} : vector<128x128xbf16>, vector<128x32xbf16>, vector<128x32xf32> -> vector<128x32xf32>
    %122 = arith.truncf %121 : vector<128x32xf32> to vector<128x32xbf16>
    %c0_57 = arith.constant 0 : index
    %c96_58 = arith.constant 96 : index
    %123 = vector.load %arg13[%c0_57, %c96_58] : memref<128x128xbf16, #tpu.memory_space<vmem>>, vector<128x32xbf16>
    tpu.vector_store %arg13[%c0_57, %c96_58], %122 {strides = array<i32>} : memref<128x128xbf16, #tpu.memory_space<vmem>>, vector<128x32xbf16>,
    %c0_59 = arith.constant 0 : index
    %c0_60 = arith.constant 0 : index
    %124 = vector.load %arg13[%c0_59, %c0_60] : memref<128x128xbf16, #tpu.memory_space<vmem>>, vector<128x128xbf16>
    %c0_61 = arith.constant 0 : index
    %c0_62 = arith.constant 0 : index
    %125 = vector.load %arg5[%c0_61, %c0_62] : memref<128x128xbf16, #tpu.memory_space<vmem>>, vector<128x128xbf16>
    %cst_63 = arith.constant dense<0.000000e+00> : vector<128x128xf32>
    %126 = tpu.matmul %124, %125, %cst_63 {dimension_numbers = #tpu.dot_dimension_numbers<[1], [0], [0], [1], [0, 0, 1, 1], [], []>} : vector<128x128xbf16>, vector<128x128xbf16>, vector<128x128xf32> -> vector<128x128xf32>
    %c0_64 = arith.constant 0 : index
    %c0_65 = arith.constant 0 : index
    %127 = vector.load %arg6[%c0_64, %c0_65] : memref<1x128xf32, #tpu.memory_space<vmem>>, vector<1x128xf32>
    %128 = vector.shape_cast %127 : vector<1x128xf32> to vector<128xf32>
    %129 = vector.shape_cast %128 : vector<128xf32> to vector<1x128xf32>
    %130 = vector.broadcast %129 : vector<1x128xf32> to vector<128x128xf32>
    %131 = arith.addf %126, %130 : vector<128x128xf32>
    %c0_66 = arith.constant 0 : index
    %c0_67 = arith.constant 0 : index
    %132 = vector.load %arg14[%c0_66, %c0_67] : memref<128x128xf32, #tpu.memory_space<vmem>>, vector<128x128xf32>
    %133 = arith.addf %131, %132 : vector<128x128xf32>
    %c0_68 = arith.constant 0 : index
    %c0_69 = arith.constant 0 : index
    %134 = vector.load %arg9[%c0_68, %c0_69] : memref<1x128xf32, #tpu.memory_space<vmem>>, vector<1x128xf32>
    %135 = vector.shape_cast %134 : vector<1x128xf32> to vector<128xf32>
    %c0_70 = arith.constant 0 : index
    %c0_71 = arith.constant 0 : index
    %136 = vector.load %arg10[%c0_70, %c0_71] : memref<1x128xf32, #tpu.memory_space<vmem>>, vector<1x128xf32>
    %137 = vector.shape_cast %136 : vector<1x128xf32> to vector<128xf32>
    %cst_72 = arith.constant dense<0.000000e+00> : vector<128xf32>
    %138 = vector.multi_reduction <add>, %133, %cst_72 [1] : vector<128x128xf32> to vector<128xf32>
    %139 = vector.shape_cast %138 : vector<128xf32> to vector<128x1xf32>
    %cst_73 = arith.constant 1.280000e+02 : f32
    %140 = vector.broadcast %cst_73 : f32 to vector<128x1xf32>
    %141 = arith.divf %139, %140 : vector<128x1xf32>
    %142 = vector.broadcast %141 : vector<128x1xf32> to vector<128x128xf32>
    %143 = arith.subf %133, %142 : vector<128x128xf32>
    %144 = arith.mulf %143, %143 : vector<128x128xf32>
    %cst_74 = arith.constant dense<0.000000e+00> : vector<128xf32>
    %145 = vector.multi_reduction <add>, %144, %cst_74 [1] : vector<128x128xf32> to vector<128xf32>
    %146 = vector.shape_cast %145 : vector<128xf32> to vector<128x1xf32>
    %cst_75 = arith.constant 1.280000e+02 : f32
    %147 = vector.broadcast %cst_75 : f32 to vector<128x1xf32>
    %148 = arith.divf %146, %147 : vector<128x1xf32>
    %149 = vector.broadcast %141 : vector<128x1xf32> to vector<128x128xf32>
    %150 = arith.subf %133, %149 : vector<128x128xf32>
    %cst_76 = arith.constant 9.99999996E-13 : f32
    %151 = vector.broadcast %cst_76 : f32 to vector<128x1xf32>
    %152 = arith.addf %148, %151 : vector<128x1xf32>
    %153 = math.rsqrt %152 : vector<128x1xf32>
    %154 = vector.broadcast %153 : vector<128x1xf32> to vector<128x128xf32>
    %155 = arith.mulf %150, %154 : vector<128x128xf32>
    %156 = vector.shape_cast %135 : vector<128xf32> to vector<1x128xf32>
    %157 = vector.broadcast %156 : vector<1x128xf32> to vector<128x128xf32>
    %158 = arith.mulf %155, %157 : vector<128x128xf32>
    %159 = vector.shape_cast %137 : vector<128xf32> to vector<1x128xf32>
    %160 = vector.broadcast %159 : vector<1x128xf32> to vector<128x128xf32>
    %161 = arith.addf %158, %160 : vector<128x128xf32>
    %c0_77 = arith.constant 0 : index
    %c0_78 = arith.constant 0 : index
    %c0_79 = arith.constant 0 : index
    %162 = vector.load %arg11[%c0_77, %c0_78, %c0_79] : memref<1x128x128xf32, #tpu.memory_space<vmem>>, vector<1x128x128xf32>
    %163 = vector.shape_cast %162 : vector<1x128x128xf32> to vector<128x128xf32>
    %164 = vector.shape_cast %161 : vector<128x128xf32> to vector<1x128x128xf32>
    tpu.vector_store %arg11[%c0_77, %c0_78, %c0_79], %164 {strides = array<i32>} : memref<1x128x128xf32, #tpu.memory_space<vmem>>, vector<1x128x128xf32>,
    return
  }
  func.func @transform_0(%arg0: i32) -> (i32, i32, i32) {
    %c0_i32 = arith.constant 0 : i32
    %c0_i32_0 = arith.constant 0 : i32
    %c0_i32_1 = arith.constant 0 : i32
    return %arg0, %c0_i32, %c0_i32_0 : i32, i32, i32
  }
  func.func @transform_1(%arg0: i32) -> (i32, i32, i32) {
    %c0_i32 = arith.constant 0 : i32
    %c0_i32_0 = arith.constant 0 : i32
    %c0_i32_1 = arith.constant 0 : i32
    return %arg0, %c0_i32, %c0_i32_0 : i32, i32, i32
  }
  func.func @transform_2(%arg0: i32) -> (i32, i32) {
    %c0_i32 = arith.constant 0 : i32
    %c0_i32_0 = arith.constant 0 : i32
    %c0_i32_1 = arith.constant 0 : i32
    return %c0_i32, %c0_i32_0 : i32, i32
  }
  func.func @transform_3(%arg0: i32) -> (i32, i32) {
    %c0_i32 = arith.constant 0 : i32
    %c0_i32_0 = arith.constant 0 : i32
    %c0_i32_1 = arith.constant 0 : i32
    return %c0_i32, %c0_i32_0 : i32, i32
  }
  func.func @transform_4(%arg0: i32) -> (i32, i32) {
    %c0_i32 = arith.constant 0 : i32
    %c0_i32_0 = arith.constant 0 : i32
    %c0_i32_1 = arith.constant 0 : i32
    return %c0_i32, %c0_i32_0 : i32, i32
  }
  func.func @transform_5(%arg0: i32) -> (i32, i32) {
    %c0_i32 = arith.constant 0 : i32
    %c0_i32_0 = arith.constant 0 : i32
    %c0_i32_1 = arith.constant 0 : i32
    return %c0_i32, %c0_i32_0 : i32, i32
  }
  func.func @transform_6(%arg0: i32) -> (i32, i32) {
    %c0_i32 = arith.constant 0 : i32
    %c0_i32_0 = arith.constant 0 : i32
    %c0_i32_1 = arith.constant 0 : i32
    return %c0_i32, %c0_i32_0 : i32, i32
  }
  func.func @transform_7(%arg0: i32) -> (i32, i32) {
    %c0_i32 = arith.constant 0 : i32
    %c0_i32_0 = arith.constant 0 : i32
    %c0_i32_1 = arith.constant 0 : i32
    return %c0_i32, %c0_i32_0 : i32, i32
  }
  func.func @transform_8(%arg0: i32) -> (i32, i32) {
    %c0_i32 = arith.constant 0 : i32
    %c0_i32_0 = arith.constant 0 : i32
    %c0_i32_1 = arith.constant 0 : i32
    return %c0_i32, %c0_i32_0 : i32, i32
  }
  func.func @transform_9(%arg0: i32) -> (i32, i32) {
    %c0_i32 = arith.constant 0 : i32
    %c0_i32_0 = arith.constant 0 : i32
    %c0_i32_1 = arith.constant 0 : i32
    return %c0_i32, %c0_i32_0 : i32, i32
  }
  func.func @transform_10(%arg0: i32) -> (i32, i32, i32) {
    %c0_i32 = arith.constant 0 : i32
    %c0_i32_0 = arith.constant 0 : i32
    %c0_i32_1 = arith.constant 0 : i32
    return %arg0, %c0_i32, %c0_i32_0 : i32, i32, i32
  }
}

</mosaic_0001>

<bundles_post_ra>
// kernel: tpu_custom_call.1
= control target key start
LH: loop header
LB: loop body
LE: loop exit
PB: predicated region body
PF: predicated region fallthrough
CT: control target
= control target key end

     0   :  { %s8288_s0 = inlined_call_operand.hbm [shape: bf16[2,128,128], index: 0, kind: input, shape index: {}]   ;;  %s8289_s1 = inlined_call_operand.hbm [shape: f32[2,1,128], index: 1, kind: input, shape index: {}]   ;;  %s8290_s2 = inlined_call_operand.hbm [shape: bf16[128,384], index: 2, kind: input, shape index: {}]   ;;  %s8291_s3 = inlined_call_operand.vmem [shape: f32[1,384], index: 3, kind: input, shape index: {}]   ;;  %s8292_s4 = inlined_call_operand.hbm [shape: bf16[128,128], index: 4, kind: input, shape index: {}]   ;;  %s8293_s5 = inlined_call_operand.vmem [shape: f32[1,128], index: 5, kind: input, shape index: {}]   ;;  %s8294_s6 = inlined_call_operand.vmem [shape: f32[1,128], index: 6, kind: input, shape index: {}]   ;;  %s8295_s7 = inlined_call_operand.vmem [shape: f32[1,128], index: 7, kind: input, shape index: {}]   ;;  %s8296_s8 = inlined_call_operand.vmem [shape: f32[1,128], index: 8, kind: input, shape index: {}]   ;;  %s8297_s9 = inlined_call_operand.vmem [shape: f32[1,128], index: 9, kind: input, shape index: {}]   ;;  %s8298_s10 = inlined_call_operand.hbm [shape: f32[2,128,128], index: 10, kind: output, shape index: {}]  }
   0x1   :  { %8327 = sst [smem:[#allocation42_spill]] %s8288_s0 }
   0x2   :  { %8328 = sst [smem:[#allocation43_spill]] %s8290_s2 }
   0x3   :  { %8329 = sst [smem:[#allocation44_spill]] %s8292_s4 }
   0x4   :  { %8330 = sst [smem:[#allocation45_spill]] %s8298_s10 }
   0x5   :  { %15 = vsyncpa [#allocation6], 0 }
   0x6   :  { %17 = vsyncpa [#allocation6 + $0x1], 0 }
   0x7   :  { %18 = vsyncpa [#allocation9], 0 }
   0x8   :  { %20 = vsyncpa [#allocation9 + $0x1], 0 }
   0x9   :  { %21 = vsyncpa [#allocation12], 0 }
   0xa   :  { %22 = vsyncpa [#allocation7], 0 }
   0xb   :  { %24 = vsyncpa [#allocation7 + $0x1], 0  ;;  %s6537_s13 = smov 0   ;;  %s6539_s14 = smov 0  }
   0xc   :  { %s6541_s15 = smov 0   ;;  %s6543_s16 = smov 0  }
   0xd LB: > { %8331 = sst [smem:[#allocation19_spill]] %s6453_s13  ;;  %s6558_s17 = sadd.s32 4294967295, %s6465_s16   ;;  %s6465_s16 = sphi %s6543_s16, %s8398_s16   ;;  %s6461_s15 = sphi %s6541_s15, %s8400_s15   ;;  %s6457_s14 = sphi %s6539_s14, %s8402_s14   ;;  %s6453_s13 = sphi %s6537_s13, %s8401_s13  }
   0xe   : > { %8332 = sst [smem:[#allocation20_spill]] %s6461_s15  ;;  %s4780_s18 = sadd.s32 4294967294, %s6465_s16  }
   0xf   : > { %p50_p0 = scmp.ne.s32.totalorder %s6457_s14, %s6453_s13  ;;  %p8299_p1 = scmp.eq.s32.totalorder %s6558_s17, 0 }
  0x10   : > { %p274_p3 = scmp.eq.s32.totalorder %s4780_s18, 1  ;;  %p4781_p5 = scmp.ge.s32.totalorder %s6465_s16, 1 }
  0x11   : > { %p6567_p4 = por %p8299_p1, %p50_p0  ;;  %p281_p7 = scmp.lt.s32.totalorder %s6465_s16, 3 }
  0x12   : > { %p6572_p6 = por %p274_p3, %p50_p0  ;;  %s6467_s22 = smov [#allocation10]  }
  0x13   : > { %s8333_s19 = scalar_select %p6567_p4, 1, 0 }
  0x14   : > { %s8334_s20 = scalar_select %p6572_p6, 1, 0 }
  0x15   : > { %p6577_p8 = pnand %p4781_p5, %p281_p7  ;;  %s293_s23 = sshll.u32 %s6467_s22, 4  ;;  %s294_s23 = int_to_ptr.vmem [resolvable:$true] %s293_s23 }
  0x16   : > { %8335 = sst [smem:[#allocation21_spill]] %s8334_s20  ;;  %s6468_s25 = smov [#allocation11]  }
  0x17   : > { %s8336_s21 = scalar_select %p6577_p8, 1, 0 }
  0x18   : > { %p5748_p9 = pneg %p6577_p8  ;;  %s309_s26 = sshll.u32 %s6468_s25, 4  ;;  %s310_s26 = int_to_ptr.vmem [resolvable:$true] %s309_s26 }
  0x19   : > { %s6292_s27 = scalar_lea.vmem %s294_s23, 3072  ;;  %p6300_p5 = scmp.lt.s32.totalorder %s294_s23, %s294_s23 }
  0x1a   : > { %p6586_p11 = pnand %p5748_p9, %p8299_p1  ;;  %p6293_p13 = scmp.ne.s32.totalorder %s294_s23, %s6292_s27 }
  0x1b   : > { %p6301_p7 = scmp.lt.s32.totalorder %s6292_s27, %s6292_s27 }
  0x1c   : > { %p6283_p12 = pneg %p6586_p11 }
  0x1d   : > { %p6302_p10 = por %p6301_p7, %p6300_p5 }
  0x1e   : > { %p6295_p0 = pnand %p6293_p13, %p6283_p12 }
  0x20   : > { %p6296_p3 = pneg %p6295_p0 }
  0x22   : > { %p6303_p9 = pnand %p6302_p10, %p6296_p3 }
  0x24   : > { %6306 = shalt.err (!%p6303_p9)
}
  0x25   : > { %s6469_s28 = smov 192   ;;  %s6470_s29 = smov 12  }
  0x26   : > { %s8338_s2 = sld [smem:[#allocation43_spill]]  ;;  %s6318_s12 = scalar_lea.vmem %s310_s26, 1024 }
  0x27   : > { %p6319_p1 = scmp.ne.s32.totalorder %s310_s26, %s6318_s12  ;;  %p6326_p2 = scmp.lt.s32.totalorder %s310_s26, %s310_s26 }
  0x28   : > { %p6327_p6 = scmp.lt.s32.totalorder %s6318_s12, %s6318_s12 }
  0x29   : > { %p6321_p13 = pnand %p6319_p1, %p6283_p12 }
  0x2a   : > { %p6328_p5 = por %p6327_p6, %p6326_p2 }
  0x2b   : > { %p6322_p0 = pneg %p6321_p13 }
  0x2c   : > { %5751 = dma.hbm_to_vmem [thread:$0]  (!%p6586_p11), %s8338_s2, 3072, %s294_s23, [#allocation9], %s6469_s28, %s6469_s28, %s6470_s29  }
  0x2d   : > { %p6329_p10 = pnand %p6328_p5, %p6322_p0 }
  0x2f   : > { %6332 = shalt.err (!%p6329_p10)
}
  0x30   : > { %s8300_s18 = smov 64   ;;  %s8301_s22 = smov 4  }
  0x31   : > { %s8339_s4 = sld [smem:[#allocation44_spill]]  ;;  %s6612_s27 = sadd.s32 1, %s6465_s16  }
  0x32   : > { %8340 = sst [smem:[#allocation22_spill]] %s6612_s27  ;;  %s34_s28 = ssub.s32 %s6465_s16, %s6612_s27 }
  0x33   : > { %p35_p1 = scmp.eq.s32.totalorder %s34_s28, 0  ;;  %s37_s29 = sadd.s32 1, %s6461_s15 }
  0x34   : > { %p44_p2 = scmp.ne.s32.totalorder %s6461_s15, %s6457_s14  ;;  %p45_p6 = scmp.eq.s32.totalorder %s6465_s16, 0 }
  0x35   : > { %s6621_s30 = scalar_select %p35_p1, %s6461_s15, %s37_s29  }
  0x36   : > { %p46_p12 = por %p45_p6, %p44_p2  ;;  %p8342_p3 = scmp.eq.s32.totalorder %s6558_s17, 1 }
  0x37   : > { %5754 = dma.hbm_to_vmem [thread:$0]  (!%p6586_p11), %s8339_s4, 1024, %s310_s26, [#allocation12], %s8300_s18, %s8300_s18, %s8301_s22  }
  0x38   : > { %8341 = sst [smem:[#allocation23_spill]] %s6621_s30  ;;  %p6625_p7 = por %p8342_p3, %p44_p2 }
  0x39   : > { %p5768_p9 = scmp.lt.s32.totalorder %s6465_s16, 2  ;;  %s6631_s11 = sand.u32 1, %s6461_s15  }
  0x3a   : > { %s8343_s24 = scalar_select %p6625_p7, 1, 0 }
  0x3b   : > { %s4785_s26 = sshll.u32 %s6631_s11, 6  ;;  %s5069_s12 = sshll.u32 %s6465_s16, 10 }
  0x3c   : > { %s8344_s0 = sld [smem:[#allocation42_spill]]  ;;  %s342_s29 = scalar_lea.vmem [#allocation5], %s4785_s26 }
  0x3d   : > { %s349_s18 = sshll.u32 %s342_s29, 4  ;;  %p6642_p11 = pnand %p5768_p9, %p46_p12  ;;  %s6640_s18 = int_to_ptr.vmem [resolvable:$true] %s349_s18 }
  0x3f   : > { %p6335_p0 = pneg %p6642_p11 }
  0x42   : > { %s6638_s28 = scalar_lea.hbm %s8344_s0, %s5069_s12  ;;  %s6338_s23 = scalar_lea.hbm %s8344_s0, 2048 }
  0x43   : > { %s6333_s30 = scalar_lea.hbm %s6638_s28, 1024  ;;  %p6339_p1 = scmp.lt.s32.totalorder %s6638_s28, %s8344_s0 }
  0x44   : > { %p6334_p13 = scmp.ne.s32.totalorder %s6638_s28, %s6333_s30  ;;  %p6340_p2 = scmp.lt.s32.totalorder %s6338_s23, %s6333_s30 }
  0x46   : > { %p6336_p5 = pnand %p6335_p0, %p6334_p13  ;;  %p6341_p6 = por %p6340_p2, %p6339_p1 }
  0x48   : > { %p6337_p10 = pneg %p6336_p5 }
  0x4a   : > { %p6342_p12 = pnand %p6341_p6, %p6337_p10 }
  0x4c   : > { %6345 = shalt.err (!%p6342_p12)
}
  0x4d   : > { %s6346_s2 = scalar_lea.vmem %s6640_s18, 1024  ;;  %s6473_s26 = smov [#allocation5]  }
  0x4e   : > { %p6347_p3 = scmp.ne.s32.totalorder %s6640_s18, %s6346_s2  ;;  %s6351_s12 = sshll.u32 %s6473_s26, 4  ;;  %s6352_s12 = int_to_ptr.vmem [resolvable:$false] %s6351_s12 }
  0x4f   : > { %s6353_s4 = scalar_lea.vmem %s6352_s12, 2048  ;;  %p6354_p5 = scmp.lt.s32.totalorder %s6640_s18, %s6352_s12 }
  0x50   : > { %p6349_p9 = pnand %p6347_p3, %p6335_p0  ;;  %p6355_p7 = scmp.lt.s32.totalorder %s6353_s4, %s6346_s2 }
  0x52   : > { %p6350_p13 = pneg %p6349_p9  ;;  %p6356_p4 = por %p6355_p7, %p6354_p5 }
  0x54   : > { %p6357_p1 = pnand %p6356_p4, %p6350_p13 }
  0x56   : > { %6360 = shalt.err (!%p6357_p1)
}
  0x57   : > { %s8346_s30 = smov 4   ;;  %s8347_s23 = smov 64  }
  0x58   : > { %s8348_s25 = scalar_lea.sflag [#allocation6], %s6631_s11  ;;  %s4788_s29 = sshll.u32 %s6465_s16, 4 }
  0x59   : > { %5758 = dma.hbm_to_vmem [thread:$0]  (!%p6642_p11), %s6638_s28, 1024, %s6640_s18, %s8348_s25, %s8347_s23, %s8347_s23, %s8346_s30  }
  0x5a   : > { %s362_s26 = scalar_lea.vmem [#allocation8], %s6631_s11  ;;  %s367_s0 = scalar_lea.hbm %s8289_s1, %s4788_s29 }
  0x5b   : > { %s369_s2 = sshll.u32 %s362_s26, 4  ;;  %s8349_s15 = sand.u32 1, %s6465_s16   ;;  %s370_s2 = int_to_ptr.vmem [resolvable:$true] %s369_s2 }
  0x5c   : > { %s360_s27 = scalar_lea.sflag [#allocation9], %s8349_s15  ;;  %s6361_s20 = scalar_lea.hbm %s367_s0, 16 }
  0x5d   : > { %p6362_p4 = scmp.ne.s32.totalorder %s367_s0, %s6361_s20  ;;  %s6366_s18 = scalar_lea.hbm %s8289_s1, 32 }
  0x5e   : > { %p6367_p2 = scmp.lt.s32.totalorder %s367_s0, %s8289_s1  ;;  %p6368_p6 = scmp.lt.s32.totalorder %s6366_s18, %s6361_s20 }
  0x5f   : > { %p6364_p7 = pnand %p6362_p4, %p6335_p0 }
  0x60   : > { %p6369_p12 = por %p6368_p6, %p6367_p2 }
  0x61   : > { %p6365_p10 = pneg %p6364_p7 }
  0x63   : > { %p6370_p3 = pnand %p6369_p12, %p6365_p10 }
  0x65   : > { %6373 = shalt.err (!%p6370_p3)
}
  0x66   : > { %s6374_s30 = scalar_lea.vmem %s370_s2, 16  ;;  %s6474_s15 = smov [#allocation8]  }
  0x67   : > { %p6375_p9 = scmp.ne.s32.totalorder %s370_s2, %s6374_s30  ;;  %s6379_s23 = sshll.u32 %s6474_s15, 4  ;;  %s6380_s23 = int_to_ptr.vmem [resolvable:$false] %s6379_s23 }
  0x68   : > { %s6381_s10 = scalar_lea.vmem %s6380_s23, 32  ;;  %p6382_p1 = scmp.lt.s32.totalorder %s370_s2, %s6380_s23 }
  0x69   : > { %p6377_p13 = pnand %p6375_p9, %p6335_p0  ;;  %p6383_p4 = scmp.lt.s32.totalorder %s6381_s10, %s6374_s30 }
  0x6b   : > { %p6378_p5 = pneg %p6377_p13  ;;  %p6384_p7 = por %p6383_p4, %p6382_p1 }
  0x6d   : > { %p6385_p8 = pnand %p6384_p7, %p6378_p5 }
  0x6f   : > { %6388 = shalt.err (!%p6385_p8)
}
  0x70   : > { %5761 = dma.hbm_to_vmem [thread:$0]  (!%p6642_p11), %s367_s0, 16, %s370_s2, %s360_s27  }
  0x71   : > { %p8350_p10 = scmp.ne.s32.totalorder %s8336_s21, 0 }
  0x73   : > { %378 = sbr.rel (%p8350_p10) target bundleno = 4047 (0xfcf), region = 60 }
  0x78   : > { %s6701_s13 = sand.u32 1, %s6457_s14   ;;  %p8351_p0 = scmp.ne.s32.totalorder %s8333_s19, 0 }
  0x79   : > { %s4790_s20 = sshll.u32 %s6701_s13, 6  ;;  %s381_s25 = scalar_lea.sflag [#allocation6], %s6701_s13 }
  0x7a   : > { %s6705_s29 = scalar_lea.vmem [#allocation5], %s4790_s20 }
  0x7b   : > { %6432 = dma.done.wait (%p8351_p0), %s381_s25, 1024  }
  0x7c   : > { %6434 = vsyncadd (%p8351_p0), %s381_s25, 4294966272  ;;  %s389_s0 = sand.u32 1, %s6558_s17   ;;  %s392_s22 = scalar_lea.vmem [#allocation8], %s6701_s13 }
  0x7d   : > { %s390_s21 = scalar_lea.sflag [#allocation9], %s389_s0 }
  0x7e   : > { %6436 = dma.done.wait (%p8351_p0), %s390_s21, 16  }
  0x7f   : > { %6438 = vsyncadd (%p8351_p0), %s390_s21, 4294967280  ;;  %p8352_p8 = scmp.eq.s32.totalorder %s6558_s17, 0 }
  0x81   : > { %6440 = dma.done.wait (%p8352_p8), [#allocation9], 3072   ;;  %p8353_p11 = pmov %p8352_p8 }
  0x82   : > { %p8354_p2 = pmov %p8352_p8 }
  0x83   : > { %6442 = vsyncadd (%p8353_p11), [#allocation9], 4294964224 }
  0x84   : > { %6444 = dma.done.wait (%p8354_p2), [#allocation12], 1024   ;;  %p8355_p6 = pmov %p8354_p2 }
  0x85   : > { %v5168_v0 = vld [vmem:[%s6705_s29] sm:$0xff]   ;;  %v5199_v1 = vld [vmem:[%s6705_s29 + $0x8] sm:$0xff]   ;;  %v6728_v4 = vld [vmem:[%s6705_s29 + $0x10] sm:$0xff]   ;;  %vm1435_vm0 = vcmask 261120   ;;  %s6476_s18 = smov 96   ;;  %vm1942_vm1 = vcmask 257024  }
  0x86   : > { %6446 = vsyncadd (%p8355_p6), [#allocation12], 4294966272  ;;  %v5169_v2 = vunpack.c.l.bf16 %v5168_v0  ;;  %v5173_v3 = vunpack.c.l.bf16 %v5199_v1  ;;  %v5170_v5 = vunpack.c.h.bf16 %v5168_v0  ;;  %v5174_v6 = vunpack.c.h.bf16 %v5199_v1  ;;  %v6731_v7 = vld [vmem:[%s6705_s29 + $0x18] sm:$0xff]   ;;  %v6736_v10 = vld [vmem:[%s6705_s29 + $0x20] sm:$0xff]   ;;  %s6477_s28 = smov 64   ;;  %s6478_s11 = smov 32  }
  0x87   : > { %v5177_v8 = vunpack.c.l.bf16 %v6728_v4  ;;  %v5178_v9 = vunpack.c.h.bf16 %v6728_v4  ;;  %v5181_v11 = vunpack.c.l.bf16 %v6731_v7  ;;  %v5182_v12 = vunpack.c.h.bf16 %v6731_v7  ;;  %v6741_v13 = vld [vmem:[%s6705_s29 + $0x28] sm:$0xff]   ;;  %v6752_v18 = vld [vmem:[%s6705_s29 + $0x30] sm:$0xff]   ;;  %v6761_v21 = vld [vmem:[%s6705_s29 + $0x38] sm:$0xff]   ;;  %s4793_s20 = sshll.u32 %s6701_s13, 7  ;;  %s5166_s21 = sshll.u32 %s6558_s17, 11 }
  0x88   : > { %477 = vadd.xlane.f32.xlu0 %v5169_v2  ;;  %481 = vadd.xlane.f32.xlu1 %v5173_v3  ;;  %v5185_v14 = vunpack.c.l.bf16 %v6736_v10  ;;  %v5186_v15 = vunpack.c.h.bf16 %v6736_v10  ;;  %v5189_v16 = vunpack.c.l.bf16 %v6741_v13  ;;  %v5190_v17 = vunpack.c.h.bf16 %v6741_v13  ;;  %v5816_v24 = vld [vmem:[#allocation10 + $0xac] ss:$12 sps:$4 sm:$0xff]   ;;  %v5818_v25 = vld [vmem:[#allocation10 + $0xa8] ss:$12 sps:$4 sm:$0xff]   ;;  %v5821_v62 = vld [vmem:[#allocation10 + $0xb0] ss:$12 sps:$4 sm:$0xff]  }
  0x89   : > { %v5193_v19 = vunpack.c.l.bf16 %v6752_v18  ;;  %v5194_v20 = vunpack.c.h.bf16 %v6752_v18  ;;  %v5197_v22 = vunpack.c.l.bf16 %v6761_v21  ;;  %v5198_v23 = vunpack.c.h.bf16 %v6761_v21  ;;  %899 = vmatprep.subr.bf16.mxu0 %v5816_v24  ;;  %v5819_v61 = vld [vmem:[#allocation10 + $0x94] ss:$12 sps:$4 sm:$0xff]   ;;  %v5822_v63 = vld [vmem:[#allocation10 + $0x90] ss:$12 sps:$4 sm:$0xff]   ;;  %5366 = vmatprep.subr.bf16.mxu1 %v5821_v62  ;;  %s8176_s0 = scalar_lea.vmem [#allocation13], %s4793_s20  ;;  %s8392_s26 = sld [smem:[#allocation45_spill]] }
  0x8a   : > { %900 = vmatpush1.bf16.msra.mxu0 %v5818_v25  ;;  %5367 = vmatpush3.bf16.msra.mxu1 %v5821_v62  ;;  %v5839_v21 = vld [vmem:[#allocation10 + $0x1c] ss:$12 sps:$4 sm:$0xff]   ;;  %vm2673_vm2 = vcmask 519424   ;;  %vm3404_vm3 = vcmask 781824   ;;  %vm4135_vm4 = vcmask 1044224   ;;  %s4655_s17 = scalar_lea.sflag [#allocation7], %s6701_s13 }
  0x8b   : > { %901 = vmatprep.subr.bf16.mxu0 %v5819_v61  ;;  %p8393_p3 = scmp.ne.s32.totalorder %s8343_s24, 0  ;;  %s6479_s12 = smov [#allocation13]  }
  0x8c   : > { %479 = vadd.xlane.f32.xlu0 %v5170_v5  ;;  %483 = vadd.xlane.f32.xlu1 %v5174_v6 }
  0x8e   : > { %902 = vmatpush1.bf16.msra.mxu0 %v5822_v63 }
  0x8f   : > { %s8241_s2 = scalar_lea.hbm %s8392_s26, %s5166_s21 }
  0x90   : > { %485 = vadd.xlane.f32.xlu0 %v5177_v8  ;;  %487 = vadd.xlane.f32.xlu1 %v5178_v9 }
  0x94   : > { %489 = vadd.xlane.f32.xlu0 %v5181_v11  ;;  %491 = vadd.xlane.f32.xlu1 %v5182_v12 }
  0x98   : > { %493 = vadd.xlane.f32.xlu0 %v5185_v14  ;;  %495 = vadd.xlane.f32.xlu1 %v5186_v15 }
  0x9c   : > { %497 = vadd.xlane.f32.xlu0 %v5189_v16  ;;  %499 = vadd.xlane.f32.xlu1 %v5190_v17 }
  0xa0   : > { %501 = vadd.xlane.f32.xlu0 %v5193_v19  ;;  %503 = vadd.xlane.f32.xlu1 %v5194_v20 }
  0xa4   : > { %505 = vadd.xlane.f32.xlu0 %v5197_v22  ;;  %507 = vadd.xlane.f32.xlu1 %v5198_v23 }
 0x111   : > { %v478_v26 = vpop.xlane.xlu0 %477  ;;  %v482_v27 = vpop.xlane.xlu1 %481 }
 0x112   : > { %v510_v28 = vmul.f32 0.0078125, %v478_v26  ;;  %v512_v29 = vmul.f32 0.0078125, %v482_v27 }
 0x114   : > { %v6773_v30 = vsub.f32 %v5169_v2, %v510_v28  ;;  %v6775_v31 = vsub.f32 %v5173_v3, %v512_v29  ;;  %v5827_v28 = vld [vmem:[#allocation10 + $0x64] ss:$12 sps:$4 sm:$0xff]   ;;  %v5829_v29 = vld [vmem:[#allocation10 + $0x80] ss:$12 sps:$4 sm:$0xff]  }
 0x115   : > { %v480_v32 = vpop.xlane.xlu0 %479  ;;  %v484_v33 = vpop.xlane.xlu1 %483 }
 0x116   : > { %v511_v34 = vmul.f32 0.0078125, %v480_v32  ;;  %v542_v35 = vmul.f32 %v6773_v30, %v6773_v30  ;;  %v513_v36 = vmul.f32 0.0078125, %v484_v33  ;;  %v544_v37 = vmul.f32 %v6775_v31, %v6775_v31  ;;  %v5830_v32 = vld [vmem:[#allocation10 + $0x60] ss:$12 sps:$4 sm:$0xff]  }
 0x118   : > { %558 = vadd.xlane.f32.xlu0 %v542_v35  ;;  %v6781_v38 = vsub.f32 %v5170_v5, %v511_v34  ;;  %v6783_v39 = vsub.f32 %v5174_v6, %v513_v36 }
 0x119   : > { %v486_v40 = vpop.xlane.xlu0 %485  ;;  %v488_v41 = vpop.xlane.xlu1 %487 }
 0x11a   : > { %v514_v42 = vmul.f32 0.0078125, %v486_v40  ;;  %v543_v43 = vmul.f32 %v6781_v38, %v6781_v38  ;;  %v515_v44 = vmul.f32 0.0078125, %v488_v41  ;;  %v545_v45 = vmul.f32 %v6783_v39, %v6783_v39  ;;  %v5831_v40 = vld [vmem:[#allocation10 + $0x4c] ss:$12 sps:$4 sm:$0xff]   ;;  %v5833_v41 = vld [vmem:[#allocation10 + $0x68] ss:$12 sps:$4 sm:$0xff]  }
 0x11c   : > { %562 = vadd.xlane.f32.xlu0 %v544_v37  ;;  %560 = vadd.xlane.f32.xlu1 %v543_v43  ;;  %v6789_v46 = vsub.f32 %v5177_v8, %v514_v42  ;;  %v6791_v47 = vsub.f32 %v5178_v9, %v515_v44  ;;  %v5823_v8 = vld [vmem:[#allocation10 + $0x7c] ss:$12 sps:$4 sm:$0xff]   ;;  %v5825_v9 = vld [vmem:[#allocation10 + $0x98] ss:$12 sps:$4 sm:$0xff]   ;;  %v5835_v44 = vld [vmem:[#allocation10 + $0x34] ss:$12 sps:$4 sm:$0xff]  }
 0x11d   : > { %v490_v48 = vpop.xlane.xlu0 %489  ;;  %v492_v49 = vpop.xlane.xlu1 %491  ;;  %903 = vmatprep.subr.bf16.mxu0 %v5823_v8  ;;  %5368 = vmatprep.subr.bf16.mxu1 %v5825_v9  ;;  %v5834_v42 = vld [vmem:[#allocation10 + $0x48] ss:$12 sps:$4 sm:$0xff]  }
 0x11e   : > { %v516_v50 = vmul.f32 0.0078125, %v490_v48  ;;  %v546_v51 = vmul.f32 %v6789_v46, %v6789_v46  ;;  %v517_v52 = vmul.f32 0.0078125, %v492_v49  ;;  %v547_v53 = vmul.f32 %v6791_v47, %v6791_v47  ;;  %5369 = vmatpush3.bf16.msra.mxu1 %v5825_v9  ;;  %v5838_v48 = vld [vmem:[#allocation10 + $0x30] ss:$12 sps:$4 sm:$0xff]   ;;  %v5842_v49 = vld [vmem:[#allocation10 + $0x18] ss:$12 sps:$4 sm:$0xff]  }
 0x11f   : > { %5370 = vmatprep.subr.bf16.mxu1 %v5829_v29 }
 0x120   : > { %564 = vadd.xlane.f32.xlu1 %v545_v45  ;;  %566 = vadd.xlane.f32.xlu0 %v546_v51  ;;  %v6797_v54 = vsub.f32 %v5181_v11, %v516_v50  ;;  %v6799_v55 = vsub.f32 %v5182_v12, %v517_v52  ;;  %v5837_v45 = vld [vmem:[#allocation10 + $0x50] ss:$12 sps:$4 sm:$0xff]   ;;  %v5845_v51 = vld [vmem:[#allocation10 + $0x20] ss:$12 sps:$4 sm:$0xff]  }
 0x121   : > { %v494_v56 = vpop.xlane.xlu0 %493  ;;  %v496_v57 = vpop.xlane.xlu1 %495  ;;  %v5843_v50 = vld [vmem:[#allocation10 + $0x4] ss:$12 sps:$4 sm:$0xff]   ;;  %v5846_v52 = vld [vmem:[#allocation10] ss:$12 sps:$4 sm:$0xff]  }
 0x122   : > { %v518_v58 = vmul.f32 0.0078125, %v494_v56  ;;  %v548_v59 = vmul.f32 %v6797_v54, %v6797_v54  ;;  %v519_v60 = vmul.f32 0.0078125, %v496_v57  ;;  %v549_v0 = vmul.f32 %v6799_v55, %v6799_v55  ;;  %5371 = vmatpush3.bf16.msra.mxu1 %v5829_v29 }
 0x123   : > { %5372 = vmatprep.subr.bf16.mxu1 %v5833_v41  ;;  %v6475_v56 = vmov 0  }
 0x124   : > { %568 = vadd.xlane.f32.xlu1 %v547_v53  ;;  %570 = vadd.xlane.f32.xlu0 %v548_v59  ;;  %v6807_v1 = vsub.f32 %v5185_v14, %v518_v58  ;;  %v6811_v2 = vsub.f32 %v5186_v15, %v519_v60  ;;  %v5826_v14 = vld [vmem:[#allocation10 + $0x78] ss:$12 sps:$4 sm:$0xff]   ;;  %v5847_v53 = vld [vmem:[#allocation10 + $0x8] ss:$12 sps:$4 sm:$0xff]  }
 0x125   : > { %v498_v3 = vpop.xlane.xlu0 %497  ;;  %v500_v4 = vpop.xlane.xlu1 %499  ;;  %904 = vmatpush1.bf16.msra.mxu0 %v5826_v14  ;;  %931 = vmatprep.mubr.bf16.mxu0 %v6475_v56 }
 0x126   : > { %v520_v5 = vmul.f32 0.0078125, %v498_v3  ;;  %v550_v6 = vmul.f32 %v6807_v1, %v6807_v1  ;;  %v521_v7 = vmul.f32 0.0078125, %v500_v4  ;;  %v551_v10 = vmul.f32 %v6811_v2, %v6811_v2  ;;  %905 = vmatprep.subr.bf16.mxu0 %v5827_v28  ;;  %5373 = vmatpush3.bf16.msra.mxu1 %v5833_v41 }
 0x127   : > { %5374 = vmatprep.subr.bf16.mxu1 %v5837_v45 }
 0x128   : > { %572 = vadd.xlane.f32.xlu1 %v549_v0  ;;  %574 = vadd.xlane.f32.xlu0 %v550_v6  ;;  %v6819_v11 = vsub.f32 %v5189_v16, %v520_v5  ;;  %v6823_v12 = vsub.f32 %v5190_v17, %v521_v7 }
 0x129   : > { %v502_v15 = vpop.xlane.xlu0 %501  ;;  %v504_v24 = vpop.xlane.xlu1 %503  ;;  %906 = vmatpush1.bf16.msra.mxu0 %v5830_v32 }
 0x12a   : > { %v522_v25 = vmul.f32 0.0078125, %v502_v15  ;;  %v552_v26 = vmul.f32 %v6819_v11, %v6819_v11  ;;  %v523_v27 = vmul.f32 0.0078125, %v504_v24  ;;  %v553_v13 = vmul.f32 %v6823_v12, %v6823_v12  ;;  %907 = vmatprep.subr.bf16.mxu0 %v5831_v40  ;;  %5375 = vmatpush3.bf16.msra.mxu1 %v5837_v45 }
 0x12c   : > { %576 = vadd.xlane.f32.xlu1 %v551_v10  ;;  %578 = vadd.xlane.f32.xlu0 %v552_v26  ;;  %v6831_v16 = vsub.f32 %v5193_v19, %v522_v25  ;;  %v6835_v17 = vsub.f32 %v5194_v20, %v523_v27 }
 0x12d   : > { %v506_v33 = vpop.xlane.xlu0 %505  ;;  %v508_v34 = vpop.xlane.xlu1 %507  ;;  %908 = vmatpush1.bf16.msra.mxu0 %v5834_v42 }
 0x12e   : > { %v524_v35 = vmul.f32 0.0078125, %v506_v33  ;;  %v554_v36 = vmul.f32 %v6831_v16, %v6831_v16  ;;  %v525_v37 = vmul.f32 0.0078125, %v508_v34  ;;  %v555_v18 = vmul.f32 %v6835_v17, %v6835_v17  ;;  %909 = vmatprep.subr.bf16.mxu0 %v5835_v44 }
 0x130   : > { %580 = vadd.xlane.f32.xlu1 %v553_v13  ;;  %582 = vadd.xlane.f32.xlu0 %v554_v36  ;;  %v6843_v19 = vsub.f32 %v5197_v22, %v524_v35  ;;  %v6847_v20 = vsub.f32 %v5198_v23, %v525_v37  ;;  %v5841_v23 = vld [vmem:[#allocation10 + $0x38] ss:$12 sps:$4 sm:$0xff]   ;;  %v6857_v35 = vld [vmem:[%s8294_s6] ss:$0 sm:$0xff] }
 0x131   : > { %910 = vmatpush1.bf16.msra.mxu0 %v5838_v48  ;;  %5376 = vmatprep.subr.bf16.mxu1 %v5841_v23  ;;  %v6864_v48 = vld [vmem:[%s8295_s7] ss:$0 sm:$0xff] }
 0x132   : > { %v556_v43 = vmul.f32 %v6843_v19, %v6843_v19  ;;  %v557_v22 = vmul.f32 %v6847_v20, %v6847_v20  ;;  %911 = vmatprep.subr.bf16.mxu0 %v5839_v21  ;;  %5377 = vmatpush3.bf16.msra.mxu1 %v5841_v23 }
 0x133   : > { %5378 = vmatprep.subr.bf16.mxu1 %v5845_v51 }
 0x134   : > { %584 = vadd.xlane.f32.xlu1 %v555_v18  ;;  %586 = vadd.xlane.f32.xlu0 %v556_v43 }
 0x135   : > { %912 = vmatpush1.bf16.msra.mxu0 %v5842_v49 }
 0x136   : > { %913 = vmatprep.subr.bf16.mxu0 %v5843_v50  ;;  %5379 = vmatpush3.bf16.msra.mxu1 %v5845_v51 }
 0x137   : > { %5380 = vmatprep.subr.bf16.mxu1 %v5847_v53 }
 0x138   : > { %588 = vadd.xlane.f32.xlu1 %v557_v22 }
 0x139   : > { %914 = vmatpush1.bf16.msra.mxu0 %v5846_v52 }
 0x13a   : > { %5381 = vmatpush3.bf16.msra.mxu1 %v5847_v53 }
 0x1a1   : > { %v559_v57 = vpop.xlane.xlu0 %558 }
 0x1a2   : > { %v590_v58 = vmul.f32 0.0078125, %v559_v57 }
 0x1a4   : > { %v606_v59 = vadd.f32 1e-12, %v590_v58 }
 0x1a5   : > { %v561_v60 = vpop.xlane.xlu1 %560  ;;  %v563_v61 = vpop.xlane.xlu0 %562 }
 0x1a6   : > { %5960 = vrsqrt.f32 %v606_v59  ;;  %v591_v62 = vmul.f32 0.0078125, %v561_v60  ;;  %v592_v63 = vmul.f32 0.0078125, %v563_v61 }
 0x1a8   : > { %v607_v0 = vadd.f32 1e-12, %v591_v62  ;;  %v608_v3 = vadd.f32 1e-12, %v592_v63 }
 0x1a9   : > { %v565_v4 = vpop.xlane.xlu1 %564  ;;  %v567_v5 = vpop.xlane.xlu0 %566 }
 0x1aa   : > { %5962 = vrsqrt.f32 %v607_v0  ;;  %v593_v6 = vmul.f32 0.0078125, %v565_v4  ;;  %v594_v7 = vmul.f32 0.0078125, %v567_v5 }
 0x1ab   : > { %5964 = vrsqrt.f32 %v608_v3 }
 0x1ac   : > { %v609_v8 = vadd.f32 1e-12, %v593_v6  ;;  %v610_v9 = vadd.f32 1e-12, %v594_v7 }
 0x1ad   : > { %v569_v10 = vpop.xlane.xlu1 %568  ;;  %v571_v14 = vpop.xlane.xlu0 %570 }
 0x1ae   : > { %5966 = vrsqrt.f32 %v609_v8  ;;  %v595_v15 = vmul.f32 0.0078125, %v569_v10  ;;  %v596_v24 = vmul.f32 0.0078125, %v571_v14 }
 0x1af   : > { %5968 = vrsqrt.f32 %v610_v9 }
 0x1b0   : > { %v611_v25 = vadd.f32 1e-12, %v595_v15  ;;  %v612_v26 = vadd.f32 1e-12, %v596_v24 }
 0x1b1   : > { %v573_v27 = vpop.xlane.xlu1 %572  ;;  %v575_v28 = vpop.xlane.xlu0 %574 }
 0x1b2   : > { %5970 = vrsqrt.f32 %v611_v25  ;;  %v597_v29 = vmul.f32 0.0078125, %v573_v27  ;;  %v598_v13 = vmul.f32 0.0078125, %v575_v28 }
 0x1b3   : > { %v5961_v32 = vpop.eup %5960  ;;  %5972 = vrsqrt.f32 %v612_v26 }
 0x1b4   : > { %v613_v33 = vadd.f32 1e-12, %v597_v29  ;;  %v614_v34 = vadd.f32 1e-12, %v598_v13  ;;  %v638_v36 = vmul.f32 %v5961_v32, %v6773_v30 }
 0x1b5   : > { %v577_v37 = vpop.xlane.xlu1 %576  ;;  %v579_v40 = vpop.xlane.xlu0 %578 }
 0x1b6   : > { %5974 = vrsqrt.f32 %v613_v33  ;;  %v599_v41 = vmul.f32 0.0078125, %v577_v37  ;;  %v600_v18 = vmul.f32 0.0078125, %v579_v40  ;;  %v660_v43 = vmul.f32 %v6857_v35, %v638_v36 }
 0x1b7   : > { %v5963_v42 = vpop.eup %5962  ;;  %5976 = vrsqrt.f32 %v614_v34 }
 0x1b8   : > { %v5965_v44 = vpop.eup %5964  ;;  %v615_v45 = vadd.f32 1e-12, %v599_v41  ;;  %v616_v22 = vadd.f32 1e-12, %v600_v18  ;;  %v639_v21 = vmul.f32 %v5963_v42, %v6781_v38  ;;  %v6870_v57 = vadd.f32 %v6864_v48, %v660_v43 }
 0x1b9   : > { %v581_v30 = vpop.xlane.xlu1 %580  ;;  %v583_v23 = vpop.xlane.xlu0 %582  ;;  %v640_v49 = vmul.f32 %v5965_v44, %v6775_v31 }
 0x1ba   : > { %5978 = vrsqrt.f32 %v615_v45  ;;  %v601_v50 = vmul.f32 0.0078125, %v581_v30  ;;  %v602_v51 = vmul.f32 0.0078125, %v583_v23  ;;  %v661_v52 = vmul.f32 %v6857_v35, %v639_v21  ;;  %8356 = vst [vmem:[#allocation24_spill] sm:$0xff] %v6870_v57 }
 0x1bb   : > { %v5967_v53 = vpop.eup %5966  ;;  %5980 = vrsqrt.f32 %v616_v22  ;;  %v662_v63 = vmul.f32 %v6857_v35, %v640_v49 }
 0x1bc   : > { %v5969_v58 = vpop.eup %5968  ;;  %v617_v59 = vadd.f32 1e-12, %v601_v50  ;;  %v618_v60 = vadd.f32 1e-12, %v602_v51  ;;  %v6873_v61 = vadd.f32 %v6864_v48, %v661_v52  ;;  %v641_v38 = vmul.f32 %v5967_v53, %v6783_v39 }
 0x1bd   : > { %v585_v62 = vpop.xlane.xlu1 %584  ;;  %v587_v31 = vpop.xlane.xlu0 %586  ;;  %v642_v0 = vmul.f32 %v5969_v58, %v6789_v46  ;;  %v6884_v15 = vadd.f32 %v6864_v48, %v662_v63 }
 0x1be   : > { %8357 = vst [vmem:[#allocation25_spill] sm:$0xff] %v6873_v61  ;;  %5982 = vrsqrt.f32 %v617_v59  ;;  %v603_v3 = vmul.f32 0.0078125, %v585_v62  ;;  %v604_v4 = vmul.f32 0.0078125, %v587_v31  ;;  %v714_v5 = vpack.c.bf16 %v6873_v61, %v6870_v57 }
 0x1bf   : > { %v5971_v6 = vpop.eup %5970  ;;  %5984 = vrsqrt.f32 %v618_v60  ;;  %v663_v7 = vmul.f32 %v6857_v35, %v641_v38  ;;  %v664_v14 = vmul.f32 %v6857_v35, %v642_v0  ;;  %8358 = vst [vmem:[#allocation26_spill] sm:$0xff] %v6884_v15 }
 0x1c0   : > { %v5973_v8 = vpop.eup %5972  ;;  %v619_v9 = vadd.f32 1e-12, %v603_v3  ;;  %v620_v10 = vadd.f32 1e-12, %v604_v4  ;;  %932 = vmatmul.mubr.bf16.vlgmr.msra.gmra.mxu0 %v714_v5  ;;  %5382 = vmatprep.mubr.bf16.mxu1 %v714_v5  ;;  %v643_v39 = vmul.f32 %v5971_v6, %v6791_v47 }
 0x1c1   : > { %v589_v46 = vpop.xlane.xlu1 %588  ;;  %v6887_v24 = vadd.f32 %v6864_v48, %v663_v7  ;;  %941 = vmatprep.mubr.bf16.mxu0 %v6475_v56  ;;  %v644_v25 = vmul.f32 %v5973_v8, %v6797_v54  ;;  %v6896_v33 = vadd.f32 %v6864_v48, %v664_v14 }
 0x1c2   : > { %5986 = vrsqrt.f32 %v619_v9  ;;  %v605_v26 = vmul.f32 0.0078125, %v589_v46  ;;  %v665_v27 = vmul.f32 %v6857_v35, %v643_v39 }
 0x1c3   : > { %8359 = vst [vmem:[#allocation27_spill] sm:$0xff] %v6887_v24  ;;  %v5975_v28 = vpop.eup %5974  ;;  %5988 = vrsqrt.f32 %v620_v10  ;;  %v715_v47 = vpack.c.bf16 %v6887_v24, %v6884_v15  ;;  %v666_v29 = vmul.f32 %v6857_v35, %v644_v25  ;;  %8360 = vst [vmem:[#allocation28_spill] sm:$0xff] %v6896_v33  ;;  %v754_v10 = vld [vmem:[%s8291_s3] sm:$0x7] }
 0x1c4   : > { %v5977_v13 = vpop.eup %5976  ;;  %v621_v32 = vadd.f32 1e-12, %v605_v26  ;;  %v6899_v34 = vadd.f32 %v6864_v48, %v665_v27  ;;  %v645_v54 = vmul.f32 %v5975_v28, %v6799_v55 }
 0x1c5   : > { %5383 = vmatmul.mubr.bf16.vlgmr.msra.gmra.mxu1 %v715_v47  ;;  %v646_v36 = vmul.f32 %v5977_v13, %v6807_v1  ;;  %v6907_v18 = vadd.f32 %v6864_v48, %v666_v29 }
 0x1c6   : > { %8361 = vst [vmem:[#allocation29_spill] sm:$0xff] %v6899_v34  ;;  %5990 = vrsqrt.f32 %v621_v32  ;;  %v716_v37 = vpack.c.bf16 %v6899_v34, %v6896_v33  ;;  %v667_v40 = vmul.f32 %v6857_v35, %v645_v54 }
 0x1c7   : > { %v5979_v41 = vpop.eup %5978  ;;  %8362 = vst [vmem:[#allocation30_spill] sm:$0xff] %v6907_v18  ;;  %v668_v1 = vmul.f32 %v6857_v35, %v646_v36 }
 0x1c8   : > { %v5981_v42 = vpop.eup %5980  ;;  %942 = vmatmul.mubr.bf16.gmra.mxu0 %v715_v47  ;;  %5386 = vmatprep.mubr.bf16.mxu1 %v716_v37  ;;  %v6910_v43 = vadd.f32 %v6864_v48, %v667_v40  ;;  %v647_v55 = vmul.f32 %v5979_v41, %v6811_v2 }
 0x1c9   : > { %951 = vmatprep.mubr.bf16.mxu0 %v6475_v56  ;;  %v648_v44 = vmul.f32 %v5981_v42, %v6819_v11  ;;  %v6921_v49 = vadd.f32 %v6864_v48, %v668_v1 }
 0x1ca   : > { %8363 = vst [vmem:[#allocation31_spill] sm:$0xff] %v6910_v43  ;;  %v717_v45 = vpack.c.bf16 %v6910_v43, %v6907_v18  ;;  %v669_v22 = vmul.f32 %v6857_v35, %v647_v55 }
 0x1cb   : > { %v5983_v21 = vpop.eup %5982  ;;  %v670_v30 = vmul.f32 %v6857_v35, %v648_v44  ;;  %8364 = vst [vmem:[#allocation32_spill] sm:$0xff] %v6921_v49 }
 0x1cc   : > { %v5985_v23 = vpop.eup %5984  ;;  %v6924_v2 = vadd.f32 %v6864_v48, %v669_v22  ;;  %v649_v50 = vmul.f32 %v5983_v21, %v6823_v12 }
 0x1cd   : > { %5387 = vmatmul.mubr.bf16.gmra.mxu1 %v717_v45  ;;  %v650_v11 = vmul.f32 %v5985_v23, %v6831_v16  ;;  %v6932_v58 = vadd.f32 %v6864_v48, %v670_v30 }
 0x1ce   : > { %8365 = vst [vmem:[#allocation33_spill] sm:$0xff] %v6924_v2  ;;  %v718_v51 = vpack.c.bf16 %v6924_v2, %v6921_v49  ;;  %v671_v52 = vmul.f32 %v6857_v35, %v649_v50 }
 0x1cf   : > { %v5987_v53 = vpop.eup %5986  ;;  %8366 = vst [vmem:[#allocation34_spill] sm:$0xff] %v6932_v58  ;;  %v672_v38 = vmul.f32 %v6857_v35, %v650_v11 }
 0x1d0   : > { %v5989_v59 = vpop.eup %5988  ;;  %952 = vmatmul.mubr.bf16.gmra.mxu0 %v716_v37  ;;  %5390 = vmatprep.mubr.bf16.mxu1 %v718_v51  ;;  %v6935_v60 = vadd.f32 %v6864_v48, %v671_v52  ;;  %v651_v12 = vmul.f32 %v5987_v53, %v6835_v17 }
 0x1d1   : > { %961 = vmatprep.mubr.bf16.mxu0 %v6475_v56  ;;  %v652_v16 = vmul.f32 %v5989_v59, %v6843_v19  ;;  %v6945_v0 = vadd.f32 %v6864_v48, %v672_v38 }
 0x1d2   : > { %8367 = vst [vmem:[#allocation35_spill] sm:$0xff] %v6935_v60  ;;  %v719_v62 = vpack.c.bf16 %v6935_v60, %v6932_v58  ;;  %v673_v31 = vmul.f32 %v6857_v35, %v651_v12 }
 0x1d3   : > { %v5991_v63 = vpop.eup %5990  ;;  %8368 = vst [vmem:[#allocation36_spill] sm:$0xff] %v6945_v0  ;;  %v674_v4 = vmul.f32 %v6857_v35, %v652_v16 }
 0x1d4   : > { %v6948_v3 = vadd.f32 %v6864_v48, %v673_v31  ;;  %v653_v17 = vmul.f32 %v5991_v63, %v6847_v20 }
 0x1d5   : > { %5391 = vmatmul.mubr.bf16.gmra.mxu1 %v719_v62  ;;  %v6956_v6 = vadd.f32 %v6864_v48, %v674_v4 }
 0x1d6   : > { %8369 = vst [vmem:[#allocation37_spill] sm:$0xff] %v6948_v3  ;;  %v720_v19 = vpack.c.bf16 %v6948_v3, %v6945_v0  ;;  %v675_v5 = vmul.f32 %v6857_v35, %v653_v17  ;;  %v756_v35 = vlaneseq }
 0x1d7   : > { %8370 = vst [vmem:[#allocation38_spill] sm:$0xff] %v6956_v6 }
 0x1d8   : > { %962 = vmatmul.mubr.bf16.gmra.mxu0 %v717_v45  ;;  %5394 = vmatprep.mubr.bf16.mxu1 %v720_v19  ;;  %v6959_v7 = vadd.f32 %v6864_v48, %v675_v5  ;;  %v757_v8 = vshrl.u32 %v756_v35, 7 }
 0x1d9   : > { %971 = vmatprep.mubr.bf16.mxu0 %v6475_v56 }
 0x1da   : > { %8371 = vst [vmem:[#allocation39_spill] sm:$0xff] %v6959_v7  ;;  %v721_v20 = vpack.c.bf16 %v6959_v7, %v6956_v6  ;;  %v758_v48 = vsub.s32 0, %v757_v8  ;;  %v762_v9 = vsub.s32 1, %v757_v8  ;;  %v766_v39 = vsub.s32 2, %v757_v8 }
 0x1dc   : > { %v6970_v14 = vrot.slane %v754_v10, %v758_v48  ;;  %v6972_v46 = vrot.slane %v754_v10, %v762_v9  ;;  %v6974_v27 = vrot.slane %v754_v10, %v766_v39 }
 0x1dd   : > { %5395 = vmatmul.mubr.bf16.gmra.mxu1 %v721_v20 }
 0x1e0   : > { %972 = vmatmul.mubr.bf16.gmra.mxu0 %v718_v51 }
 0x1e1   : > { %981 = vmatprep.mubr.bf16.mxu0 %v6475_v56 }
 0x1e8   : > { %982 = vmatmul.mubr.bf16.gmra.mxu0 %v719_v62 }
 0x1e9   : > { %991 = vmatprep.mubr.bf16.mxu0 %v6475_v56 }
 0x1f0   : > { %992 = vmatmul.mubr.bf16.gmra.mxu0 %v720_v19 }
 0x1f1   : > { %1001 = vmatprep.mubr.bf16.mxu0 %v6475_v56 }
 0x1f8   : > { %1002 = vmatmul.mubr.bf16.gmra.mxu0 %v721_v20 }
 0x280   : > { %v933_v25 = vpop.f32.mrf.mxu0 }
 0x281   : > { %v934_v56 = vadd.f32 %v933_v25, %v6970_v14 }
 0x282   : > { %v935_v26 = vpop.f32.mrf.mxu0 }
 0x283   : > { %v936_v28 = vadd.f32 %v935_v26, %v6972_v46 }
 0x284   : > { %v937_v47 = vpop.f32.mrf.mxu0 }
 0x285   : > { %v5070_v29 = vpack.c.bf16 %v936_v28, %v934_v56  ;;  %v5384_v13 = vpop.f32.mrf.mxu1  ;;  %v938_v36 = vadd.f32 %v937_v47, %v6970_v14 }
 0x286   : > { %v1055_v32 = vadd.f32 %v5384_v13, %v6974_v27  ;;  %v939_v54 = vpop.f32.mrf.mxu0 }
 0x287   : > { %1269 = vst [vmem:[#allocation2] sm:$0xff] %v5070_v29  ;;  %v940_v37 = vadd.f32 %v939_v54, %v6972_v46  ;;  %v1046_v40 = vpop.f32.mrf.mxu1 }
 0x288   : > { %v5075_v41 = vpack.c.bf16 %v1055_v32, %v1055_v32  ;;  %v1047_v42 = vadd.f32 %v1046_v40, %v6974_v27  ;;  %v943_v55 = vpop.f32.mrf.mxu0 }
 0x289   : > { %v5072_v1 = vpack.c.bf16 %v940_v37, %v938_v36  ;;  %v5385_v44 = vpop.f32.mrf.mxu1  ;;  %v944_v30 = vadd.f32 %v943_v55, %v6970_v14 }
 0x28a   : > { %1274 = vst [vmem:[#allocation2 + $0x20] sm:$0xf] %v5075_v41  ;;  %v5071_v45 = vpack.c.bf16 %v1047_v42, %v1047_v42  ;;  %v1058_v22 = vadd.f32 %v5385_v44, %v6974_v27  ;;  %v945_v21 = vpop.f32.mrf.mxu0 }
 0x28b   : > { %1271 = vst [vmem:[#allocation2 + $0xc] sm:$0xff] %v5072_v1  ;;  %v946_v23 = vadd.f32 %v945_v21, %v6972_v46  ;;  %v1049_v50 = vpop.f32.mrf.mxu1 }
 0x28c   : > { %1270 = vst [vmem:[#allocation2 + $0x8] sm:$0xf] %v5071_v45  ;;  %v5077_v11 = vpack.c.bf16 %v1058_v22, %v1058_v22  ;;  %v1050_v51 = vadd.f32 %v1049_v50, %v6974_v27  ;;  %v947_v52 = vpop.f32.mrf.mxu0 }
 0x28d   : > { %v5074_v53 = vpack.c.bf16 %v946_v23, %v944_v30  ;;  %v5388_v59 = vpop.f32.mrf.mxu1  ;;  %v948_v62 = vadd.f32 %v947_v52, %v6970_v14 }
 0x28e   : > { %1276 = vst [vmem:[#allocation2 + $0x2c] sm:$0xf] %v5077_v11  ;;  %v5073_v12 = vpack.c.bf16 %v1050_v51, %v1050_v51  ;;  %v1071_v38 = vadd.f32 %v5388_v59, %v6974_v27  ;;  %v949_v16 = vpop.f32.mrf.mxu0 }
 0x28f   : > { %1273 = vst [vmem:[#allocation2 + $0x18] sm:$0xff] %v5074_v53  ;;  %v950_v31 = vadd.f32 %v949_v16, %v6972_v46  ;;  %v1062_v63 = vpop.f32.mrf.mxu1 }
 0x290   : > { %1272 = vst [vmem:[#allocation2 + $0x14] sm:$0xf] %v5073_v12  ;;  %v5083_v17 = vpack.c.bf16 %v1071_v38, %v1071_v38  ;;  %v1063_v4 = vadd.f32 %v1062_v63, %v6974_v27  ;;  %v953_v19 = vpop.f32.mrf.mxu0 }
 0x291   : > { %v5076_v5 = vpack.c.bf16 %v950_v31, %v948_v62  ;;  %v5389_v20 = vpop.f32.mrf.mxu1  ;;  %v954_v10 = vadd.f32 %v953_v19, %v6970_v14 }
 0x292   : > { %1282 = vst [vmem:[#allocation2 + $0x50] sm:$0xf] %v5083_v17  ;;  %v5079_v35 = vpack.c.bf16 %v1063_v4, %v1063_v4  ;;  %v1074_v8 = vadd.f32 %v5389_v20, %v6974_v27  ;;  %v955_v48 = vpop.f32.mrf.mxu0  ;;  %v5848_v9 = vld [vmem:[#allocation2] ss:$12 sps:$4 sm:$0xff]  }
 0x293   : > { %1275 = vst [vmem:[#allocation2 + $0x24] sm:$0xff] %v5076_v5  ;;  %v956_v39 = vadd.f32 %v955_v48, %v6972_v46  ;;  %v1065_v25 = vpop.f32.mrf.mxu1  ;;  %5414 = vmatprep.mubr.msk.bf16.mxu0 %vm1435_vm0, %v5848_v9 }
 0x294   : > { %1278 = vst [vmem:[#allocation2 + $0x38] sm:$0xf] %v5079_v35  ;;  %v5085_v26 = vpack.c.bf16 %v1074_v8, %v1074_v8  ;;  %v1066_v56 = vadd.f32 %v1065_v25, %v6974_v27  ;;  %v957_v28 = vpop.f32.mrf.mxu0 }
 0x295   : > { %v5078_v47 = vpack.c.bf16 %v956_v39, %v954_v10  ;;  %v5392_v29 = vpop.f32.mrf.mxu1  ;;  %v958_v36 = vadd.f32 %v957_v28, %v6970_v14 }
 0x296   : > { %1284 = vst [vmem:[#allocation2 + $0x5c] sm:$0xf] %v5085_v26  ;;  %v5081_v13 = vpack.c.bf16 %v1066_v56, %v1066_v56  ;;  %v1087_v32 = vadd.f32 %v5392_v29, %v6974_v27  ;;  %v959_v54 = vpop.f32.mrf.mxu0 }
 0x297   : > { %1277 = vst [vmem:[#allocation2 + $0x30] sm:$0xff] %v5078_v47  ;;  %v960_v37 = vadd.f32 %v959_v54, %v6972_v46  ;;  %v1078_v40 = vpop.f32.mrf.mxu1 }
 0x298   : > { %1280 = vst [vmem:[#allocation2 + $0x44] sm:$0xf] %v5081_v13  ;;  %v5091_v41 = vpack.c.bf16 %v1087_v32, %v1087_v32  ;;  %v1079_v42 = vadd.f32 %v1078_v40, %v6974_v27  ;;  %v963_v55 = vpop.f32.mrf.mxu0 }
 0x299   : > { %v5080_v1 = vpack.c.bf16 %v960_v37, %v958_v36  ;;  %v5393_v44 = vpop.f32.mrf.mxu1  ;;  %v964_v30 = vadd.f32 %v963_v55, %v6970_v14 }
 0x29a   : > { %1290 = vst [vmem:[#allocation2 + $0x80] sm:$0xf] %v5091_v41  ;;  %v5087_v45 = vpack.c.bf16 %v1079_v42, %v1079_v42  ;;  %v1090_v22 = vadd.f32 %v5393_v44, %v6974_v27  ;;  %v965_v21 = vpop.f32.mrf.mxu0 }
 0x29b   : > { %1279 = vst [vmem:[#allocation2 + $0x3c] sm:$0xff] %v5080_v1  ;;  %v966_v23 = vadd.f32 %v965_v21, %v6972_v46  ;;  %v1081_v50 = vpop.f32.mrf.mxu1 }
 0x29c   : > { %1286 = vst [vmem:[#allocation2 + $0x68] sm:$0xf] %v5087_v45  ;;  %v5093_v11 = vpack.c.bf16 %v1090_v22, %v1090_v22  ;;  %v1082_v51 = vadd.f32 %v1081_v50, %v6974_v27  ;;  %v967_v52 = vpop.f32.mrf.mxu0 }
 0x29d   : > { %v5082_v53 = vpack.c.bf16 %v966_v23, %v964_v30  ;;  %v5396_v59 = vpop.f32.mrf.mxu1  ;;  %v968_v62 = vadd.f32 %v967_v52, %v6970_v14 }
 0x29e   : > { %1292 = vst [vmem:[#allocation2 + $0x8c] sm:$0xf] %v5093_v11  ;;  %v5089_v12 = vpack.c.bf16 %v1082_v51, %v1082_v51  ;;  %v1103_v38 = vadd.f32 %v5396_v59, %v6974_v27  ;;  %v969_v16 = vpop.f32.mrf.mxu0 }
 0x29f   : > { %1281 = vst [vmem:[#allocation2 + $0x48] sm:$0xff] %v5082_v53  ;;  %v970_v31 = vadd.f32 %v969_v16, %v6972_v46  ;;  %v1094_v63 = vpop.f32.mrf.mxu1 }
 0x2a0   : > { %1288 = vst [vmem:[#allocation2 + $0x74] sm:$0xf] %v5089_v12  ;;  %v5099_v17 = vpack.c.bf16 %v1103_v38, %v1103_v38  ;;  %v1095_v4 = vadd.f32 %v1094_v63, %v6974_v27  ;;  %v973_v19 = vpop.f32.mrf.mxu0 }
 0x2a1   : > { %v5084_v5 = vpack.c.bf16 %v970_v31, %v968_v62  ;;  %v5397_v20 = vpop.f32.mrf.mxu1  ;;  %v974_v9 = vadd.f32 %v973_v19, %v6970_v14  ;;  %v5853_v19 = vld [vmem:[#allocation2 + $0x50] ss:$12 sps:$4 sm:$0xff]  }
 0x2a2   : > { %1298 = vst [vmem:[#allocation2 + $0xb0] sm:$0xf] %v5099_v17  ;;  %v5095_v35 = vpack.c.bf16 %v1095_v4, %v1095_v4  ;;  %v1106_v8 = vadd.f32 %v5397_v20, %v6974_v27  ;;  %v975_v48 = vpop.f32.mrf.mxu0 }
 0x2a3   : > { %1283 = vst [vmem:[#allocation2 + $0x54] sm:$0xff] %v5084_v5  ;;  %v976_v10 = vadd.f32 %v975_v48, %v6972_v46  ;;  %v1097_v39 = vpop.f32.mrf.mxu1 }
 0x2a4   : > { %1294 = vst [vmem:[#allocation2 + $0x98] sm:$0xf] %v5095_v35  ;;  %v5101_v25 = vpack.c.bf16 %v1106_v8, %v1106_v8  ;;  %v1098_v26 = vadd.f32 %v1097_v39, %v6974_v27  ;;  %v977_v56 = vpop.f32.mrf.mxu0  ;;  %v5854_v35 = vld [vmem:[#allocation2 + $0x38] ss:$12 sps:$4 sm:$0xff]  }
 0x2a5   : > { %v5086_v28 = vpack.c.bf16 %v976_v10, %v974_v9  ;;  %v978_v13 = vadd.f32 %v977_v56, %v6970_v14  ;;  %v5851_v51 = vld [vmem:[#allocation2 + $0x80] ss:$12 sps:$4 sm:$0xff]  }
 0x2a6   : > { %1300 = vst [vmem:[#allocation2 + $0xbc] sm:$0xf] %v5101_v25  ;;  %v5097_v47 = vpack.c.bf16 %v1098_v26, %v1098_v26  ;;  %v979_v29 = vpop.f32.mrf.mxu0  ;;  %v5856_v25 = vld [vmem:[#allocation2 + $0x20] ss:$12 sps:$4 sm:$0xff]   ;;  %v5857_v26 = vld [vmem:[#allocation2 + $0x8] ss:$12 sps:$4 sm:$0xff]  }
 0x2a7   : > { %1285 = vst [vmem:[#allocation2 + $0x60] sm:$0xff] %v5086_v28  ;;  %v980_v32 = vadd.f32 %v979_v29, %v6972_v46  ;;  %v5852_v16 = vld [vmem:[#allocation2 + $0x68] ss:$12 sps:$4 sm:$0xff]  }
 0x2a8   : > { %1296 = vst [vmem:[#allocation2 + $0xa4] sm:$0xf] %v5097_v47  ;;  %v983_v54 = vpop.f32.mrf.mxu0 }
 0x2a9   : > { %v5088_v36 = vpack.c.bf16 %v980_v32, %v978_v13  ;;  %v984_v40 = vadd.f32 %v983_v54, %v6970_v14 }
 0x2aa   : > { %v985_v37 = vpop.f32.mrf.mxu0  ;;  %v5863_v54 = vld [vmem:[#allocation2 + $0x4c] ss:$12 sps:$4 sm:$0xff]  }
 0x2ab   : > { %1287 = vst [vmem:[#allocation2 + $0x6c] sm:$0xff] %v5088_v36  ;;  %v986_v41 = vadd.f32 %v985_v37, %v6972_v46  ;;  %v5864_v37 = vld [vmem:[#allocation2 + $0x34] ss:$12 sps:$4 sm:$0xff]  }
 0x2ac   : > { %v987_v27 = vpop.f32.mrf.mxu0 }
 0x2ad   : > { %v5090_v42 = vpack.c.bf16 %v986_v41, %v984_v40  ;;  %v5849_v55 = vld [vmem:[#allocation2 + $0xb0] ss:$12 sps:$4 sm:$0xff]   ;;  %v988_v44 = vadd.f32 %v987_v27, %v6970_v14  ;;  %v1470_v40 = vsel %vm1435_vm0, %v5863_v54, 0  ;;  %v1467_v41 = vsel %vm1435_vm0, %v5864_v37, 0 }
 0x2ae   : > { %v989_v1 = vpop.f32.mrf.mxu0  ;;  %5430 = vmatprep.subr.bf16.mxu1 %v5849_v55  ;;  %v5865_v27 = vld [vmem:[#allocation2 + $0x1c] ss:$12 sps:$4 sm:$0xff]  }
 0x2af   : > { %1289 = vst [vmem:[#allocation2 + $0x78] sm:$0xff] %v5090_v42  ;;  %v990_v45 = vadd.f32 %v989_v1, %v6972_v46  ;;  %v5850_v22 = vld [vmem:[#allocation2 + $0x98] ss:$12 sps:$4 sm:$0xff]   ;;  %5431 = vmatpush3.bf16.msra.mxu1 %v5849_v55  ;;  %v1464_v42 = vsel %vm1435_vm0, %v5865_v27, 0 }
 0x2b0   : > { %v993_v21 = vpop.f32.mrf.mxu0  ;;  %5432 = vmatprep.subr.bf16.mxu1 %v5850_v22  ;;  %v5866_v55 = vld [vmem:[#allocation2 + $0x4] ss:$12 sps:$4 sm:$0xff]  }
 0x2b1   : > { %v5092_v30 = vpack.c.bf16 %v990_v45, %v988_v44  ;;  %v994_v50 = vadd.f32 %v993_v21, %v6970_v14  ;;  %v1461_v1 = vsel %vm1435_vm0, %v5866_v55, 0  ;;  %v5867_v44 = vld [vmem:[#allocation2 + $0x18] ss:$12 sps:$4 sm:$0xff]   ;;  %v5868_v45 = vld [vmem:[#allocation2 + $0x30] ss:$12 sps:$4 sm:$0xff]  }
 0x2b2   : > { %v995_v23 = vpop.f32.mrf.mxu0  ;;  %v5862_v13 = vld [vmem:[#allocation2 + $0x64] ss:$12 sps:$4 sm:$0xff]   ;;  %v5870_v21 = vld [vmem:[#allocation2 + $0x60] ss:$12 sps:$4 sm:$0xff]  }
 0x2b3   : > { %1291 = vst [vmem:[#allocation2 + $0x84] sm:$0xff] %v5092_v30  ;;  %v996_v11 = vadd.f32 %v995_v23, %v6972_v46  ;;  %5433 = vmatpush3.bf16.msra.mxu1 %v5850_v22  ;;  %v1473_v36 = vsel %vm1435_vm0, %v5862_v13, 0  ;;  %v5869_v22 = vld [vmem:[#allocation2 + $0x48] ss:$12 sps:$4 sm:$0xff]  }
 0x2b4   : > { %v997_v52 = vpop.f32.mrf.mxu0  ;;  %5434 = vmatprep.subr.bf16.mxu1 %v5851_v51 }
 0x2b5   : > { %v5094_v53 = vpack.c.bf16 %v996_v11, %v994_v50  ;;  %v998_v12 = vadd.f32 %v997_v52, %v6970_v14 }
 0x2b6   : > { %v999_v59 = vpop.f32.mrf.mxu0 }
 0x2b7   : > { %1293 = vst [vmem:[#allocation2 + $0x90] sm:$0xff] %v5094_v53  ;;  %v1000_v38 = vadd.f32 %v999_v59, %v6972_v46  ;;  %5435 = vmatpush3.bf16.msra.mxu1 %v5851_v51  ;;  %v7056_v51 = vld [vmem:[%s392_s22] ss:$0 sm:$0xff] }
 0x2b8   : > { %v1003_v62 = vpop.f32.mrf.mxu0  ;;  %5436 = vmatprep.subr.bf16.mxu1 %v5852_v16 }
 0x2b9   : > { %v5096_v31 = vpack.c.bf16 %v1000_v38, %v998_v12  ;;  %v1004_v17 = vadd.f32 %v1003_v62, %v6970_v14 }
 0x2ba   : > { %v1005_v63 = vpop.f32.mrf.mxu0  ;;  %v5861_v47 = vld [vmem:[#allocation2 + $0x7c] ss:$12 sps:$4 sm:$0xff]   ;;  %v5871_v30 = vld [vmem:[#allocation2 + $0x78] ss:$12 sps:$4 sm:$0xff]  }
 0x2bb   : > { %1295 = vst [vmem:[#allocation2 + $0x9c] sm:$0xff] %v5096_v31  ;;  %v1006_v4 = vadd.f32 %v1005_v63, %v6972_v46  ;;  %5437 = vmatpush3.bf16.msra.mxu1 %v5852_v16  ;;  %v1476_v32 = vsel %vm1435_vm0, %v5861_v47, 0 }
 0x2bc   : > { %v1007_v5 = vpop.f32.mrf.mxu0  ;;  %5438 = vmatprep.subr.bf16.mxu1 %v5853_v19 }
 0x2bd   : > { %v5098_v20 = vpack.c.bf16 %v1006_v4, %v1004_v17  ;;  %v1008_v48 = vadd.f32 %v1007_v5, %v6970_v14 }
 0x2be   : > { %v1009_v8 = vpop.f32.mrf.mxu0 }
 0x2bf   : > { %1297 = vst [vmem:[#allocation2 + $0xa8] sm:$0xff] %v5098_v20  ;;  %v1010_v9 = vadd.f32 %v1009_v8, %v6972_v46  ;;  %5439 = vmatpush3.bf16.msra.mxu1 %v5853_v19 }
 0x2c0   : > { %5440 = vmatprep.subr.bf16.mxu1 %v5854_v35 }
 0x2c1   : > { %v5100_v10 = vpack.c.bf16 %v1010_v9, %v1008_v48 }
 0x2c2   : > { %v5855_v39 = vld [vmem:[#allocation2 + $0x94] ss:$12 sps:$4 sm:$0xff]   ;;  %v5872_v23 = vld [vmem:[#allocation2 + $0x90] ss:$12 sps:$4 sm:$0xff]  }
 0x2c3   : > { %1299 = vst [vmem:[#allocation2 + $0xb4] sm:$0xff] %v5100_v10  ;;  %5441 = vmatpush3.bf16.msra.mxu1 %v5854_v35  ;;  %2115 = vrot.lane.b32.xlu1 %v5855_v39, %s6476_s18  ;;  %v5860_v46 = vld [vmem:[#allocation2 + $0x94] ss:$12 sps:$4 sm:$0xff]  }
 0x2c4   : > { %5442 = vmatprep.subr.bf16.mxu1 %v5856_v25  ;;  %v1479_v29 = vsel %vm1435_vm0, %v5860_v46, 0 }
 0x2c7   : > { %5443 = vmatpush3.bf16.msra.mxu1 %v5856_v25 }
 0x2c8   : > { %5444 = vmatprep.subr.bf16.mxu1 %v5857_v26 }
 0x2ca   : > { %v5858_v56 = vld [vmem:[#allocation2 + $0xac] ss:$12 sps:$4 sm:$0xff]   ;;  %v5873_v50 = vld [vmem:[#allocation2 + $0xa8] ss:$12 sps:$4 sm:$0xff]  }
 0x2cb   : > { %v5859_v28 = vld [vmem:[#allocation2 + $0xac] ss:$12 sps:$4 sm:$0xff]   ;;  %5445 = vmatpush3.bf16.msra.mxu1 %v5857_v26  ;;  %2117 = vrot.lane.b32.xlu0 %v5858_v56, %s6476_s18 }
 0x2cc   : > { %5702 = vmatprep.subr.msk.bf16.mxu0 %vm1435_vm0, %v5859_v28  ;;  %v1482_v14 = vsel %vm1435_vm0, %v5859_v28, 0 }
 0x2cd   : > { %5399 = vmatpush3.bf16.xpose.msra.mxu0 %v1482_v14 }
 0x2ce   : > { %5703 = vmatprep.subr.msk.bf16.mxu0 %vm1435_vm0, %v5860_v46 }
 0x2d5   : > { %5401 = vmatpush3.bf16.xpose.msra.mxu0 %v1479_v29 }
 0x2d6   : > { %5704 = vmatprep.subr.msk.bf16.mxu0 %vm1435_vm0, %v5861_v47 }
 0x2dd   : > { %5403 = vmatpush3.bf16.xpose.msra.mxu0 %v1476_v32  ;;  %v5875_v32 = vld [vmem:[#allocation2 + $0x7c] ss:$12 sps:$4 sm:$0xff]  }
 0x2de   : > { %5705 = vmatprep.subr.msk.bf16.mxu0 %vm1435_vm0, %v5862_v13  ;;  %v5874_v13 = vld [vmem:[#allocation2 + $0x64] ss:$12 sps:$4 sm:$0xff]  }
 0x2e5   : > { %5405 = vmatpush3.bf16.xpose.msra.mxu0 %v1473_v36 }
 0x2e6   : > { %5706 = vmatprep.subr.msk.bf16.mxu0 %vm1435_vm0, %v5863_v54 }
 0x2ed   : > { %5407 = vmatpush3.bf16.xpose.msra.mxu0 %v1470_v40 }
 0x2ee   : > { %5707 = vmatprep.subr.msk.bf16.mxu0 %vm1435_vm0, %v5864_v37 }
 0x2f5   : > { %5409 = vmatpush3.bf16.xpose.msra.mxu0 %v1467_v41 }
 0x2f6   : > { %5708 = vmatprep.subr.msk.bf16.mxu0 %vm1435_vm0, %v5865_v27 }
 0x2fd   : > { %5411 = vmatpush3.bf16.xpose.msra.mxu0 %v1464_v42 }
 0x2fe   : > { %5709 = vmatprep.subr.msk.bf16.mxu0 %vm1435_vm0, %v5866_v55 }
 0x305   : > { %5413 = vmatpush3.bf16.xpose.msra.mxu0 %v1461_v1 }
 0x30c   : > { %5415 = vmatmul.mubr.msk.bf16.vlgmr.msra.gmra.mxu0 %vm1435_vm0, %v5867_v44 }
 0x30d   : > { %5418 = vmatprep.mubr.msk.bf16.mxu0 %vm1435_vm0, %v5868_v45 }
 0x314   : > { %5419 = vmatmul.mubr.msk.bf16.gmra.mxu0 %vm1435_vm0, %v5869_v22 }
 0x315   : > { %5422 = vmatprep.mubr.msk.bf16.mxu0 %vm1435_vm0, %v5870_v21 }
 0x31c   : > { %5423 = vmatmul.mubr.msk.bf16.gmra.mxu0 %vm1435_vm0, %v5871_v30 }
 0x31d   : > { %5426 = vmatprep.mubr.msk.bf16.mxu0 %vm1435_vm0, %v5872_v23 }
 0x324   : > { %5427 = vmatmul.mubr.msk.bf16.gmra.mxu0 %vm1435_vm0, %v5873_v50 }
 0x335   : > { %v7112_v41 = vpop.permute.xlu1 %2115 }
 0x33d   : > { %v7050_v11 = vpop.permute.xlu0 %2117 }
 0x33e   : > { %5710 = vmatprep.subr.msk.bf16.mxu1 %vm1435_vm0, %v7050_v11 }
 0x3cc   : > { %v5416_v52 = vpop.f32.mrf.mxu0 }
 0x3cd   : > { %v1527_v53 = vadd.f32 %v5416_v52, %v7056_v51 }
 0x3ce   : > { %v1518_v59 = vpop.f32.mrf.mxu0 }
 0x3cf   : > { %1585 = vmax.xlane.f32.xlu0 %v1527_v53  ;;  %v1519_v38 = vadd.f32 %v7056_v51, %v1518_v59 }
 0x3d0   : > { %v5417_v12 = vpop.f32.mrf.mxu0 }
 0x3d1   : > { %v1530_v16 = vadd.f32 %v5417_v12, %v7056_v51 }
 0x3d2   : > { %v1521_v62 = vpop.f32.mrf.mxu0 }
 0x3d3   : > { %1587 = vmax.xlane.f32.xlu1 %v1530_v16  ;;  %1581 = vmax.xlane.f32.xlu0 %v1519_v38  ;;  %v1522_v63 = vadd.f32 %v7056_v51, %v1521_v62 }
 0x3d4   : > { %v5420_v31 = vpop.f32.mrf.mxu0 }
 0x3d5   : > { %v7063_v17 = vadd.f32 %v5420_v31, %v7056_v51  ;;  %v5876_v31 = vld [vmem:[#allocation2 + $0x34] ss:$12 sps:$4 sm:$0xff]  }
 0x3d6   : > { %v1534_v4 = vpop.f32.mrf.mxu0 }
 0x3d7   : > { %1583 = vmax.xlane.f32.xlu1 %v1522_v63  ;;  %1593 = vmax.xlane.f32.xlu0 %v7063_v17  ;;  %v7067_v5 = vadd.f32 %v7056_v51, %v1534_v4 }
 0x3d8   : > { %v5421_v19 = vpop.f32.mrf.mxu0 }
 0x3d9   : > { %v7070_v20 = vadd.f32 %v5421_v19, %v7056_v51 }
 0x3da   : > { %v1537_v35 = vpop.f32.mrf.mxu0 }
 0x3db   : > { %1595 = vmax.xlane.f32.xlu1 %v7070_v20  ;;  %1589 = vmax.xlane.f32.xlu0 %v7067_v5  ;;  %v7075_v48 = vadd.f32 %v7056_v51, %v1537_v35 }
 0x3dc   : > { %v5424_v8 = vpop.f32.mrf.mxu0 }
 0x3dd   : > { %v7078_v9 = vadd.f32 %v5424_v8, %v7056_v51 }
 0x3de   : > { %v1550_v10 = vpop.f32.mrf.mxu0 }
 0x3df   : > { %1591 = vmax.xlane.f32.xlu1 %v7075_v48  ;;  %1601 = vmax.xlane.f32.xlu0 %v7078_v9  ;;  %v7083_v25 = vadd.f32 %v7056_v51, %v1550_v10 }
 0x3e0   : > { %v5425_v39 = vpop.f32.mrf.mxu0 }
 0x3e1   : > { %v7086_v26 = vadd.f32 %v5425_v39, %v7056_v51 }
 0x3e2   : > { %v1553_v56 = vpop.f32.mrf.mxu0 }
 0x3e3   : > { %1603 = vmax.xlane.f32.xlu1 %v7086_v26  ;;  %1597 = vmax.xlane.f32.xlu0 %v7083_v25  ;;  %v7091_v14 = vadd.f32 %v7056_v51, %v1553_v56 }
 0x3e4   : > { %v5428_v28 = vpop.f32.mrf.mxu0 }
 0x3e5   : > { %v7094_v46 = vadd.f32 %v5428_v28, %v7056_v51 }
 0x3e6   : > { %v1566_v47 = vpop.f32.mrf.mxu0 }
 0x3e7   : > { %1599 = vmax.xlane.f32.xlu1 %v7091_v14  ;;  %1609 = vmax.xlane.f32.xlu0 %v7094_v46  ;;  %v7099_v29 = vadd.f32 %v7056_v51, %v1566_v47 }
 0x3e8   : > { %v5429_v54 = vpop.f32.mrf.mxu0 }
 0x3e9   : > { %v7105_v36 = vadd.f32 %v5429_v54, %v7056_v51 }
 0x3ea   : > { %v1569_v37 = vpop.f32.mrf.mxu0 }
 0x3eb   : > { %1605 = vmax.xlane.f32.xlu0 %v7099_v29  ;;  %v7109_v40 = vadd.f32 %v7056_v51, %v1569_v37 }
 0x3f8   : > { %2111 = vrot.lane.b32.xlu1 %v5874_v13, %s6476_s18 }
 0x401   : > { %2113 = vrot.lane.b32.xlu0 %v5875_v32, %s6476_s18 }
 0x41c   : > { %1611 = vmax.xlane.f32.xlu1 %v7105_v36 }
 0x420   : > { %1607 = vmax.xlane.f32.xlu1 %v7109_v40 }
 0x458   : > { %v1586_v27 = vpop.xlane.xlu0 %1585 }
 0x459   : > { %v1615_v42 = vsub.f32 %v1527_v53, %v1586_v27 }
 0x45b   : > { %v1633_v55 = vmul.f32 1.442695, %v1615_v42 }
 0x45c   : > { %v1588_v1 = vpop.xlane.xlu1 %1587  ;;  %v1582_v44 = vpop.xlane.xlu0 %1581 }
 0x45d   : > { %5992 = vpow2.f32 %v1633_v55  ;;  %v1616_v45 = vsub.f32 %v1530_v16, %v1588_v1  ;;  %v1613_v22 = vsub.f32 %v1519_v38, %v1582_v44 }
 0x45f   : > { %v1635_v21 = vmul.f32 1.442695, %v1616_v45  ;;  %v1629_v30 = vmul.f32 1.442695, %v1613_v22 }
 0x460   : > { %v1584_v23 = vpop.xlane.xlu1 %1583  ;;  %v1594_v16 = vpop.xlane.xlu0 %1593 }
 0x461   : > { %5994 = vpow2.f32 %v1635_v21  ;;  %v1614_v50 = vsub.f32 %v1522_v63, %v1584_v23  ;;  %v5877_v63 = vld [vmem:[#allocation2 + $0x4c] ss:$12 sps:$4 sm:$0xff]   ;;  %v1619_v8 = vsub.f32 %v7063_v17, %v1594_v16 }
 0x462   : > { %5996 = vpow2.f32 %v1629_v30 }
 0x463   : > { %v1631_v52 = vmul.f32 1.442695, %v1614_v50  ;;  %v1641_v28 = vmul.f32 1.442695, %v1619_v8 }
 0x464   : > { %v1590_v62 = vpop.xlane.xlu0 %1589  ;;  %v1596_v19 = vpop.xlane.xlu1 %1595 }
 0x465   : > { %5998 = vpow2.f32 %v1631_v52  ;;  %v1617_v39 = vsub.f32 %v7067_v5, %v1590_v62  ;;  %v1620_v32 = vsub.f32 %v7070_v20, %v1596_v19 }
 0x466   : > { %6000 = vpow2.f32 %v1641_v28  ;;  %v5879_v28 = vld [vmem:[#allocation2 + $0x4] ss:$12 sps:$4 sm:$0xff]  }
 0x467   : > { %v1637_v54 = vmul.f32 1.442695, %v1617_v39  ;;  %v1643_v55 = vmul.f32 1.442695, %v1620_v32  ;;  %v5882_v32 = vld [vmem:[#allocation2 + $0x30] ss:$12 sps:$4 sm:$0xff]  }
 0x468   : > { %v1602_v4 = vpop.xlane.xlu0 %1601  ;;  %v1592_v10 = vpop.xlane.xlu1 %1591 }
 0x469   : > { %v1618_v47 = vsub.f32 %v7075_v48, %v1592_v10  ;;  %6002 = vpow2.f32 %v1637_v54  ;;  %v1623_v17 = vsub.f32 %v7078_v9, %v1602_v4  ;;  %v5883_v54 = vld [vmem:[#allocation2 + $0x48] ss:$12 sps:$4 sm:$0xff]  }
 0x46a   : > { %v7114_v59 = vpop.eup %5992 }
 0x46b   : > { %1665 = vadd.xlane.f32.xlu0 %v7114_v59  ;;  %v1639_v37 = vmul.f32 1.442695, %v1618_v47  ;;  %v1649_v48 = vmul.f32 1.442695, %v1623_v17  ;;  %v5880_v47 = vld [vmem:[#allocation2] ss:$12 sps:$4 sm:$0xff]  }
 0x46c   : > { %v1598_v35 = vpop.xlane.xlu0 %1597  ;;  %v1604_v13 = vpop.xlane.xlu1 %1603  ;;  %v5888_v17 = vld [vmem:[#allocation2 + $0xb0] ss:$12 sps:$4 sm:$0xff]  }
 0x46d   : > { %6004 = vpow2.f32 %v1639_v37  ;;  %v1621_v45 = vsub.f32 %v7083_v25, %v1598_v35  ;;  %v1624_v22 = vsub.f32 %v7086_v26, %v1604_v13  ;;  %v5881_v13 = vld [vmem:[#allocation2 + $0x18] ss:$12 sps:$4 sm:$0xff]   ;;  %v5884_v37 = vld [vmem:[#allocation2 + $0x60] ss:$12 sps:$4 sm:$0xff]  }
 0x46e   : > { %v7117_v12 = vpop.eup %5994  ;;  %6006 = vpow2.f32 %v1643_v55  ;;  %v5887_v55 = vld [vmem:[#allocation2 + $0xa8] ss:$12 sps:$4 sm:$0xff]  }
 0x46f   : > { %v7119_v53 = vpop.eup %5996  ;;  %1667 = vadd.xlane.f32.xlu1 %v7117_v12  ;;  %v1651_v9 = vmul.f32 1.442695, %v1624_v22 }
 0x470   : > { %1661 = vadd.xlane.f32.xlu0 %v7119_v53  ;;  %v1610_v56 = vpop.xlane.xlu0 %1609  ;;  %v1600_v1 = vpop.xlane.xlu1 %1599 }
 0x471   : > { %v1627_v27 = vsub.f32 %v7094_v46, %v1610_v56  ;;  %v1645_v46 = vmul.f32 1.442695, %v1621_v45  ;;  %v5878_v56 = vld [vmem:[#allocation2 + $0x1c] ss:$12 sps:$4 sm:$0xff]  }
 0x472   : > { %v7123_v38 = vpop.eup %5998  ;;  %v5893_v45 = vld [vmem:[#allocation2 + $0x8] ss:$12 sps:$4 sm:$0xff]  }
 0x473   : > { %1663 = vadd.xlane.f32.xlu1 %v7123_v38  ;;  %v1657_v5 = vmul.f32 1.442695, %v1627_v27  ;;  %v7139_v30 = vpop.eup %6000  ;;  %v5885_v27 = vld [vmem:[#allocation2 + $0x78] ss:$12 sps:$4 sm:$0xff]  }
 0x474   : > { %v1606_v42 = vpop.xlane.xlu0 %1605  ;;  %v7137_v21 = vpop.permute.xlu1 %2111 }
 0x475   : > { %v1625_v44 = vsub.f32 %v7099_v29, %v1606_v42  ;;  %6008 = vpow2.f32 %v1657_v5  ;;  %v1622_v29 = vsub.f32 %v7091_v14, %v1600_v1  ;;  %v5886_v42 = vld [vmem:[#allocation2 + $0x90] ss:$12 sps:$4 sm:$0xff]   ;;  %v5889_v1 = vld [vmem:[#allocation2 + $0x98] ss:$12 sps:$4 sm:$0xff]   ;;  %v5890_v5 = vld [vmem:[#allocation2 + $0x80] ss:$12 sps:$4 sm:$0xff]  }
 0x476   : > { %6010 = vpow2.f32 %v1649_v48  ;;  %v7144_v50 = vpop.eup %6002  ;;  %v5892_v48 = vld [vmem:[#allocation2 + $0x68] ss:$12 sps:$4 sm:$0xff]  }
 0x477   : > { %v1653_v20 = vmul.f32 1.442695, %v1625_v44  ;;  %v1647_v62 = vmul.f32 1.442695, %v1622_v29  ;;  %v5891_v44 = vld [vmem:[#allocation2 + $0x38] ss:$12 sps:$4 sm:$0xff]  }
 0x478   : > { %v2114_v22 = vpop.permute.xlu0 %2113 }
 0x479   : > { %6012 = vpow2.f32 %v1653_v20  ;;  %v5894_v20 = vld [vmem:[#allocation2 + $0x50] ss:$12 sps:$4 sm:$0xff]  }
 0x47a   : > { %6014 = vpow2.f32 %v1645_v46  ;;  %v7146_v52 = vpop.eup %6004 }
 0x47b   : > { %6016 = vpow2.f32 %v1651_v9 }
 0x484   : > { %2107 = vrot.lane.b32.xlu1 %v5876_v31, %s6476_s18 }
 0x486   : > { %2109 = vrot.lane.b32.xlu0 %v5877_v63, %s6476_s18  ;;  %v7151_v63 = vpop.eup %6006 }
 0x487   : > { %v7153_v14 = vpop.eup %6008 }
 0x488   : > { %v7157_v4 = vpop.eup %6010 }
 0x489   : > { %v7159_v19 = vpop.eup %6012 }
 0x4a5   : > { %1673 = vadd.xlane.f32.xlu0 %v7139_v30  ;;  %v1612_v23 = vpop.xlane.xlu1 %1611 }
 0x4a6   : > { %v1628_v25 = vsub.f32 %v7105_v36, %v1612_v23 }
 0x4a8   : > { %v1659_v26 = vmul.f32 1.442695, %v1628_v25  ;;  %1669 = vadd.xlane.f32.xlu1 %v7144_v50 }
 0x4a9   : > { %1671 = vadd.xlane.f32.xlu0 %v7146_v52  ;;  %v1608_v16 = vpop.xlane.xlu1 %1607 }
 0x4aa   : > { %6018 = vpow2.f32 %v1659_v26  ;;  %v1626_v31 = vsub.f32 %v7109_v40, %v1608_v16  ;;  %v7163_v40 = vpop.eup %6014 }
 0x4ab   : > { %6020 = vpow2.f32 %v1647_v62  ;;  %v7166_v35 = vpop.eup %6016 }
 0x4ac   : > { %1675 = vadd.xlane.f32.xlu1 %v7151_v63  ;;  %v1655_v36 = vmul.f32 1.442695, %v1626_v31 }
 0x4ad   : > { %1689 = vadd.xlane.f32.xlu0 %v7153_v14 }
 0x4ae   : > { %6022 = vpow2.f32 %v1655_v36 }
 0x4b0   : > { %1681 = vadd.xlane.f32.xlu1 %v7157_v4 }
 0x4b1   : > { %1685 = vadd.xlane.f32.xlu0 %v7159_v19 }
 0x4b4   : > { %1677 = vadd.xlane.f32.xlu1 %v7163_v40 }
 0x4b7   : > { %v7168_v8 = vpop.eup %6018 }
 0x4b8   : > { %1683 = vadd.xlane.f32.xlu1 %v7166_v35  ;;  %1691 = vadd.xlane.f32.xlu0 %v7168_v8  ;;  %v7172_v10 = vpop.eup %6020 }
 0x4bb   : > { %v7175_v39 = vpop.eup %6022 }
 0x4bc   : > { %1679 = vadd.xlane.f32.xlu1 %v7172_v10 }
 0x4c0   : > { %1687 = vadd.xlane.f32.xlu1 %v7175_v39 }
 0x4ce   : > { %2105 = vrot.lane.b32.xlu0 %v5878_v56, %s6476_s18 }
 0x4d1   : > { %2103 = vrot.lane.b32.xlu1 %v5879_v28, %s6476_s18 }
 0x4d2   : > { %2047 = vrot.lane.b32.xlu0 %v5880_v47, %s6476_s18 }
 0x4d5   : > { %2049 = vrot.lane.b32.xlu1 %v5881_v13, %s6476_s18 }
 0x4d6   : > { %2051 = vrot.lane.b32.xlu0 %v5882_v32, %s6476_s18  ;;  %v2165_v32 = vsel %vm1435_vm0, %v7050_v11, 0 }
 0x4d9   : > { %2053 = vrot.lane.b32.xlu1 %v5883_v54, %s6476_s18 }
 0x4da   : > { %2055 = vrot.lane.b32.xlu0 %v5884_v37, %s6476_s18 }
 0x4dd   : > { %2057 = vrot.lane.b32.xlu1 %v5885_v27, %s6476_s18 }
 0x4de   : > { %2059 = vrot.lane.b32.xlu0 %v5886_v42, %s6476_s18 }
 0x4e1   : > { %2061 = vrot.lane.b32.xlu1 %v5887_v55, %s6476_s18 }
 0x4e2   : > { %2470 = vrot.lane.b32.xlu0 %v5888_v17, %s6476_s18 }
 0x4e5   : > { %2468 = vrot.lane.b32.xlu1 %v5889_v1, %s6476_s18 }
 0x4e6   : > { %2466 = vrot.lane.b32.xlu0 %v5890_v5, %s6476_s18 }
 0x4e9   : > { %2460 = vrot.lane.b32.xlu1 %v5891_v44, %s6476_s18 }
 0x4ea   : > { %2464 = vrot.lane.b32.xlu0 %v5892_v48, %s6476_s18 }
 0x4ed   : > { %2456 = vrot.lane.b32.xlu1 %v5893_v45, %s6476_s18 }
 0x4ee   : > { %2462 = vrot.lane.b32.xlu0 %v5894_v20, %s6476_s18 }
 0x4f4   : > { %v1666_v46 = vpop.xlane.xlu0 %1665 }
 0x4f8   : > { %v1668_v9 = vpop.xlane.xlu1 %1667 }
 0x4f9   : > { %v1662_v23 = vpop.xlane.xlu0 %1661  ;;  %6024 = vrcp.f32 %v1668_v9 }
 0x4fa   : > { %6026 = vrcp.f32 %v1662_v23 }
 0x4fb   : > { %6028 = vrcp.f32 %v1666_v46 }
 0x4fc   : > { %v1664_v29 = vpop.xlane.xlu1 %1663 }
 0x4fd   : > { %6030 = vrcp.f32 %v1664_v29  ;;  %v2110_v11 = vpop.permute.xlu0 %2109 }
 0x506   : > { %v6025_v25 = vpop.eup %6024 }
 0x507   : > { %v6027_v26 = vpop.eup %6026  ;;  %v1712_v31 = vmul.f32 %v6025_v25, %v7117_v12  ;;  %v2162_v12 = vsel %vm1435_vm0, %v7112_v41, 0 }
 0x508   : > { %v6029_v16 = vpop.eup %6028  ;;  %v1709_v36 = vmul.f32 %v6027_v26, %v7119_v53  ;;  %v2159_v53 = vsel %vm1435_vm0, %v2114_v22, 0 }
 0x509   : > { %v1711_v28 = vmul.f32 %v6029_v16, %v7114_v59  ;;  %v2156_v59 = vsel %vm1435_vm0, %v7137_v21, 0 }
 0x50a   : > { %v6031_v62 = vpop.eup %6030 }
 0x50b   : > { %v1710_v56 = vmul.f32 %v6031_v62, %v7123_v38  ;;  %v1726_v13 = vpack.c.bf16 %v1712_v31, %v1711_v28  ;;  %v2108_v38 = vpop.permute.xlu1 %2107 }
 0x50d   : > { %v1725_v47 = vpack.c.bf16 %v1710_v56, %v1709_v36 }
 0x50f   : > { %5446 = vmatprep.mubr.bf16.mxu1 %v1725_v47 }
 0x510   : > { %5447 = vmatmul.mubr.bf16.vlgmr.msra.gmra.mxu1 %v1726_v13 }
 0x511   : > { %5463 = vmatpush3.bf16.xpose.msra.mxu1 %v2165_v32 }
 0x512   : > { %5711 = vmatprep.subr.msk.bf16.mxu1 %vm1435_vm0, %v7112_v41  ;;  %v2153_v41 = vsel %vm1435_vm0, %v2110_v11, 0 }
 0x519   : > { %5465 = vmatpush3.bf16.xpose.msra.mxu1 %v2162_v12 }
 0x51a   : > { %5712 = vmatprep.subr.msk.bf16.mxu1 %vm1435_vm0, %v2114_v22 }
 0x521   : > { %5467 = vmatpush3.bf16.xpose.msra.mxu1 %v2159_v53 }
 0x522   : > { %5713 = vmatprep.subr.msk.bf16.mxu1 %vm1435_vm0, %v7137_v21  ;;  %v2150_v21 = vsel %vm1435_vm0, %v2108_v38, 0 }
 0x529   : > { %5469 = vmatpush3.bf16.xpose.msra.mxu1 %v2156_v59 }
 0x52a   : > { %5714 = vmatprep.subr.msk.bf16.mxu1 %vm1435_vm0, %v2110_v11 }
 0x52e   : > { %v1674_v54 = vpop.xlane.xlu0 %1673 }
 0x531   : > { %5471 = vmatpush3.bf16.xpose.msra.mxu1 %v2153_v41  ;;  %v1670_v37 = vpop.xlane.xlu1 %1669 }
 0x532   : > { %6032 = vrcp.f32 %v1670_v37  ;;  %5715 = vmatprep.subr.msk.bf16.mxu1 %vm1435_vm0, %v2108_v38  ;;  %v1672_v27 = vpop.xlane.xlu0 %1671 }
 0x533   : > { %6034 = vrcp.f32 %v1672_v27 }
 0x534   : > { %6036 = vrcp.f32 %v1674_v54 }
 0x535   : > { %v1676_v42 = vpop.xlane.xlu1 %1675 }
 0x536   : > { %6038 = vrcp.f32 %v1676_v42  ;;  %v1690_v55 = vpop.xlane.xlu0 %1689 }
 0x539   : > { %5473 = vmatpush3.bf16.xpose.msra.mxu1 %v2150_v21  ;;  %v1682_v17 = vpop.xlane.xlu1 %1681 }
 0x53a   : > { %v1686_v1 = vpop.xlane.xlu0 %1685 }
 0x53d   : > { %v1678_v5 = vpop.xlane.xlu1 %1677 }
 0x53f   : > { %v6033_v44 = vpop.eup %6032 }
 0x540   : > { %v6035_v48 = vpop.eup %6034  ;;  %v1713_v45 = vmul.f32 %v6033_v44, %v7144_v50 }
 0x541   : > { %v6037_v20 = vpop.eup %6036  ;;  %v1684_v22 = vpop.xlane.xlu1 %1683  ;;  %v1714_v9 = vmul.f32 %v6035_v48, %v7146_v52 }
 0x542   : > { %v1692_v46 = vpop.xlane.xlu0 %1691  ;;  %6040 = vrcp.f32 %v1684_v22  ;;  %v1715_v25 = vmul.f32 %v6037_v20, %v7139_v30 }
 0x543   : > { %v6039_v23 = vpop.eup %6038  ;;  %v1727_v29 = vpack.c.bf16 %v1714_v9, %v1713_v45  ;;  %6042 = vrcp.f32 %v1678_v5 }
 0x544   : > { %v1716_v26 = vmul.f32 %v6039_v23, %v7151_v63  ;;  %6044 = vrcp.f32 %v1682_v17 }
 0x545   : > { %5450 = vmatprep.mubr.bf16.mxu1 %v1727_v29  ;;  %v1680_v16 = vpop.xlane.xlu1 %1679 }
 0x546   : > { %v2106_v62 = vpop.permute.xlu0 %2105  ;;  %6046 = vrcp.f32 %v1680_v16  ;;  %v1728_v31 = vpack.c.bf16 %v1716_v26, %v1715_v25 }
 0x547   : > { %5716 = vmatprep.subr.msk.bf16.mxu1 %vm1435_vm0, %v2106_v62  ;;  %v2147_v50 = vsel %vm1435_vm0, %v2106_v62, 0  ;;  %6048 = vrcp.f32 %v1686_v1 }
 0x548   : > { %5475 = vmatpush3.bf16.xpose.msra.mxu1 %v2147_v50 }
 0x549   : > { %5451 = vmatmul.mubr.bf16.gmra.mxu1 %v1728_v31  ;;  %v1688_v52 = vpop.xlane.xlu1 %1687 }
 0x54a   : > { %v2048_v36 = vpop.permute.xlu0 %2047  ;;  %6050 = vrcp.f32 %v1688_v52 }
 0x54b   : > { %6052 = vrcp.f32 %v1692_v46 }
 0x54c   : > { %6054 = vrcp.f32 %v1690_v55 }
 0x54d   : > { %v2104_v30 = vpop.permute.xlu1 %2103 }
 0x54e   : > { %v2052_v63 = vpop.permute.xlu0 %2051  ;;  %5717 = vmatprep.subr.msk.bf16.mxu1 %vm1435_vm0, %v2104_v30  ;;  %v2144_v56 = vsel %vm1435_vm0, %v2104_v30, 0 }
 0x54f   : > { %v6041_v28 = vpop.eup %6040 }
 0x550   : > { %5477 = vmatpush3.bf16.xpose.msra.mxu1 %v2144_v56  ;;  %v6043_v47 = vpop.eup %6042  ;;  %v1720_v59 = vmul.f32 %v6041_v28, %v7166_v35 }
 0x551   : > { %v2050_v13 = vpop.permute.xlu1 %2049  ;;  %v6045_v12 = vpop.eup %6044  ;;  %v1717_v11 = vmul.f32 %v6043_v47, %v7163_v40 }
 0x552   : > { %v2056_v32 = vpop.permute.xlu0 %2055  ;;  %v1719_v27 = vmul.f32 %v6045_v12, %v7157_v4 }
 0x553   : > { %v6047_v53 = vpop.eup %6046 }
 0x554   : > { %v1718_v38 = vmul.f32 %v6047_v53, %v7172_v10  ;;  %v6049_v54 = vpop.eup %6048  ;;  %v1730_v21 = vpack.c.bf16 %v1720_v59, %v1719_v27 }
 0x555   : > { %v2054_v41 = vpop.permute.xlu1 %2053  ;;  %v1721_v1 = vmul.f32 %v6049_v54, %v7159_v19 }
 0x556   : > { %v2060_v37 = vpop.permute.xlu0 %2059  ;;  %v1729_v42 = vpack.c.bf16 %v1718_v38, %v1717_v11 }
 0x557   : > { %v6051_v55 = vpop.eup %6050 }
 0x558   : > { %v6053_v17 = vpop.eup %6052  ;;  %5454 = vmatprep.mubr.bf16.mxu1 %v1729_v42  ;;  %v1722_v5 = vmul.f32 %v6051_v55, %v7175_v39 }
 0x559   : > { %v2058_v44 = vpop.permute.xlu1 %2057  ;;  %5455 = vmatmul.mubr.bf16.gmra.mxu1 %v1730_v21  ;;  %v6055_v40 = vpop.eup %6054  ;;  %v1724_v48 = vmul.f32 %v6053_v17, %v7168_v8 }
 0x55a   : > { %v2471_v35 = vpop.permute.xlu0 %2470  ;;  %v1731_v10 = vpack.c.bf16 %v1722_v5, %v1721_v1  ;;  %v1723_v45 = vmul.f32 %v6055_v40, %v7153_v14 }
 0x55b   : > { %5494 = vmatprep.subr.bf16.mxu0 %v2471_v35 }
 0x55c   : > { %5495 = vmatpush3.bf16.msra.mxu0 %v2471_v35  ;;  %5458 = vmatprep.mubr.bf16.mxu1 %v1731_v10  ;;  %v1732_v22 = vpack.c.bf16 %v1724_v48, %v1723_v45 }
 0x55d   : > { %v2062_v4 = vpop.permute.xlu1 %2061 }
 0x55e   : > { %v2467_v20 = vpop.permute.xlu0 %2466 }
 0x561   : > { %v2469_v46 = vpop.permute.xlu1 %2468  ;;  %5459 = vmatmul.mubr.bf16.gmra.mxu1 %v1732_v22 }
 0x562   : > { %5478 = vmatprep.mubr.msk.bf16.mxu1 %vm1435_vm0, %v2048_v36  ;;  %5496 = vmatprep.subr.bf16.mxu0 %v2469_v46  ;;  %v2465_v19 = vpop.permute.xlu0 %2464 }
 0x563   : > { %5497 = vmatpush3.bf16.msra.mxu0 %v2469_v46 }
 0x564   : > { %5498 = vmatprep.subr.bf16.mxu0 %v2467_v20 }
 0x565   : > { %v2461_v14 = vpop.permute.xlu1 %2460 }
 0x566   : > { %v2463_v8 = vpop.permute.xlu0 %2462 }
 0x567   : > { %5499 = vmatpush3.bf16.msra.mxu0 %v2467_v20 }
 0x568   : > { %5500 = vmatprep.subr.bf16.mxu0 %v2465_v19 }
 0x569   : > { %5479 = vmatmul.mubr.msk.bf16.vlgmr.msra.gmra.mxu1 %vm1435_vm0, %v2050_v13 }
 0x56a   : > { %5482 = vmatprep.mubr.msk.bf16.mxu1 %vm1435_vm0, %v2052_v63 }
 0x56b   : > { %5501 = vmatpush3.bf16.msra.mxu0 %v2465_v19 }
 0x56c   : > { %5502 = vmatprep.subr.bf16.mxu0 %v2463_v8 }
 0x56f   : > { %5503 = vmatpush3.bf16.msra.mxu0 %v2463_v8 }
 0x570   : > { %5504 = vmatprep.subr.bf16.mxu0 %v2461_v14 }
 0x571   : > { %5483 = vmatmul.mubr.msk.bf16.gmra.mxu1 %vm1435_vm0, %v2054_v41 }
 0x572   : > { %5486 = vmatprep.mubr.msk.bf16.mxu1 %vm1435_vm0, %v2056_v32 }
 0x573   : > { %5505 = vmatpush3.bf16.msra.mxu0 %v2461_v14 }
 0x579   : > { %5487 = vmatmul.mubr.msk.bf16.gmra.mxu1 %vm1435_vm0, %v2058_v44 }
 0x57a   : > { %5490 = vmatprep.mubr.msk.bf16.mxu1 %vm1435_vm0, %v2060_v37 }
 0x581   : > { %5491 = vmatmul.mubr.msk.bf16.gmra.mxu1 %vm1435_vm0, %v2062_v4 }
 0x5d0   : > { %v5448_v39 = vpop.f32.mrf.mxu1 }
 0x5d1   : > { %v5104_v9 = vpack.c.bf16 %v5448_v39, %v5448_v39 }
 0x5d2   : > { %v1815_v23 = vpop.f32.mrf.mxu1 }
 0x5d3   : > { %1945 = vst.msk [vmem:[#allocation3 + $0x8] sm:$0xf] %vm1942_vm1, %v5104_v9  ;;  %v5102_v29 = vpack.c.bf16 %v1815_v23, %v1815_v23 }
 0x5d4   : > { %v5449_v25 = vpop.f32.mrf.mxu1 }
 0x5d5   : > { %1943 = vst.msk [vmem:[#allocation3] sm:$0xf] %vm1942_vm1, %v5102_v29  ;;  %v5105_v26 = vpack.c.bf16 %v5449_v25, %v5449_v25 }
 0x5d6   : > { %v1818_v16 = vpop.f32.mrf.mxu1 }
 0x5d7   : > { %1946 = vst.msk [vmem:[#allocation3 + $0xc] sm:$0xf] %vm1942_vm1, %v5105_v26  ;;  %v5103_v62 = vpack.c.bf16 %v1818_v16, %v1818_v16  ;;  %v5895_v26 = vld [vmem:[#allocation2 + $0x20] ss:$12 sps:$4 sm:$0xff]  }
 0x5d8   : > { %v5896_v16 = vld [vmem:[#allocation2 + $0x94] ss:$12 sps:$4 sm:$0xff]  }
 0x5d9   : > { %1944 = vst.msk [vmem:[#allocation3 + $0x4] sm:$0xf] %vm1942_vm1, %v5103_v62  ;;  %v5897_v62 = vld [vmem:[#allocation2 + $0x64] ss:$12 sps:$4 sm:$0xff]  }
 0x609   : > { %v5452_v50 = vpop.f32.mrf.mxu1 }
 0x60a   : > { %v5108_v31 = vpack.c.bf16 %v5452_v50, %v5452_v50 }
 0x60b   : > { %v1831_v52 = vpop.f32.mrf.mxu1 }
 0x60c   : > { %1949 = vst.msk [vmem:[#allocation3 + $0x18] sm:$0xf] %vm1942_vm1, %v5108_v31  ;;  %v5106_v36 = vpack.c.bf16 %v1831_v52, %v1831_v52 }
 0x60d   : > { %v5453_v30 = vpop.f32.mrf.mxu1 }
 0x60e   : > { %1947 = vst.msk [vmem:[#allocation3 + $0x10] sm:$0xf] %vm1942_vm1, %v5106_v36  ;;  %v5109_v63 = vpack.c.bf16 %v5453_v30, %v5453_v30 }
 0x60f   : > { %v1834_v56 = vpop.f32.mrf.mxu1 }
 0x610   : > { %1950 = vst.msk [vmem:[#allocation3 + $0x1c] sm:$0xf] %vm1942_vm1, %v5109_v63  ;;  %v5107_v28 = vpack.c.bf16 %v1834_v56, %v1834_v56 }
 0x612   : > { %1948 = vst.msk [vmem:[#allocation3 + $0x14] sm:$0xf] %vm1942_vm1, %v5107_v28 }
 0x619   : > { %v5456_v47 = vpop.f32.mrf.mxu1 }
 0x61a   : > { %v5112_v13 = vpack.c.bf16 %v5456_v47, %v5456_v47 }
 0x61b   : > { %v1847_v32 = vpop.f32.mrf.mxu1 }
 0x61c   : > { %1953 = vst.msk [vmem:[#allocation3 + $0x28] sm:$0xf] %vm1942_vm1, %v5112_v13  ;;  %v5110_v12 = vpack.c.bf16 %v1847_v32, %v1847_v32 }
 0x61d   : > { %v5457_v53 = vpop.f32.mrf.mxu1 }
 0x61e   : > { %1951 = vst.msk [vmem:[#allocation3 + $0x20] sm:$0xf] %vm1942_vm1, %v5110_v12  ;;  %v5113_v59 = vpack.c.bf16 %v5457_v53, %v5457_v53  ;;  %v5898_v53 = vld [vmem:[#allocation2 + $0xac] ss:$12 sps:$4 sm:$0xff]  }
 0x61f   : > { %v1850_v11 = vpop.f32.mrf.mxu1 }
 0x620   : > { %1954 = vst.msk [vmem:[#allocation3 + $0x2c] sm:$0xf] %vm1942_vm1, %v5113_v59  ;;  %v5111_v38 = vpack.c.bf16 %v1850_v11, %v1850_v11  ;;  %v5899_v59 = vld [vmem:[#allocation2 + $0x7c] ss:$12 sps:$4 sm:$0xff]   ;;  %v5900_v11 = vld [vmem:[#allocation2 + $0x4c] ss:$12 sps:$4 sm:$0xff]  }
 0x621   : > { %v5460_v54 = vpop.f32.mrf.mxu1 }
 0x622   : > { %1952 = vst.msk [vmem:[#allocation3 + $0x24] sm:$0xf] %vm1942_vm1, %v5111_v38  ;;  %v5116_v41 = vpack.c.bf16 %v5460_v54, %v5460_v54 }
 0x623   : > { %v1863_v37 = vpop.f32.mrf.mxu1 }
 0x624   : > { %1957 = vst.msk [vmem:[#allocation3 + $0x38] sm:$0xf] %vm1942_vm1, %v5116_v41  ;;  %v5114_v27 = vpack.c.bf16 %v1863_v37, %v1863_v37  ;;  %v2457_v41 = vpop.permute.xlu1 %2456 }
 0x625   : > { %v5461_v42 = vpop.f32.mrf.mxu1 }
 0x626   : > { %1955 = vst.msk [vmem:[#allocation3 + $0x30] sm:$0xf] %vm1942_vm1, %v5114_v27  ;;  %v5117_v55 = vpack.c.bf16 %v5461_v42, %v5461_v42 }
 0x627   : > { %v1866_v21 = vpop.f32.mrf.mxu1 }
 0x628   : > { %1958 = vst.msk [vmem:[#allocation3 + $0x3c] sm:$0xf] %vm1942_vm1, %v5117_v55  ;;  %v5115_v17 = vpack.c.bf16 %v1866_v21, %v1866_v21 }
 0x629   : > { %v5480_v1 = vpop.f32.mrf.mxu1 }
 0x62a   : > { %1956 = vst.msk [vmem:[#allocation3 + $0x34] sm:$0xf] %vm1942_vm1, %v5115_v17  ;;  %v7256_v5 = vadd.f32 %v5480_v1, %v7056_v51 }
 0x62b   : > { %v2201_v44 = vpop.f32.mrf.mxu1 }
 0x62c   : > { %2268 = vmax.xlane.f32.xlu0 %v7256_v5  ;;  %v7260_v40 = vadd.f32 %v7056_v51, %v2201_v44 }
 0x62d   : > { %v5481_v35 = vpop.f32.mrf.mxu1 }
 0x62e   : > { %v7267_v45 = vadd.f32 %v5481_v35, %v7056_v51 }
 0x62f   : > { %v2204_v10 = vpop.f32.mrf.mxu1 }
 0x630   : > { %v7263_v48 = vadd.f32 %v7056_v51, %v2204_v10  ;;  %2264 = vmax.xlane.f32.xlu0 %v7260_v40 }
 0x631   : > { %v5484_v4 = vpop.f32.mrf.mxu1 }
 0x632   : > { %2266 = vmax.xlane.f32.xlu1 %v7263_v48  ;;  %v7291_v50 = vadd.f32 %v5484_v4, %v7056_v51 }
 0x633   : > { %v2217_v20 = vpop.f32.mrf.mxu1 }
 0x634   : > { %2270 = vmax.xlane.f32.xlu0 %v7267_v45  ;;  %v7295_v31 = vadd.f32 %v7056_v51, %v2217_v20 }
 0x635   : > { %v5485_v22 = vpop.f32.mrf.mxu1 }
 0x636   : > { %v7272_v46 = vadd.f32 %v5485_v22, %v7056_v51 }
 0x637   : > { %v2220_v19 = vpop.f32.mrf.mxu1 }
 0x638   : > { %2278 = vmax.xlane.f32.xlu1 %v7272_v46  ;;  %v7276_v14 = vadd.f32 %v7056_v51, %v2220_v19 }
 0x639   : > { %v5488_v8 = vpop.f32.mrf.mxu1 }
 0x63a   : > { %v7299_v52 = vadd.f32 %v5488_v8, %v7056_v51 }
 0x63b   : > { %v2233_v39 = vpop.f32.mrf.mxu1 }
 0x63c   : > { %2274 = vmax.xlane.f32.xlu1 %v7276_v14  ;;  %v7303_v30 = vadd.f32 %v7056_v51, %v2233_v39 }
 0x63d   : > { %v5489_v9 = vpop.f32.mrf.mxu1 }
 0x63e   : > { %v7280_v23 = vadd.f32 %v5489_v9, %v7056_v51 }
 0x63f   : > { %v2236_v29 = vpop.f32.mrf.mxu1 }
 0x640   : > { %2286 = vmax.xlane.f32.xlu1 %v7280_v23  ;;  %v7284_v25 = vadd.f32 %v7056_v51, %v2236_v29 }
 0x641   : > { %v5492_v36 = vpop.f32.mrf.mxu1 }
 0x642   : > { %v7307_v56 = vadd.f32 %v5492_v36, %v7056_v51 }
 0x643   : > { %v2249_v63 = vpop.f32.mrf.mxu1 }
 0x644   : > { %2282 = vmax.xlane.f32.xlu1 %v7284_v25  ;;  %v7311_v47 = vadd.f32 %v7056_v51, %v2249_v63 }
 0x645   : > { %v5493_v28 = vpop.f32.mrf.mxu1 }
 0x646   : > { %v7314_v13 = vadd.f32 %v5493_v28, %v7056_v51 }
 0x647   : > { %v2252_v32 = vpop.f32.mrf.mxu1 }
 0x648   : > { %v7319_v12 = vadd.f32 %v7056_v51, %v2252_v32 }
 0x64a   : > { %2458 = vrot.lane.b32.xlu0 %v5895_v26, %s6476_s18 }
 0x655   : > { %2846 = vrot.lane.b32.xlu1 %v5896_v16, %s6477_s28 }
 0x659   : > { %2842 = vrot.lane.b32.xlu1 %v5897_v62, %s6477_s28 }
 0x669   : > { %2276 = vmax.xlane.f32.xlu0 %v7291_v50 }
 0x66d   : > { %2272 = vmax.xlane.f32.xlu0 %v7295_v31 }
 0x671   : > { %2284 = vmax.xlane.f32.xlu0 %v7299_v52 }
 0x675   : > { %2280 = vmax.xlane.f32.xlu0 %v7303_v30 }
 0x679   : > { %2292 = vmax.xlane.f32.xlu0 %v7307_v56 }
 0x67d   : > { %2294 = vmax.xlane.f32.xlu1 %v7314_v13  ;;  %2288 = vmax.xlane.f32.xlu0 %v7311_v47 }
 0x681   : > { %2290 = vmax.xlane.f32.xlu1 %v7319_v12 }
 0x693   : > { %2848 = vrot.lane.b32.xlu0 %v5898_v53, %s6477_s28 }
 0x697   : > { %2844 = vrot.lane.b32.xlu0 %v5899_v59, %s6477_s28 }
 0x69b   : > { %2840 = vrot.lane.b32.xlu0 %v5900_v11, %s6477_s28 }
 0x6b5   : > { %v2269_v38 = vpop.xlane.xlu0 %2268 }
 0x6b6   : > { %v2298_v54 = vsub.f32 %v7256_v5, %v2269_v38 }
 0x6b8   : > { %v2316_v37 = vmul.f32 1.442695, %v2298_v54 }
 0x6b9   : > { %v2265_v27 = vpop.xlane.xlu0 %2264 }
 0x6ba   : > { %6056 = vpow2.f32 %v2316_v37  ;;  %v2296_v51 = vsub.f32 %v7260_v40, %v2265_v27 }
 0x6bb   : > { %v2267_v42 = vpop.xlane.xlu1 %2266 }
 0x6bc   : > { %v2312_v55 = vmul.f32 1.442695, %v2296_v51  ;;  %v2297_v17 = vsub.f32 %v7263_v48, %v2267_v42 }
 0x6bd   : > { %v2271_v21 = vpop.xlane.xlu0 %2270 }
 0x6be   : > { %6058 = vpow2.f32 %v2312_v55  ;;  %v2299_v1 = vsub.f32 %v7267_v45, %v2271_v21  ;;  %v2314_v10 = vmul.f32 1.442695, %v2297_v17  ;;  %v5901_v45 = vld [vmem:[#allocation2 + $0x34] ss:$12 sps:$4 sm:$0xff]  }
 0x6c0   : > { %v2318_v44 = vmul.f32 1.442695, %v2299_v1 }
 0x6c1   : > { %v2459_v35 = vpop.permute.xlu0 %2458  ;;  %v2279_v20 = vpop.xlane.xlu1 %2278 }
 0x6c2   : > { %6060 = vpow2.f32 %v2318_v44  ;;  %5506 = vmatprep.subr.bf16.mxu0 %v2459_v35  ;;  %v2303_v26 = vsub.f32 %v7272_v46, %v2279_v20 }
 0x6c3   : > { %5507 = vmatpush3.bf16.msra.mxu0 %v2459_v35  ;;  %6062 = vpow2.f32 %v2314_v10 }
 0x6c4   : > { %5508 = vmatprep.subr.bf16.mxu0 %v2457_v41  ;;  %v2326_v32 = vmul.f32 1.442695, %v2303_v26  ;;  %v5902_v26 = vld [vmem:[#allocation2 + $0x4] ss:$12 sps:$4 sm:$0xff]  }
 0x6c5   : > { %v2275_v22 = vpop.xlane.xlu1 %2274 }
 0x6c6   : > { %v2301_v8 = vsub.f32 %v7276_v14, %v2275_v22 }
 0x6c7   : > { %v7329_v5 = vpop.eup %6056  ;;  %5509 = vmatpush3.bf16.msra.mxu0 %v2457_v41 }
 0x6c8   : > { %2348 = vadd.xlane.f32.xlu1 %v7329_v5  ;;  %v2322_v16 = vmul.f32 1.442695, %v2301_v8 }
 0x6c9   : > { %v2287_v19 = vpop.xlane.xlu1 %2286 }
 0x6cb   : > { %v7332_v40 = vpop.eup %6058 }
 0x6cc   : > { %2344 = vadd.xlane.f32.xlu1 %v7332_v40 }
 0x6cd   : > { %v2283_v62 = vpop.xlane.xlu1 %2282 }
 0x6ce   : > { %v2305_v27 = vsub.f32 %v7284_v25, %v2283_v62  ;;  %v5904_v62 = vld [vmem:[#allocation2 + $0x1c] ss:$12 sps:$4 sm:$0xff]  }
 0x6cf   : > { %v7335_v48 = vpop.eup %6060 }
 0x6d0   : > { %2350 = vadd.xlane.f32.xlu1 %v7335_v48  ;;  %v7338_v4 = vpop.eup %6062 }
 0x6d1   : > { %v7347_v14 = vpop.permute.xlu1 %2846 }
 0x6d4   : > { %2346 = vadd.xlane.f32.xlu1 %v7338_v4 }
 0x6e5   : > { %2838 = vrot.lane.b32.xlu1 %v5901_v45, %s6477_s28 }
 0x6f2   : > { %v2277_v39 = vpop.xlane.xlu0 %2276 }
 0x6f3   : > { %v2302_v9 = vsub.f32 %v7291_v50, %v2277_v39  ;;  %v2307_v50 = vsub.f32 %v7280_v23, %v2287_v19 }
 0x6f5   : > { %v2324_v29 = vmul.f32 1.442695, %v2302_v9  ;;  %v2334_v41 = vmul.f32 1.442695, %v2307_v50  ;;  %v5912_v50 = vld [vmem:[#allocation2 + $0x90] ss:$12 sps:$4 sm:$0xff]  }
 0x6f6   : > { %v2273_v36 = vpop.xlane.xlu0 %2272 }
 0x6f7   : > { %6064 = vpow2.f32 %v2324_v29  ;;  %v2300_v63 = vsub.f32 %v7295_v31, %v2273_v36  ;;  %v7351_v31 = vpop.permute.xlu1 %2842  ;;  %v5905_v36 = vld [vmem:[#allocation2 + $0x48] ss:$12 sps:$4 sm:$0xff]  }
 0x6f8   : > { %6066 = vpow2.f32 %v2322_v16  ;;  %v5903_v16 = vld [vmem:[#allocation2 + $0x18] ss:$12 sps:$4 sm:$0xff]  }
 0x6f9   : > { %v2320_v28 = vmul.f32 1.442695, %v2300_v63  ;;  %v5906_v63 = vld [vmem:[#allocation2] ss:$12 sps:$4 sm:$0xff]  }
 0x6fa   : > { %v2285_v53 = vpop.xlane.xlu0 %2284 }
 0x6fb   : > { %6068 = vpow2.f32 %v2320_v28  ;;  %v2306_v59 = vsub.f32 %v7299_v52, %v2285_v53  ;;  %v5907_v28 = vld [vmem:[#allocation2 + $0x78] ss:$12 sps:$4 sm:$0xff]   ;;  %v5909_v53 = vld [vmem:[#allocation2 + $0xa8] ss:$12 sps:$4 sm:$0xff]  }
 0x6fc   : > { %6070 = vpow2.f32 %v2326_v32  ;;  %v5908_v32 = vld [vmem:[#allocation2 + $0x30] ss:$12 sps:$4 sm:$0xff]  }
 0x6fd   : > { %v2332_v11 = vmul.f32 1.442695, %v2306_v59  ;;  %v5910_v59 = vld [vmem:[#allocation2 + $0x60] ss:$12 sps:$4 sm:$0xff]  }
 0x6fe   : > { %v2281_v46 = vpop.xlane.xlu0 %2280 }
 0x6ff   : > { %6072 = vpow2.f32 %v2332_v11  ;;  %v2304_v38 = vsub.f32 %v7303_v30, %v2281_v46  ;;  %v2330_v30 = vmul.f32 1.442695, %v2305_v27  ;;  %v5911_v11 = vld [vmem:[#allocation2 + $0x98] ss:$12 sps:$4 sm:$0xff]  }
 0x700   : > { %v5913_v46 = vld [vmem:[#allocation2 + $0x38] ss:$12 sps:$4 sm:$0xff]  }
 0x701   : > { %v2328_v54 = vmul.f32 1.442695, %v2304_v38  ;;  %v5914_v38 = vld [vmem:[#allocation2 + $0xb0] ss:$12 sps:$4 sm:$0xff]  }
 0x702   : > { %v2293_v37 = vpop.xlane.xlu0 %2292 }
 0x703   : > { %6074 = vpow2.f32 %v2328_v54  ;;  %v2310_v52 = vsub.f32 %v7307_v56, %v2293_v37  ;;  %v5915_v54 = vld [vmem:[#allocation2 + $0x8] ss:$12 sps:$4 sm:$0xff]  }
 0x704   : > { %v7355_v51 = vpop.eup %6064  ;;  %6076 = vpow2.f32 %v2334_v41  ;;  %v5916_v41 = vld [vmem:[#allocation2 + $0x80] ss:$12 sps:$4 sm:$0xff]   ;;  %v5917_v37 = vld [vmem:[#allocation2 + $0x68] ss:$12 sps:$4 sm:$0xff]  }
 0x705   : > { %v2340_v42 = vmul.f32 1.442695, %v2310_v52  ;;  %2356 = vadd.xlane.f32.xlu0 %v7355_v51  ;;  %v7358_v21 = vpop.eup %6066  ;;  %v5918_v52 = vld [vmem:[#allocation2 + $0x50] ss:$12 sps:$4 sm:$0xff]  }
 0x706   : > { %v2295_v23 = vpop.xlane.xlu1 %2294  ;;  %v2289_v55 = vpop.xlane.xlu0 %2288 }
 0x707   : > { %6078 = vpow2.f32 %v2340_v42  ;;  %v2308_v17 = vsub.f32 %v7311_v47, %v2289_v55  ;;  %v2311_v25 = vsub.f32 %v7314_v13, %v2295_v23 }
 0x708   : > { %v7361_v1 = vpop.eup %6068  ;;  %6080 = vpow2.f32 %v2330_v30 }
 0x709   : > { %v2336_v44 = vmul.f32 1.442695, %v2308_v17  ;;  %2354 = vadd.xlane.f32.xlu1 %v7358_v21  ;;  %2352 = vadd.xlane.f32.xlu0 %v7361_v1  ;;  %v7368_v10 = vpop.eup %6070  ;;  %v2342_v20 = vmul.f32 1.442695, %v2311_v25 }
 0x70a   : > { %v2291_v56 = vpop.xlane.xlu1 %2290  ;;  %v7366_v35 = vpop.permute.xlu0 %2848 }
 0x70b   : > { %v2309_v45 = vsub.f32 %v7319_v12, %v2291_v56  ;;  %5718 = vmatprep.subr.msk.bf16.mxu0 %vm1435_vm0, %v7366_v35  ;;  %6082 = vpow2.f32 %v2336_v44 }
 0x70c   : > { %v7373_v47 = vpop.eup %6072 }
 0x70d   : > { %v2338_v13 = vmul.f32 1.442695, %v2309_v45  ;;  %2358 = vadd.xlane.f32.xlu0 %v7368_v10  ;;  %2364 = vadd.xlane.f32.xlu1 %v7373_v47 }
 0x70f   : > { %6084 = vpow2.f32 %v2338_v13 }
 0x710   : > { %v7377_v22 = vpop.eup %6074  ;;  %6086 = vpow2.f32 %v2342_v20 }
 0x711   : > { %2360 = vadd.xlane.f32.xlu1 %v7377_v22  ;;  %v7380_v19 = vpop.eup %6076 }
 0x714   : > { %v7382_v12 = vpop.eup %6078 }
 0x715   : > { %2366 = vadd.xlane.f32.xlu1 %v7380_v19  ;;  %2372 = vadd.xlane.f32.xlu0 %v7382_v12  ;;  %v7386_v8 = vpop.eup %6080 }
 0x718   : > { %v7388_v39 = vpop.eup %6082 }
 0x719   : > { %2362 = vadd.xlane.f32.xlu1 %v7386_v8  ;;  %2368 = vadd.xlane.f32.xlu0 %v7388_v39 }
 0x71c   : > { %v7392_v9 = vpop.eup %6084 }
 0x71d   : > { %v7394_v29 = vpop.eup %6086  ;;  %2370 = vadd.xlane.f32.xlu1 %v7392_v9 }
 0x71e   : > { %2374 = vadd.xlane.f32.xlu0 %v7394_v29 }
 0x72e   : > { %2834 = vrot.lane.b32.xlu1 %v5902_v26, %s6477_s28 }
 0x732   : > { %2780 = vrot.lane.b32.xlu1 %v5903_v16, %s6477_s28 }
 0x734   : > { %2836 = vrot.lane.b32.xlu0 %v5904_v62, %s6477_s28  ;;  %v2896_v62 = vsel %vm1435_vm0, %v7366_v35, 0 }
 0x736   : > { %2784 = vrot.lane.b32.xlu1 %v5905_v36, %s6477_s28  ;;  %v2845_v36 = vpop.permute.xlu0 %2844 }
 0x738   : > { %2778 = vrot.lane.b32.xlu0 %v5906_v63, %s6477_s28 }
 0x73a   : > { %2788 = vrot.lane.b32.xlu1 %v5907_v28, %s6477_s28 }
 0x73c   : > { %2782 = vrot.lane.b32.xlu0 %v5908_v32, %s6477_s28 }
 0x73e   : > { %2792 = vrot.lane.b32.xlu1 %v5909_v53, %s6477_s28 }
 0x740   : > { %2786 = vrot.lane.b32.xlu0 %v5910_v59, %s6477_s28 }
 0x742   : > { %3199 = vrot.lane.b32.xlu1 %v5911_v11, %s6477_s28 }
 0x744   : > { %2790 = vrot.lane.b32.xlu0 %v5912_v50, %s6477_s28 }
 0x746   : > { %3191 = vrot.lane.b32.xlu1 %v5913_v46, %s6477_s28 }
 0x748   : > { %3201 = vrot.lane.b32.xlu0 %v5914_v38, %s6477_s28 }
 0x74a   : > { %3187 = vrot.lane.b32.xlu1 %v5915_v54, %s6477_s28 }
 0x74c   : > { %3197 = vrot.lane.b32.xlu0 %v5916_v41, %s6477_s28 }
 0x750   : > { %3195 = vrot.lane.b32.xlu0 %v5917_v37, %s6477_s28 }
 0x751   : > { %v2349_v27 = vpop.xlane.xlu1 %2348 }
 0x754   : > { %3193 = vrot.lane.b32.xlu0 %v5918_v52, %s6477_s28 }
 0x755   : > { %v2345_v42 = vpop.xlane.xlu1 %2344 }
 0x759   : > { %v2351_v23 = vpop.xlane.xlu1 %2350 }
 0x75a   : > { %6088 = vrcp.f32 %v2351_v23 }
 0x75b   : > { %6090 = vrcp.f32 %v2345_v42 }
 0x75c   : > { %6092 = vrcp.f32 %v2349_v27 }
 0x75d   : > { %v2347_v55 = vpop.xlane.xlu1 %2346 }
 0x75e   : > { %6094 = vrcp.f32 %v2347_v55 }
 0x761   : > { %v2839_v35 = vpop.permute.xlu1 %2838 }
 0x767   : > { %v6089_v30 = vpop.eup %6088 }
 0x768   : > { %v6091_v17 = vpop.eup %6090  ;;  %v2395_v56 = vmul.f32 %v6089_v30, %v7335_v48  ;;  %v2893_v48 = vsel %vm1435_vm0, %v7347_v14, 0 }
 0x769   : > { %v6093_v25 = vpop.eup %6092  ;;  %v2392_v45 = vmul.f32 %v6091_v17, %v7332_v40  ;;  %v2887_v40 = vsel %vm1435_vm0, %v7351_v31, 0 }
 0x76a   : > { %v2394_v13 = vmul.f32 %v6093_v25, %v7329_v5  ;;  %v2890_v5 = vsel %vm1435_vm0, %v2845_v36, 0 }
 0x76b   : > { %v6095_v44 = vpop.eup %6094 }
 0x76c   : > { %v2393_v20 = vmul.f32 %v6095_v44, %v7338_v4  ;;  %v2409_v16 = vpack.c.bf16 %v2395_v56, %v2394_v13  ;;  %v2841_v4 = vpop.permute.xlu0 %2840 }
 0x76e   : > { %v2408_v26 = vpack.c.bf16 %v2393_v20, %v2392_v45 }
 0x770   : > { %5510 = vmatprep.mubr.bf16.mxu0 %v2408_v26 }
 0x771   : > { %5511 = vmatmul.mubr.bf16.vlgmr.msra.gmra.mxu0 %v2409_v16 }
 0x772   : > { %5527 = vmatpush3.bf16.xpose.msra.mxu0 %v2896_v62 }
 0x773   : > { %5719 = vmatprep.subr.msk.bf16.mxu0 %vm1435_vm0, %v7347_v14  ;;  %v2884_v14 = vsel %vm1435_vm0, %v2841_v4, 0 }
 0x77a   : > { %5529 = vmatpush3.bf16.xpose.msra.mxu0 %v2893_v48 }
 0x77b   : > { %5720 = vmatprep.subr.msk.bf16.mxu0 %vm1435_vm0, %v2845_v36 }
 0x782   : > { %5531 = vmatpush3.bf16.xpose.msra.mxu0 %v2890_v5 }
 0x783   : > { %5721 = vmatprep.subr.msk.bf16.mxu0 %vm1435_vm0, %v7351_v31  ;;  %v2881_v31 = vsel %vm1435_vm0, %v2839_v35, 0 }
 0x78a   : > { %5533 = vmatpush3.bf16.xpose.msra.mxu0 %v2887_v40 }
 0x78b   : > { %5722 = vmatprep.subr.msk.bf16.mxu0 %vm1435_vm0, %v2841_v4 }
 0x78e   : > { %v2357_v63 = vpop.xlane.xlu0 %2356 }
 0x792   : > { %5535 = vmatpush3.bf16.xpose.msra.mxu0 %v2884_v14  ;;  %v2355_v28 = vpop.xlane.xlu1 %2354  ;;  %v2353_v32 = vpop.xlane.xlu0 %2352 }
 0x793   : > { %6096 = vrcp.f32 %v2355_v28  ;;  %5723 = vmatprep.subr.msk.bf16.mxu0 %vm1435_vm0, %v2839_v35 }
 0x794   : > { %6098 = vrcp.f32 %v2353_v32 }
 0x795   : > { %6100 = vrcp.f32 %v2357_v63 }
 0x796   : > { %v2365_v53 = vpop.xlane.xlu1 %2364  ;;  %v2359_v59 = vpop.xlane.xlu0 %2358 }
 0x797   : > { %6102 = vrcp.f32 %v2359_v59 }
 0x79a   : > { %5537 = vmatpush3.bf16.xpose.msra.mxu0 %v2881_v31  ;;  %v2361_v11 = vpop.xlane.xlu1 %2360 }
 0x79e   : > { %v2367_v50 = vpop.xlane.xlu1 %2366  ;;  %v2373_v46 = vpop.xlane.xlu0 %2372 }
 0x79f   : > { %6104 = vrcp.f32 %v2367_v50 }
 0x7a0   : > { %v6097_v38 = vpop.eup %6096  ;;  %6106 = vrcp.f32 %v2361_v11 }
 0x7a1   : > { %v6099_v54 = vpop.eup %6098  ;;  %v2397_v41 = vmul.f32 %v6097_v38, %v7358_v21  ;;  %6108 = vrcp.f32 %v2365_v53 }
 0x7a2   : > { %v2363_v37 = vpop.xlane.xlu1 %2362  ;;  %v2396_v27 = vmul.f32 %v6099_v54, %v7361_v1  ;;  %v6101_v52 = vpop.eup %6100 }
 0x7a3   : > { %6110 = vrcp.f32 %v2363_v37  ;;  %v2369_v42 = vpop.xlane.xlu0 %2368  ;;  %v2398_v17 = vmul.f32 %v6101_v52, %v7355_v51 }
 0x7a4   : > { %v2410_v23 = vpack.c.bf16 %v2397_v41, %v2396_v27  ;;  %v6103_v55 = vpop.eup %6102  ;;  %6112 = vrcp.f32 %v2369_v42 }
 0x7a5   : > { %v2399_v25 = vmul.f32 %v6103_v55, %v7368_v10 }
 0x7a6   : > { %5514 = vmatprep.mubr.bf16.mxu0 %v2410_v23  ;;  %v2371_v30 = vpop.xlane.xlu1 %2370 }
 0x7a7   : > { %6114 = vrcp.f32 %v2371_v30  ;;  %v2375_v44 = vpop.xlane.xlu0 %2374  ;;  %v2411_v21 = vpack.c.bf16 %v2399_v25, %v2398_v17 }
 0x7a8   : > { %6116 = vrcp.f32 %v2375_v44 }
 0x7a9   : > { %6118 = vrcp.f32 %v2373_v46  ;;  %5515 = vmatmul.mubr.bf16.gmra.mxu0 %v2411_v21 }
 0x7aa   : > { %v2835_v56 = vpop.permute.xlu1 %2834 }
 0x7ab   : > { %v2837_v1 = vpop.permute.xlu0 %2836  ;;  %v2875_v28 = vsel %vm1435_vm0, %v2835_v56, 0 }
 0x7ac   : > { %5724 = vmatprep.subr.msk.bf16.mxu0 %vm1435_vm0, %v2837_v1  ;;  %v2878_v45 = vsel %vm1435_vm0, %v2837_v1, 0  ;;  %v6105_v20 = vpop.eup %6104 }
 0x7ad   : > { %5539 = vmatpush3.bf16.xpose.msra.mxu0 %v2878_v45  ;;  %v6107_v13 = vpop.eup %6106  ;;  %v2403_v62 = vmul.f32 %v6105_v20, %v7380_v19 }
 0x7ae   : > { %5725 = vmatprep.subr.msk.bf16.mxu0 %vm1435_vm0, %v2835_v56  ;;  %v2781_v51 = vpop.permute.xlu1 %2780  ;;  %v6109_v26 = vpop.eup %6108  ;;  %v2400_v48 = vmul.f32 %v6107_v13, %v7377_v22 }
 0x7af   : > { %v2779_v10 = vpop.permute.xlu0 %2778  ;;  %v2402_v4 = vmul.f32 %v6109_v26, %v7373_v47 }
 0x7b0   : > { %v6111_v16 = vpop.eup %6110 }
 0x7b1   : > { %v2401_v36 = vmul.f32 %v6111_v16, %v7386_v8  ;;  %v6113_v5 = vpop.eup %6112  ;;  %v2413_v32 = vpack.c.bf16 %v2403_v62, %v2402_v4 }
 0x7b2   : > { %v2785_v40 = vpop.permute.xlu1 %2784  ;;  %v2404_v59 = vmul.f32 %v6113_v5, %v7388_v39 }
 0x7b3   : > { %v2783_v35 = vpop.permute.xlu0 %2782  ;;  %v2412_v63 = vpack.c.bf16 %v2401_v36, %v2400_v48 }
 0x7b4   : > { %v6115_v14 = vpop.eup %6114 }
 0x7b5   : > { %v6117_v53 = vpop.eup %6116  ;;  %5541 = vmatpush3.bf16.xpose.msra.mxu0 %v2875_v28  ;;  %5518 = vmatprep.mubr.bf16.mxu0 %v2412_v63  ;;  %v2405_v19 = vmul.f32 %v6115_v14, %v7392_v9 }
 0x7b6   : > { %v2789_v22 = vpop.permute.xlu1 %2788  ;;  %5519 = vmatmul.mubr.bf16.gmra.mxu0 %v2413_v32  ;;  %v6119_v8 = vpop.eup %6118  ;;  %v2407_v47 = vmul.f32 %v6117_v53, %v7394_v29 }
 0x7b7   : > { %v2787_v31 = vpop.permute.xlu0 %2786  ;;  %v2414_v11 = vpack.c.bf16 %v2405_v19, %v2404_v59  ;;  %v2406_v50 = vmul.f32 %v6119_v8, %v7382_v12 }
 0x7b9   : > { %5522 = vmatprep.mubr.bf16.mxu0 %v2414_v11  ;;  %v2415_v54 = vpack.c.bf16 %v2407_v47, %v2406_v50  ;;  %v5919_v47 = vld [vmem:[#allocation2 + $0x20] ss:$12 sps:$4 sm:$0xff]  }
 0x7ba   : > { %v2793_v46 = vpop.permute.xlu1 %2792  ;;  %v5920_v50 = vld [vmem:[#allocation2 + $0x94] ss:$12 sps:$4 sm:$0xff]  }
 0x7bb   : > { %v2791_v38 = vpop.permute.xlu0 %2790 }
 0x7be   : > { %5523 = vmatmul.mubr.bf16.gmra.mxu0 %v2415_v54  ;;  %v3200_v39 = vpop.permute.xlu1 %3199 }
 0x7bf   : > { %v3202_v41 = vpop.permute.xlu0 %3201  ;;  %5542 = vmatprep.mubr.msk.bf16.mxu0 %vm1435_vm0, %v2779_v10  ;;  %v7493_v10 = vld [vmem:[%s392_s22] ss:$0 sm:$0xff]  ;;  %s4668_s22 = sshll.u32 %s8176_s0, 4  ;;  %s8243_s22 = int_to_ptr.vmem [resolvable:$true] %s4668_s22 }
 0x7c0   : > { %5558 = vmatprep.subr.bf16.mxu1 %v3202_v41  ;;  %s6389_s4 = scalar_lea.vmem %s8243_s22, 2048 }
 0x7c1   : > { %5559 = vmatpush3.bf16.msra.mxu1 %v3202_v41  ;;  %p6390_p12 = scmp.ne.s32.totalorder %s8243_s22, %s6389_s4 }
 0x7c2   : > { %5560 = vmatprep.subr.bf16.mxu1 %v3200_v39  ;;  %v3192_v37 = vpop.permute.xlu1 %3191 }
 0x7c3   : > { %v3198_v9 = vpop.permute.xlu0 %3197  ;;  %p6391_p9 = pnand %p6390_p12, %p8393_p3 }
 0x7c5   : > { %5561 = vmatpush3.bf16.msra.mxu1 %v3200_v39  ;;  %p6392_p13 = pneg %p6391_p9 }
 0x7c6   : > { %5562 = vmatprep.subr.bf16.mxu1 %v3198_v9  ;;  %5543 = vmatmul.mubr.msk.bf16.vlgmr.msra.gmra.mxu0 %vm1435_vm0, %v2781_v51 }
 0x7c7   : > { %v3196_v29 = vpop.permute.xlu0 %3195  ;;  %5546 = vmatprep.mubr.msk.bf16.mxu0 %vm1435_vm0, %v2783_v35 }
 0x7c9   : > { %5563 = vmatpush3.bf16.msra.mxu1 %v3198_v9 }
 0x7ca   : > { %5564 = vmatprep.subr.bf16.mxu1 %v3196_v29 }
 0x7cb   : > { %v3194_v12 = vpop.permute.xlu0 %3193 }
 0x7cd   : > { %5565 = vmatpush3.bf16.msra.mxu1 %v3196_v29 }
 0x7ce   : > { %5566 = vmatprep.subr.bf16.mxu1 %v3194_v12  ;;  %5547 = vmatmul.mubr.msk.bf16.gmra.mxu0 %vm1435_vm0, %v2785_v40 }
 0x7cf   : > { %5550 = vmatprep.mubr.msk.bf16.mxu0 %vm1435_vm0, %v2787_v31 }
 0x7d1   : > { %5567 = vmatpush3.bf16.msra.mxu1 %v3194_v12 }
 0x7d2   : > { %5568 = vmatprep.subr.bf16.mxu1 %v3192_v37 }
 0x7d5   : > { %5569 = vmatpush3.bf16.msra.mxu1 %v3192_v37 }
 0x7d6   : > { %5551 = vmatmul.mubr.msk.bf16.gmra.mxu0 %vm1435_vm0, %v2789_v22 }
 0x7d7   : > { %5554 = vmatprep.mubr.msk.bf16.mxu0 %vm1435_vm0, %v2791_v38 }
 0x7de   : > { %5555 = vmatmul.mubr.msk.bf16.gmra.mxu0 %vm1435_vm0, %v2793_v46  ;;  %v5921_v46 = vld [vmem:[#allocation2 + $0x64] ss:$12 sps:$4 sm:$0xff]  }
 0x831   : > { %v7459_v27 = vpop.f32.mrf.mxu0 }
 0x833   : > { %v7461_v52 = vpop.f32.mrf.mxu0 }
 0x835   : > { %v7463_v42 = vpop.f32.mrf.mxu0 }
 0x837   : > { %v7465_v23 = vpop.f32.mrf.mxu0 }
 0x869   : > { %v7467_v55 = vpop.f32.mrf.mxu0 }
 0x86b   : > { %v7469_v30 = vpop.f32.mrf.mxu0 }
 0x86d   : > { %v7471_v17 = vpop.f32.mrf.mxu0 }
 0x86f   : > { %v7473_v25 = vpop.f32.mrf.mxu0 }
 0x876   : > { %v7475_v44 = vpop.f32.mrf.mxu0 }
 0x878   : > { %v7477_v21 = vpop.f32.mrf.mxu0 }
 0x87a   : > { %v7479_v56 = vpop.f32.mrf.mxu0 }
 0x87c   : > { %v7481_v1 = vpop.f32.mrf.mxu0 }
 0x87e   : > { %v7483_v45 = vpop.f32.mrf.mxu0 }
 0x880   : > { %v7485_v20 = vpop.f32.mrf.mxu0 }
 0x882   : > { %v7487_v13 = vpop.f32.mrf.mxu0 }
 0x884   : > { %v7489_v51 = vpop.f32.mrf.mxu0 }
 0x886   : > { %v5544_v26 = vpop.f32.mrf.mxu0 }
 0x887   : > { %v7496_v16 = vadd.f32 %v7493_v10, %v5544_v26 }
 0x888   : > { %v2932_v62 = vpop.f32.mrf.mxu0 }
 0x889   : > { %2999 = vmax.xlane.f32.xlu0 %v7496_v16  ;;  %v7500_v36 = vadd.f32 %v7493_v10, %v2932_v62 }
 0x88a   : > { %v5545_v48 = vpop.f32.mrf.mxu0 }
 0x88b   : > { %v7507_v35 = vadd.f32 %v7493_v10, %v5545_v48 }
 0x88c   : > { %v2935_v5 = vpop.f32.mrf.mxu0 }
 0x88d   : > { %v7503_v40 = vadd.f32 %v7493_v10, %v2935_v5  ;;  %2995 = vmax.xlane.f32.xlu0 %v7500_v36 }
 0x88e   : > { %v5548_v4 = vpop.f32.mrf.mxu0 }
 0x88f   : > { %2997 = vmax.xlane.f32.xlu1 %v7503_v40  ;;  %v7531_v38 = vadd.f32 %v7493_v10, %v5548_v4  ;;  %v5922_v4 = vld [vmem:[#allocation2 + $0xac] ss:$12 sps:$4 sm:$0xff]  }
 0x890   : > { %v2948_v63 = vpop.f32.mrf.mxu0 }
 0x891   : > { %3001 = vmax.xlane.f32.xlu0 %v7507_v35  ;;  %v7535_v54 = vadd.f32 %v7493_v10, %v2948_v63  ;;  %v5923_v63 = vld [vmem:[#allocation2 + $0x7c] ss:$12 sps:$4 sm:$0xff]  }
 0x892   : > { %v5549_v14 = vpop.f32.mrf.mxu0 }
 0x893   : > { %v7512_v28 = vadd.f32 %v7493_v10, %v5549_v14  ;;  %v5924_v14 = vld [vmem:[#allocation2 + $0x4c] ss:$12 sps:$4 sm:$0xff]  }
 0x894   : > { %v2951_v32 = vpop.f32.mrf.mxu0 }
 0x895   : > { %3009 = vmax.xlane.f32.xlu1 %v7512_v28  ;;  %v7516_v59 = vadd.f32 %v7493_v10, %v2951_v32 }
 0x896   : > { %v5552_v53 = vpop.f32.mrf.mxu0 }
 0x897   : > { %v7539_v41 = vadd.f32 %v7493_v10, %v5552_v53 }
 0x898   : > { %v2964_v19 = vpop.f32.mrf.mxu0 }
 0x899   : > { %3005 = vmax.xlane.f32.xlu1 %v7516_v59  ;;  %v7543_v9 = vadd.f32 %v7493_v10, %v2964_v19  ;;  %v3188_v19 = vpop.permute.xlu1 %3187 }
 0x89a   : > { %v5553_v22 = vpop.f32.mrf.mxu0 }
 0x89b   : > { %v7520_v8 = vadd.f32 %v7493_v10, %v5553_v22 }
 0x89c   : > { %v2967_v31 = vpop.f32.mrf.mxu0 }
 0x89d   : > { %3017 = vmax.xlane.f32.xlu1 %v7520_v8  ;;  %v7524_v11 = vadd.f32 %v7493_v10, %v2967_v31 }
 0x89e   : > { %v5556_v39 = vpop.f32.mrf.mxu0 }
 0x89f   : > { %v7547_v12 = vadd.f32 %v7493_v10, %v5556_v39 }
 0x8a0   : > { %v2980_v29 = vpop.f32.mrf.mxu0 }
 0x8a1   : > { %3013 = vmax.xlane.f32.xlu1 %v7524_v11  ;;  %v7551_v26 = vadd.f32 %v7493_v10, %v2980_v29 }
 0x8a2   : > { %v5557_v37 = vpop.f32.mrf.mxu0 }
 0x8a3   : > { %v7554_v62 = vadd.f32 %v7493_v10, %v5557_v37 }
 0x8a4   : > { %v2983_v48 = vpop.f32.mrf.mxu0 }
 0x8a5   : > { %v7559_v5 = vadd.f32 %v7493_v10, %v2983_v48 }
 0x8a7   : > { %3189 = vrot.lane.b32.xlu0 %v5919_v47, %s6477_s28 }
 0x8b2   : > { %3577 = vrot.lane.b32.xlu1 %v5920_v50, %s6478_s11 }
 0x8b6   : > { %3573 = vrot.lane.b32.xlu1 %v5921_v46, %s6478_s11 }
 0x8c6   : > { %3007 = vmax.xlane.f32.xlu0 %v7531_v38 }
 0x8ca   : > { %3003 = vmax.xlane.f32.xlu0 %v7535_v54 }
 0x8ce   : > { %3015 = vmax.xlane.f32.xlu0 %v7539_v41 }
 0x8d2   : > { %3011 = vmax.xlane.f32.xlu0 %v7543_v9 }
 0x8d6   : > { %3023 = vmax.xlane.f32.xlu0 %v7547_v12 }
 0x8da   : > { %3025 = vmax.xlane.f32.xlu1 %v7554_v62  ;;  %3019 = vmax.xlane.f32.xlu0 %v7551_v26 }
 0x8de   : > { %3021 = vmax.xlane.f32.xlu1 %v7559_v5 }
 0x8f0   : > { %3579 = vrot.lane.b32.xlu0 %v5922_v4, %s6478_s11 }
 0x8f4   : > { %3575 = vrot.lane.b32.xlu0 %v5923_v63, %s6478_s11 }
 0x8f8   : > { %3571 = vrot.lane.b32.xlu0 %v5924_v14, %s6478_s11  ;;  %v5925_v14 = vld [vmem:[#allocation2 + $0x34] ss:$12 sps:$4 sm:$0xff]  }
 0x912   : > { %v3000_v32 = vpop.xlane.xlu0 %2999 }
 0x913   : > { %v3029_v53 = vsub.f32 %v7496_v16, %v3000_v32 }
 0x915   : > { %v3047_v22 = vmul.f32 1.442695, %v3029_v53 }
 0x916   : > { %v2996_v31 = vpop.xlane.xlu0 %2995 }
 0x917   : > { %6120 = vpow2.f32 %v3047_v22  ;;  %v3027_v47 = vsub.f32 %v7500_v36, %v2996_v31 }
 0x918   : > { %v2998_v50 = vpop.xlane.xlu1 %2997 }
 0x919   : > { %v3043_v46 = vmul.f32 1.442695, %v3027_v47  ;;  %v3028_v29 = vsub.f32 %v7503_v40, %v2998_v50 }
 0x91a   : > { %v3002_v39 = vpop.xlane.xlu0 %3001 }
 0x91b   : > { %6122 = vpow2.f32 %v3043_v46  ;;  %v3030_v37 = vsub.f32 %v7507_v35, %v3002_v39  ;;  %v3045_v63 = vmul.f32 1.442695, %v3028_v29 }
 0x91d   : > { %v3049_v48 = vmul.f32 1.442695, %v3030_v37 }
 0x91e   : > { %v3190_v4 = vpop.permute.xlu0 %3189  ;;  %v3010_v32 = vpop.xlane.xlu1 %3009 }
 0x91f   : > { %6124 = vpow2.f32 %v3049_v48  ;;  %5570 = vmatprep.subr.bf16.mxu1 %v3190_v4  ;;  %v3034_v46 = vsub.f32 %v7512_v28, %v3010_v32 }
 0x920   : > { %5571 = vmatpush3.bf16.msra.mxu1 %v3190_v4  ;;  %6126 = vpow2.f32 %v3045_v63 }
 0x921   : > { %5572 = vmatprep.subr.bf16.mxu1 %v3188_v19  ;;  %v3057_v63 = vmul.f32 1.442695, %v3034_v46 }
 0x922   : > { %v3006_v53 = vpop.xlane.xlu1 %3005 }
 0x923   : > { %v3032_v22 = vsub.f32 %v7516_v59, %v3006_v53 }
 0x924   : > { %v7569_v16 = vpop.eup %6120  ;;  %5573 = vmatpush3.bf16.msra.mxu1 %v3188_v19 }
 0x925   : > { %3079 = vadd.xlane.f32.xlu1 %v7569_v16  ;;  %v3053_v39 = vmul.f32 1.442695, %v3032_v22 }
 0x926   : > { %v3018_v19 = vpop.xlane.xlu1 %3017 }
 0x928   : > { %v7572_v36 = vpop.eup %6122 }
 0x929   : > { %3075 = vadd.xlane.f32.xlu1 %v7572_v36 }
 0x92a   : > { %v3014_v29 = vpop.xlane.xlu1 %3013 }
 0x92c   : > { %v7575_v40 = vpop.eup %6124 }
 0x92d   : > { %3081 = vadd.xlane.f32.xlu1 %v7575_v40  ;;  %v7578_v35 = vpop.eup %6126 }
 0x92e   : > { %v7587_v59 = vpop.permute.xlu1 %3577 }
 0x931   : > { %3077 = vadd.xlane.f32.xlu1 %v7578_v35 }
 0x942   : > { %3569 = vrot.lane.b32.xlu1 %v5925_v14, %s6478_s11 }
 0x94f   : > { %v3008_v31 = vpop.xlane.xlu0 %3007 }
 0x950   : > { %v3033_v47 = vsub.f32 %v7531_v38, %v3008_v31  ;;  %v3038_v38 = vsub.f32 %v7520_v8, %v3018_v19 }
 0x952   : > { %v3055_v50 = vmul.f32 1.442695, %v3033_v47  ;;  %v3065_v31 = vmul.f32 1.442695, %v3038_v38 }
 0x953   : > { %v3004_v37 = vpop.xlane.xlu0 %3003 }
 0x954   : > { %6128 = vpow2.f32 %v3055_v50  ;;  %v3031_v48 = vsub.f32 %v7535_v54, %v3004_v37  ;;  %v7591_v54 = vpop.permute.xlu1 %3573  ;;  %v3036_v50 = vsub.f32 %v7524_v11, %v3014_v29 }
 0x955   : > { %6130 = vpow2.f32 %v3053_v39 }
 0x956   : > { %v3051_v4 = vmul.f32 1.442695, %v3031_v48 }
 0x957   : > { %v3016_v14 = vpop.xlane.xlu0 %3015 }
 0x958   : > { %6132 = vpow2.f32 %v3051_v4  ;;  %v3037_v7 = vsub.f32 %v7539_v41, %v3016_v14 }
 0x959   : > { %6134 = vpow2.f32 %v3057_v63 }
 0x95a   : > { %v3063_v53 = vmul.f32 1.442695, %v3037_v7 }
 0x95b   : > { %v3012_v28 = vpop.xlane.xlu0 %3011 }
 0x95c   : > { %6136 = vpow2.f32 %v3063_v53  ;;  %v3035_v32 = vsub.f32 %v7543_v9, %v3012_v28  ;;  %v3061_v9 = vmul.f32 1.442695, %v3036_v50  ;;  %v5926_v50 = vld [vmem:[#allocation2 + $0x4] ss:$12 sps:$4 sm:$0xff]  }
 0x95e   : > { %v3059_v22 = vmul.f32 1.442695, %v3035_v32 }
 0x95f   : > { %v3024_v47 = vpop.xlane.xlu0 %3023 }
 0x960   : > { %6138 = vpow2.f32 %v3059_v22  ;;  %v3041_v41 = vsub.f32 %v7547_v12, %v3024_v47 }
 0x961   : > { %v7595_v46 = vpop.eup %6128  ;;  %6140 = vpow2.f32 %v3065_v31 }
 0x962   : > { %v3071_v7 = vmul.f32 1.442695, %v3041_v41  ;;  %3087 = vadd.xlane.f32.xlu0 %v7595_v46  ;;  %v7598_v39 = vpop.eup %6130  ;;  %v5927_v41 = vld [vmem:[#allocation2 + $0x18] ss:$12 sps:$4 sm:$0xff]  }
 0x963   : > { %v3026_v8 = vpop.xlane.xlu1 %3025  ;;  %v3020_v19 = vpop.xlane.xlu0 %3019 }
 0x964   : > { %6142 = vpow2.f32 %v3071_v7  ;;  %v3039_v37 = vsub.f32 %v7551_v26, %v3020_v19  ;;  %v3042_v11 = vsub.f32 %v7554_v62, %v3026_v8  ;;  %v5928_v7 = vld [vmem:[#allocation2 + $0x1c] ss:$12 sps:$4 sm:$0xff]   ;;  %v5930_v19 = vld [vmem:[#allocation2] ss:$12 sps:$4 sm:$0xff]  }
 0x965   : > { %v7601_v48 = vpop.eup %6132  ;;  %6144 = vpow2.f32 %v3061_v9  ;;  %v5929_v8 = vld [vmem:[#allocation2 + $0x48] ss:$12 sps:$4 sm:$0xff]   ;;  %v5931_v9 = vld [vmem:[#allocation2 + $0x78] ss:$12 sps:$4 sm:$0xff]  }
 0x966   : > { %v3067_v29 = vmul.f32 1.442695, %v3039_v37  ;;  %3085 = vadd.xlane.f32.xlu1 %v7598_v39  ;;  %3083 = vadd.xlane.f32.xlu0 %v7601_v48  ;;  %v7608_v63 = vpop.eup %6134  ;;  %v3073_v53 = vmul.f32 1.442695, %v3042_v11  ;;  %v5932_v37 = vld [vmem:[#allocation2 + $0x30] ss:$12 sps:$4 sm:$0xff]  }
 0x967   : > { %v3022_v12 = vpop.xlane.xlu1 %3021  ;;  %v7606_v4 = vpop.permute.xlu0 %3579  ;;  %v5933_v11 = vld [vmem:[#allocation2 + $0xa8] ss:$12 sps:$4 sm:$0xff]  }
 0x968   : > { %v3040_v14 = vsub.f32 %v7559_v5, %v3022_v12  ;;  %5726 = vmatprep.subr.msk.bf16.mxu1 %vm1435_vm0, %v7606_v4  ;;  %6146 = vpow2.f32 %v3067_v29  ;;  %v5934_v29 = vld [vmem:[#allocation2 + $0x60] ss:$12 sps:$4 sm:$0xff]   ;;  %v5935_v12 = vld [vmem:[#allocation2 + $0x98] ss:$12 sps:$4 sm:$0xff]  }
 0x969   : > { %v7613_v26 = vpop.eup %6136 }
 0x96a   : > { %v3069_v62 = vmul.f32 1.442695, %v3040_v14  ;;  %3089 = vadd.xlane.f32.xlu0 %v7608_v63  ;;  %3095 = vadd.xlane.f32.xlu1 %v7613_v26  ;;  %v5936_v14 = vld [vmem:[#allocation2 + $0x90] ss:$12 sps:$4 sm:$0xff]  }
 0x96c   : > { %6148 = vpow2.f32 %v3069_v62  ;;  %v5938_v62 = vld [vmem:[#allocation2 + $0x80] ss:$12 sps:$4 sm:$0xff]  }
 0x96d   : > { %v7617_v38 = vpop.eup %6138  ;;  %6150 = vpow2.f32 %v3073_v53  ;;  %v5937_v53 = vld [vmem:[#allocation2 + $0xb0] ss:$12 sps:$4 sm:$0xff]  }
 0x96e   : > { %3091 = vadd.xlane.f32.xlu1 %v7617_v38  ;;  %v7620_v28 = vpop.eup %6140 }
 0x971   : > { %v7622_v5 = vpop.eup %6142 }
 0x972   : > { %3097 = vadd.xlane.f32.xlu1 %v7620_v28  ;;  %3103 = vadd.xlane.f32.xlu0 %v7622_v5  ;;  %v7626_v32 = vpop.eup %6144 }
 0x975   : > { %v7628_v22 = vpop.eup %6146 }
 0x976   : > { %3093 = vadd.xlane.f32.xlu1 %v7626_v32  ;;  %3099 = vadd.xlane.f32.xlu0 %v7628_v22 }
 0x979   : > { %v7632_v31 = vpop.eup %6148 }
 0x97a   : > { %v7634_v47 = vpop.eup %6150  ;;  %3101 = vadd.xlane.f32.xlu1 %v7632_v31 }
 0x97b   : > { %3105 = vadd.xlane.f32.xlu0 %v7634_v47 }
 0x98b   : > { %3565 = vrot.lane.b32.xlu1 %v5926_v50, %s6478_s11 }
 0x98f   : > { %3511 = vrot.lane.b32.xlu1 %v5927_v41, %s6478_s11 }
 0x991   : > { %3567 = vrot.lane.b32.xlu0 %v5928_v7, %s6478_s11 }
 0x993   : > { %3515 = vrot.lane.b32.xlu1 %v5929_v8, %s6478_s11 }
 0x995   : > { %3509 = vrot.lane.b32.xlu0 %v5930_v19, %s6478_s11 }
 0x997   : > { %3519 = vrot.lane.b32.xlu1 %v5931_v9, %s6478_s11 }
 0x999   : > { %3513 = vrot.lane.b32.xlu0 %v5932_v37, %s6478_s11 }
 0x99b   : > { %3523 = vrot.lane.b32.xlu1 %v5933_v11, %s6478_s11 }
 0x99d   : > { %3517 = vrot.lane.b32.xlu0 %v5934_v29, %s6478_s11 }
 0x99f   : > { %3930 = vrot.lane.b32.xlu1 %v5935_v12, %s6478_s11 }
 0x9a1   : > { %3521 = vrot.lane.b32.xlu0 %v5936_v14, %s6478_s11 }
 0x9a5   : > { %3932 = vrot.lane.b32.xlu0 %v5937_v53, %s6478_s11 }
 0x9a9   : > { %3928 = vrot.lane.b32.xlu0 %v5938_v62, %s6478_s11 }
 0x9ae   : > { %v3080_v50 = vpop.xlane.xlu1 %3079 }
 0x9b2   : > { %v3076_v41 = vpop.xlane.xlu1 %3075 }
 0x9b6   : > { %v3082_v7 = vpop.xlane.xlu1 %3081 }
 0x9b7   : > { %6152 = vrcp.f32 %v3082_v7 }
 0x9b8   : > { %6154 = vrcp.f32 %v3076_v41  ;;  %v3576_v41 = vpop.permute.xlu0 %3575 }
 0x9b9   : > { %6156 = vrcp.f32 %v3080_v50  ;;  %v3627_v50 = vsel %vm1435_vm0, %v7606_v4, 0 }
 0x9ba   : > { %v3078_v8 = vpop.xlane.xlu1 %3077 }
 0x9bb   : > { %6158 = vrcp.f32 %v3078_v8 }
 0x9c4   : > { %v6153_v19 = vpop.eup %6152 }
 0x9c5   : > { %v6155_v9 = vpop.eup %6154  ;;  %v3126_v29 = vmul.f32 %v6153_v19, %v7575_v40  ;;  %v3624_v40 = vsel %vm1435_vm0, %v7587_v59, 0 }
 0x9c6   : > { %v6157_v37 = vpop.eup %6156  ;;  %v3123_v12 = vmul.f32 %v6155_v9, %v7572_v36  ;;  %v3572_v36 = vpop.permute.xlu0 %3571 }
 0x9c7   : > { %v3125_v53 = vmul.f32 %v6157_v37, %v7569_v16  ;;  %v3621_v16 = vsel %vm1435_vm0, %v3576_v41, 0 }
 0x9c8   : > { %v6159_v11 = vpop.eup %6158 }
 0x9c9   : > { %v3124_v14 = vmul.f32 %v6159_v11, %v7578_v35  ;;  %v3140_v3 = vpack.c.bf16 %v3126_v29, %v3125_v53  ;;  %v3570_v35 = vpop.permute.xlu1 %3569 }
 0x9cb   : > { %v3139_v62 = vpack.c.bf16 %v3124_v14, %v3123_v12 }
 0x9cd   : > { %5574 = vmatprep.mubr.bf16.mxu1 %v3139_v62 }
 0x9ce   : > { %5575 = vmatmul.mubr.bf16.vlgmr.msra.gmra.mxu1 %v3140_v3  ;;  %v3618_v3 = vsel %vm1435_vm0, %v7591_v54, 0 }
 0x9cf   : > { %5591 = vmatpush3.bf16.xpose.msra.mxu1 %v3627_v50 }
 0x9d0   : > { %5727 = vmatprep.subr.msk.bf16.mxu1 %vm1435_vm0, %v7587_v59  ;;  %v3615_v59 = vsel %vm1435_vm0, %v3572_v36, 0 }
 0x9d7   : > { %5593 = vmatpush3.bf16.xpose.msra.mxu1 %v3624_v40 }
 0x9d8   : > { %5728 = vmatprep.subr.msk.bf16.mxu1 %vm1435_vm0, %v3576_v41 }
 0x9df   : > { %5595 = vmatpush3.bf16.xpose.msra.mxu1 %v3621_v16 }
 0x9e0   : > { %5729 = vmatprep.subr.msk.bf16.mxu1 %vm1435_vm0, %v7591_v54  ;;  %v3612_v54 = vsel %vm1435_vm0, %v3570_v35, 0 }
 0x9e7   : > { %5597 = vmatpush3.bf16.xpose.msra.mxu1 %v3618_v3 }
 0x9e8   : > { %5730 = vmatprep.subr.msk.bf16.mxu1 %vm1435_vm0, %v3572_v36 }
 0x9eb   : > { %v3088_v4 = vpop.xlane.xlu0 %3087 }
 0x9ef   : > { %5599 = vmatpush3.bf16.xpose.msra.mxu1 %v3615_v59  ;;  %v3086_v7 = vpop.xlane.xlu1 %3085  ;;  %v3084_v8 = vpop.xlane.xlu0 %3083 }
 0x9f0   : > { %6160 = vrcp.f32 %v3086_v7  ;;  %5731 = vmatprep.subr.msk.bf16.mxu1 %vm1435_vm0, %v3570_v35 }
 0x9f1   : > { %6162 = vrcp.f32 %v3084_v8 }
 0x9f2   : > { %6164 = vrcp.f32 %v3088_v4 }
 0x9f3   : > { %v3096_v19 = vpop.xlane.xlu1 %3095  ;;  %v3090_v9 = vpop.xlane.xlu0 %3089 }
 0x9f4   : > { %6166 = vrcp.f32 %v3090_v9 }
 0x9f7   : > { %5601 = vmatpush3.bf16.xpose.msra.mxu1 %v3612_v54  ;;  %v3092_v37 = vpop.xlane.xlu1 %3091 }
 0x9fb   : > { %v3098_v11 = vpop.xlane.xlu1 %3097  ;;  %v3104_v29 = vpop.xlane.xlu0 %3103 }
 0x9fc   : > { %6168 = vrcp.f32 %v3098_v11 }
 0x9fd   : > { %v6161_v12 = vpop.eup %6160  ;;  %6170 = vrcp.f32 %v3092_v37 }
 0x9fe   : > { %v6163_v14 = vpop.eup %6162  ;;  %v3128_v53 = vmul.f32 %v6161_v12, %v7598_v39  ;;  %6172 = vrcp.f32 %v3096_v19 }
 0x9ff   : > { %v3094_v62 = vpop.xlane.xlu1 %3093  ;;  %v3127_v50 = vmul.f32 %v6163_v14, %v7601_v48  ;;  %v6165_v40 = vpop.eup %6164 }
 0xa00   : > { %6174 = vrcp.f32 %v3094_v62  ;;  %v3100_v41 = vpop.xlane.xlu0 %3099  ;;  %v3129_v35 = vmul.f32 %v6165_v40, %v7595_v46 }
 0xa01   : > { %v3141_v16 = vpack.c.bf16 %v3128_v53, %v3127_v50  ;;  %v6167_v3 = vpop.eup %6166  ;;  %6176 = vrcp.f32 %v3100_v41 }
 0xa02   : > { %v3130_v4 = vmul.f32 %v6167_v3, %v7608_v63 }
 0xa03   : > { %5578 = vmatprep.mubr.bf16.mxu1 %v3141_v16  ;;  %v3102_v36 = vpop.xlane.xlu1 %3101 }
 0xa04   : > { %6178 = vrcp.f32 %v3102_v36  ;;  %v3106_v59 = vpop.xlane.xlu0 %3105  ;;  %v3142_v39 = vpack.c.bf16 %v3130_v4, %v3129_v35 }
 0xa05   : > { %6180 = vrcp.f32 %v3106_v59 }
 0xa06   : > { %6182 = vrcp.f32 %v3104_v29  ;;  %5579 = vmatmul.mubr.bf16.gmra.mxu1 %v3142_v39 }
 0xa07   : > { %v3566_v7 = vpop.permute.xlu1 %3565 }
 0xa08   : > { %v3568_v48 = vpop.permute.xlu0 %3567  ;;  %v3606_v16 = vsel %vm1435_vm0, %v3566_v7, 0 }
 0xa09   : > { %5732 = vmatprep.subr.msk.bf16.mxu1 %vm1435_vm0, %v3568_v48  ;;  %v3609_v8 = vsel %vm1435_vm0, %v3568_v48, 0  ;;  %v6169_v19 = vpop.eup %6168 }
 0xa0a   : > { %5603 = vmatpush3.bf16.xpose.msra.mxu1 %v3609_v8  ;;  %v6171_v9 = vpop.eup %6170  ;;  %v3134_v11 = vmul.f32 %v6169_v19, %v7620_v28 }
 0xa0b   : > { %5733 = vmatprep.subr.msk.bf16.mxu1 %vm1435_vm0, %v3566_v7  ;;  %v3512_v46 = vpop.permute.xlu1 %3511  ;;  %v6173_v54 = vpop.eup %6172  ;;  %v3131_v29 = vmul.f32 %v6171_v9, %v7617_v38 }
 0xa0c   : > { %v3510_v63 = vpop.permute.xlu0 %3509  ;;  %v3133_v62 = vmul.f32 %v6173_v54, %v7613_v26 }
 0xa0d   : > { %v6175_v37 = vpop.eup %6174 }
 0xa0e   : > { %v3132_v12 = vmul.f32 %v6175_v37, %v7626_v32  ;;  %v6177_v14 = vpop.eup %6176  ;;  %v3144_v3 = vpack.c.bf16 %v3134_v11, %v3133_v62 }
 0xa0f   : > { %v3516_v53 = vpop.permute.xlu1 %3515  ;;  %v3135_v35 = vmul.f32 %v6177_v14, %v7628_v22 }
 0xa10   : > { %v3514_v50 = vpop.permute.xlu0 %3513  ;;  %v3143_v40 = vpack.c.bf16 %v3132_v12, %v3131_v29 }
 0xa11   : > { %v6179_v41 = vpop.eup %6178 }
 0xa12   : > { %v6181_v36 = vpop.eup %6180  ;;  %5605 = vmatpush3.bf16.xpose.msra.mxu1 %v3606_v16  ;;  %5582 = vmatprep.mubr.bf16.mxu1 %v3143_v40  ;;  %v3136_v28 = vmul.f32 %v6179_v41, %v7632_v31 }
 0xa13   : > { %v3520_v38 = vpop.permute.xlu1 %3519  ;;  %5583 = vmatmul.mubr.bf16.gmra.mxu1 %v3144_v3  ;;  %v6183_v32 = vpop.eup %6182  ;;  %v3138_v26 = vmul.f32 %v6181_v36, %v7634_v47 }
 0xa14   : > { %v3518_v4 = vpop.permute.xlu0 %3517  ;;  %v3145_v59 = vpack.c.bf16 %v3136_v28, %v3135_v35  ;;  %v3137_v39 = vmul.f32 %v6183_v32, %v7622_v5 }
 0xa16   : > { %5586 = vmatprep.mubr.bf16.mxu1 %v3145_v59  ;;  %v3146_v8 = vpack.c.bf16 %v3138_v26, %v3137_v39 }
 0xa17   : > { %v3524_v48 = vpop.permute.xlu1 %3523 }
 0xa18   : > { %v3522_v7 = vpop.permute.xlu0 %3521 }
 0xa1b   : > { %5587 = vmatmul.mubr.bf16.gmra.mxu1 %v3146_v8  ;;  %v3931_v22 = vpop.permute.xlu1 %3930 }
 0xa1c   : > { %v3933_v19 = vpop.permute.xlu0 %3932  ;;  %5606 = vmatprep.mubr.msk.bf16.mxu1 %vm1435_vm0, %v3510_v63 }
 0xa1d   : > { %5622 = vmatprep.subr.bf16.mxu0 %v3933_v19 }
 0xa1e   : > { %5623 = vmatpush3.bf16.msra.mxu0 %v3933_v19 }
 0xa1f   : > { %5624 = vmatprep.subr.bf16.mxu0 %v3931_v22 }
 0xa20   : > { %v3929_v31 = vpop.permute.xlu0 %3928 }
 0xa22   : > { %5625 = vmatpush3.bf16.msra.mxu0 %v3931_v22 }
 0xa23   : > { %5626 = vmatprep.subr.bf16.mxu0 %v3929_v31  ;;  %5607 = vmatmul.mubr.msk.bf16.vlgmr.msra.gmra.mxu1 %vm1435_vm0, %v3512_v46 }
 0xa24   : > { %5610 = vmatprep.mubr.msk.bf16.mxu1 %vm1435_vm0, %v3514_v50 }
 0xa26   : > { %5627 = vmatpush3.bf16.msra.mxu0 %v3929_v31 }
 0xa2b   : > { %5611 = vmatmul.mubr.msk.bf16.gmra.mxu1 %vm1435_vm0, %v3516_v53 }
 0xa2c   : > { %5614 = vmatprep.mubr.msk.bf16.mxu1 %vm1435_vm0, %v3518_v4 }
 0xa33   : > { %5615 = vmatmul.mubr.msk.bf16.gmra.mxu1 %vm1435_vm0, %v3520_v38 }
 0xa34   : > { %5618 = vmatprep.mubr.msk.bf16.mxu1 %vm1435_vm0, %v3522_v7 }
 0xa3b   : > { %5619 = vmatmul.mubr.msk.bf16.gmra.mxu1 %vm1435_vm0, %v3524_v48 }
 0xa8e   : > { %v7695_v5 = vpop.f32.mrf.mxu1 }
 0xa90   : > { %v7697_v47 = vpop.f32.mrf.mxu1 }
 0xa92   : > { %v7699_v9 = vpop.f32.mrf.mxu1 }
 0xa94   : > { %v7701_v46 = vpop.f32.mrf.mxu1 }
 0xac6   : > { %v7703_v54 = vpop.f32.mrf.mxu1 }
 0xac7   : > { %8372 = vst [vmem:[#allocation40_spill] sm:$0xff] %v7703_v54 }
 0xac8   : > { %v7705_v63 = vpop.f32.mrf.mxu1 }
 0xaca   : > { %v7707_v37 = vpop.f32.mrf.mxu1 }
 0xacc   : > { %v7709_v11 = vpop.f32.mrf.mxu1 }
 0xad3   : > { %v7711_v29 = vpop.f32.mrf.mxu1 }
 0xad5   : > { %v7713_v12 = vpop.f32.mrf.mxu1 }
 0xad7   : > { %v7715_v14 = vpop.f32.mrf.mxu1 }
 0xad9   : > { %v7717_v53 = vpop.f32.mrf.mxu1 }
 0xadb   : > { %v7719_v62 = vpop.f32.mrf.mxu1 }
 0xadc   : > { %8373 = vst [vmem:[#allocation41_spill] sm:$0xff] %v7719_v62 }
 0xadd   : > { %v7721_v50 = vpop.f32.mrf.mxu1 }
 0xadf   : > { %v7723_v40 = vpop.f32.mrf.mxu1 }
 0xae1   : > { %v7725_v41 = vpop.f32.mrf.mxu1 }
 0xae3   : > { %v5608_v16 = vpop.f32.mrf.mxu1 }
 0xae4   : > { %v3672_v3 = vadd.f32 %v7493_v10, %v5608_v16 }
 0xae5   : > { %v3663_v36 = vpop.f32.mrf.mxu1 }
 0xae6   : > { %3730 = vmax.xlane.f32.xlu0 %v3672_v3  ;;  %v3664_v28 = vadd.f32 %v7493_v10, %v3663_v36 }
 0xae7   : > { %v5609_v35 = vpop.f32.mrf.mxu1 }
 0xae8   : > { %v3675_v59 = vadd.f32 %v7493_v10, %v5609_v35 }
 0xae9   : > { %v3666_v38 = vpop.f32.mrf.mxu1 }
 0xaea   : > { %v3667_v32 = vadd.f32 %v7493_v10, %v3666_v38  ;;  %3726 = vmax.xlane.f32.xlu0 %v3664_v28 }
 0xaeb   : > { %v5612_v4 = vpop.f32.mrf.mxu1 }
 0xaec   : > { %3728 = vmax.xlane.f32.xlu1 %v3667_v32  ;;  %v3688_v48 = vadd.f32 %v7493_v10, %v5612_v4 }
 0xaed   : > { %v3679_v26 = vpop.f32.mrf.mxu1 }
 0xaee   : > { %3732 = vmax.xlane.f32.xlu0 %v3675_v59  ;;  %v3680_v22 = vadd.f32 %v7493_v10, %v3679_v26 }
 0xaef   : > { %v5613_v39 = vpop.f32.mrf.mxu1 }
 0xaf0   : > { %v7733_v7 = vadd.f32 %v7493_v10, %v5613_v39 }
 0xaf1   : > { %v3682_v8 = vpop.f32.mrf.mxu1 }
 0xaf2   : > { %3738 = vmax.xlane.f32.xlu0 %v3688_v48  ;;  %3740 = vmax.xlane.f32.xlu1 %v7733_v7  ;;  %v3683_v31 = vadd.f32 %v7493_v10, %v3682_v8 }
 0xaf3   : > { %v5616_v19 = vpop.f32.mrf.mxu1 }
 0xaf4   : > { %v7739_v35 = vadd.f32 %v7493_v10, %v5616_v19 }
 0xaf5   : > { %v3695_v16 = vpop.f32.mrf.mxu1 }
 0xaf6   : > { %3736 = vmax.xlane.f32.xlu1 %v3683_v31  ;;  %3734 = vmax.xlane.f32.xlu0 %v3680_v22  ;;  %v7747_v39 = vadd.f32 %v7493_v10, %v3695_v16  ;;  %v5939_v16 = vld [vmem:[#allocation2 + $0x50] ss:$12 sps:$4 sm:$0xff]  }
 0xaf7   : > { %v5617_v36 = vpop.f32.mrf.mxu1 }
 0xaf8   : > { %v7742_v38 = vadd.f32 %v7493_v10, %v5617_v36 }
 0xaf9   : > { %v3698_v4 = vpop.f32.mrf.mxu1 }
 0xafa   : > { %3746 = vmax.xlane.f32.xlu0 %v7739_v35  ;;  %3748 = vmax.xlane.f32.xlu1 %v7742_v38  ;;  %v7750_v26 = vadd.f32 %v7493_v10, %v3698_v4  ;;  %v5940_v4 = vld [vmem:[#allocation2 + $0x68] ss:$12 sps:$4 sm:$0xff]  }
 0xafb   : > { %v5620_v8 = vpop.f32.mrf.mxu1 }
 0xafc   : > { %v7755_v19 = vadd.f32 %v7493_v10, %v5620_v8 }
 0xafd   : > { %v3711_v36 = vpop.f32.mrf.mxu1 }
 0xafe   : > { %3744 = vmax.xlane.f32.xlu1 %v7750_v26  ;;  %3742 = vmax.xlane.f32.xlu0 %v7747_v39  ;;  %v7759_v6 = vadd.f32 %v7493_v10, %v3711_v36  ;;  %v5941_v36 = vld [vmem:[#allocation2 + $0x38] ss:$12 sps:$4 sm:$0xff]  }
 0xaff   : > { %v5621_v0 = vpop.f32.mrf.mxu1 }
 0xb00   : > { %v7765_v2 = vadd.f32 %v7493_v10, %v5621_v0 }
 0xb01   : > { %v3714_v8 = vpop.f32.mrf.mxu1 }
 0xb02   : > { %3754 = vmax.xlane.f32.xlu0 %v7755_v19  ;;  %v7769_v60 = vadd.f32 %v7493_v10, %v3714_v8 }
 0xb06   : > { %3750 = vmax.xlane.f32.xlu0 %v7759_v6 }
 0xb0f   : > { %3924 = vrot.lane.b32.xlu1 %v5939_v16, %s6478_s11 }
 0xb1c   : > { %3926 = vrot.lane.b32.xlu0 %v5940_v4, %s6478_s11 }
 0xb33   : > { %3756 = vmax.xlane.f32.xlu1 %v7765_v2 }
 0xb37   : > { %3752 = vmax.xlane.f32.xlu1 %v7769_v60 }
 0xb48   : > { %3922 = vrot.lane.b32.xlu1 %v5941_v36, %s6478_s11 }
 0xb6f   : > { %v3731_v49 = vpop.xlane.xlu0 %3730 }
 0xb70   : > { %v3760_v16 = vsub.f32 %v3672_v3, %v3731_v49 }
 0xb72   : > { %v3778_v34 = vmul.f32 1.442695, %v3760_v16 }
 0xb73   : > { %v3727_v58 = vpop.xlane.xlu0 %3726 }
 0xb74   : > { %6184 = vpow2.f32 %v3778_v34  ;;  %v3758_v4 = vsub.f32 %v3664_v28, %v3727_v58 }
 0xb75   : > { %v3729_v43 = vpop.xlane.xlu1 %3728 }
 0xb76   : > { %v3774_v0 = vmul.f32 1.442695, %v3758_v4  ;;  %v3759_v18 = vsub.f32 %v3667_v32, %v3729_v43 }
 0xb77   : > { %v3733_v33 = vpop.xlane.xlu0 %3732 }
 0xb78   : > { %6186 = vpow2.f32 %v3774_v0  ;;  %v3761_v24 = vsub.f32 %v3675_v59, %v3733_v33  ;;  %v3776_v57 = vmul.f32 1.442695, %v3759_v18 }
 0xb7a   : > { %v3780_v61 = vmul.f32 1.442695, %v3761_v24 }
 0xb7b   : > { %v3741_v10 = vpop.xlane.xlu1 %3740  ;;  %v3739_v8 = vpop.xlane.xlu0 %3738 }
 0xb7c   : > { %6188 = vpow2.f32 %v3780_v61  ;;  %v3764_v15 = vsub.f32 %v3688_v48, %v3739_v8  ;;  %v3765_v58 = vsub.f32 %v7733_v7, %v3741_v10 }
 0xb7d   : > { %6190 = vpow2.f32 %v3776_v57 }
 0xb7e   : > { %v3786_v62 = vmul.f32 1.442695, %v3764_v15  ;;  %v3788_v18 = vmul.f32 1.442695, %v3765_v58 }
 0xb7f   : > { %v3737_v36 = vpop.xlane.xlu1 %3736  ;;  %v3735_v54 = vpop.xlane.xlu0 %3734 }
 0xb80   : > { %v3763_v49 = vsub.f32 %v3683_v31, %v3737_v36  ;;  %v3762_v3 = vsub.f32 %v3680_v22, %v3735_v54  ;;  %6192 = vpow2.f32 %v3786_v62 }
 0xb81   : > { %v7773_v34 = vpop.eup %6184 }
 0xb82   : > { %v3784_v28 = vmul.f32 1.442695, %v3763_v49  ;;  %v3782_v43 = vmul.f32 1.442695, %v3762_v3  ;;  %3810 = vadd.xlane.f32.xlu1 %v7773_v34 }
 0xb83   : > { %v3747_v24 = vpop.xlane.xlu0 %3746  ;;  %v3749_v33 = vpop.xlane.xlu1 %3748 }
 0xb84   : > { %6194 = vpow2.f32 %v3784_v28  ;;  %v3768_v61 = vsub.f32 %v7739_v35, %v3747_v24  ;;  %v3769_v59 = vsub.f32 %v7742_v38, %v3749_v33 }
 0xb85   : > { %v7778_v15 = vpop.eup %6186  ;;  %6196 = vpow2.f32 %v3782_v43 }
 0xb86   : > { %3806 = vadd.xlane.f32.xlu1 %v7778_v15  ;;  %v3794_v54 = vmul.f32 1.442695, %v3768_v61  ;;  %6198 = vpow2.f32 %v3788_v18  ;;  %v3796_v16 = vmul.f32 1.442695, %v3769_v59  ;;  %v5942_v18 = vld [vmem:[#allocation2 + $0x8] ss:$12 sps:$4 sm:$0xff]  }
 0xb87   : > { %v3743_v57 = vpop.xlane.xlu0 %3742  ;;  %v3745_v48 = vpop.xlane.xlu1 %3744 }
 0xb88   : > { %v3766_v32 = vsub.f32 %v7747_v39, %v3743_v57  ;;  %6200 = vpow2.f32 %v3794_v54  ;;  %v3767_v4 = vsub.f32 %v7750_v26, %v3745_v48  ;;  %v5119_v57 = vpack.c.bf16 %v7465_v23, %v7465_v23  ;;  %v5943_v54 = vld [vmem:[#allocation2 + $0x20] ss:$12 sps:$4 sm:$0xff]  }
 0xb89   : > { %v7782_v62 = vpop.eup %6188  ;;  %v5127_v48 = vpack.c.bf16 %v7481_v1, %v7481_v1  ;;  %v5121_v23 = vpack.c.bf16 %v7463_v42, %v7463_v42  ;;  %v5135_v1 = vpack.c.bf16 %v7701_v46, %v7701_v46  ;;  %v5145_v42 = vpack.c.bf16 %v7715_v14, %v7715_v14 }
 0xb8a   : > { %v3790_v7 = vmul.f32 1.442695, %v3766_v32  ;;  %3812 = vadd.xlane.f32.xlu1 %v7782_v62  ;;  %v7787_v35 = vpop.eup %6190  ;;  %v5126_v32 = vpack.c.bf16 %v7477_v21, %v7477_v21  ;;  %v5129_v21 = vpack.c.bf16 %v7479_v56, %v7479_v56  ;;  %v5123_v46 = vpack.c.bf16 %v7473_v25, %v7473_v25 }
 0xb8b   : > { %v3755_v22 = vpop.xlane.xlu0 %3754  ;;  %v3925_v3 = vpop.permute.xlu1 %3924  ;;  %v5125_v14 = vpack.c.bf16 %v7471_v17, %v7471_v17  ;;  %v5139_v25 = vpack.c.bf16 %v7709_v11, %v7709_v11  ;;  %v5141_v17 = vpack.c.bf16 %v7707_v37, %v7707_v37  ;;  %v5149_v11 = vpack.c.bf16 %v7723_v40, %v7723_v40 }
 0xb8c   : > { %v3772_v31 = vsub.f32 %v7755_v19, %v3755_v22  ;;  %6202 = vpow2.f32 %v3790_v7  ;;  %v3792_v19 = vmul.f32 1.442695, %v3767_v4  ;;  %v5134_v37 = vpack.c.bf16 %v7697_v47, %v7697_v47 }
 0xb8d   : > { %v7790_v39 = vpop.eup %6192  ;;  %v5136_v40 = vpack.c.bf16 %v7695_v5, %v7695_v5  ;;  %v5122_v47 = vpack.c.bf16 %v7469_v30, %v7469_v30 }
 0xb8e   : > { %v3802_v0 = vmul.f32 1.442695, %v3772_v31  ;;  %3808 = vadd.xlane.f32.xlu1 %v7787_v35  ;;  %3818 = vadd.xlane.f32.xlu0 %v7790_v39 }
 0xb8f   : > { %v3751_v38 = vpop.xlane.xlu0 %3750 }
 0xb90   : > { %6204 = vpow2.f32 %v3802_v0  ;;  %v3770_v10 = vsub.f32 %v7759_v6, %v3751_v38  ;;  %v5133_v38 = vpack.c.bf16 %v7487_v13, %v7487_v13  ;;  %v5120_v13 = vpack.c.bf16 %v7459_v27, %v7459_v27 }
 0xb91   : > { %v7795_v8 = vpop.eup %6194  ;;  %6206 = vpow2.f32 %v3796_v16  ;;  %v5142_v27 = vpack.c.bf16 %v7713_v12, %v7713_v12  ;;  %v5130_v12 = vpack.c.bf16 %v7485_v20, %v7485_v20  ;;  %v5138_v20 = vpack.c.bf16 %v7705_v63, %v7705_v63 }
 0xb92   : > { %v7797_v36 = vpop.eup %6196  ;;  %v3798_v49 = vmul.f32 1.442695, %v3770_v10  ;;  %3816 = vadd.xlane.f32.xlu1 %v7795_v8  ;;  %v5118_v10 = vpack.c.bf16 %v7461_v52, %v7461_v52  ;;  %v5128_v52 = vpack.c.bf16 %v7475_v44, %v7475_v44  ;;  %v5144_v44 = vpack.c.bf16 %v7711_v29, %v7711_v29 }
 0xb93   : > { %3814 = vadd.xlane.f32.xlu0 %v7797_v36  ;;  %v3927_v26 = vpop.permute.xlu0 %3926  ;;  %v7801_v58 = vpop.eup %6198 }
 0xb94   : > { %6208 = vpow2.f32 %v3798_v49  ;;  %5628 = vmatprep.subr.bf16.mxu0 %v3927_v26  ;;  %v5124_v49 = vpack.c.bf16 %v7467_v55, %v7467_v55  ;;  %v5146_v55 = vpack.c.bf16 %v7721_v50, %v7721_v50 }
 0xb95   : > { %6210 = vpow2.f32 %v3792_v19  ;;  %5629 = vmatpush3.bf16.msra.mxu0 %v3927_v26  ;;  %v7804_v6 = vpop.eup %6200  ;;  %v5132_v26 = vpack.c.bf16 %v7483_v45, %v7483_v45  ;;  %v8374_v45 = vld [vmem:[#allocation40_spill] sm:$0xff] }
 0xb96   : > { %5630 = vmatprep.subr.bf16.mxu0 %v3925_v3 }
 0xb97   : > { %3820 = vadd.xlane.f32.xlu0 %v7801_v58 }
 0xb99   : > { %5631 = vmatpush3.bf16.msra.mxu0 %v3925_v3  ;;  %v7806_v28 = vpop.eup %6202 }
 0xb9a   : > { %3822 = vadd.xlane.f32.xlu1 %v7806_v28 }
 0xb9b   : > { %3826 = vadd.xlane.f32.xlu0 %v7804_v6 }
 0xb9d   : > { %v7810_v43 = vpop.eup %6204 }
 0xb9e   : > { %v7812_v24 = vpop.eup %6206  ;;  %3834 = vadd.xlane.f32.xlu1 %v7810_v43 }
 0xb9f   : > { %3828 = vadd.xlane.f32.xlu0 %v7812_v24 }
 0xba1   : > { %v7816_v33 = vpop.eup %6208 }
 0xba2   : > { %v7818_v61 = vpop.eup %6210  ;;  %3830 = vadd.xlane.f32.xlu1 %v7816_v33 }
 0xba3   : > { %3824 = vadd.xlane.f32.xlu0 %v7818_v61 }
 0xbb3   : > { %3918 = vrot.lane.b32.xlu1 %v5942_v18, %s6478_s11 }
 0xbb7   : > { %2627 = vrot.lane.b32.xlu1 %v5119_v57, %s6478_s11 }
 0xbb9   : > { %3920 = vrot.lane.b32.xlu0 %v5943_v54, %s6478_s11 }
 0xbbb   : > { %2641 = vrot.lane.b32.xlu1 %v5126_v32, %s6478_s11  ;;  %v5140_v32 = vpack.c.bf16 %v8374_v45, %v8374_v45 }
 0xbbc   : > { %v3757_v59 = vpop.xlane.xlu1 %3756 }
 0xbbd   : > { %v3773_v16 = vsub.f32 %v7765_v2, %v3757_v59  ;;  %v5137_v2 = vpack.c.bf16 %v7699_v9, %v7699_v9  ;;  %v5131_v9 = vpack.c.bf16 %v7489_v51, %v7489_v51  ;;  %v5147_v51 = vpack.c.bf16 %v7725_v41, %v7725_v41 }
 0xbbf   : > { %2643 = vrot.lane.b32.xlu1 %v5127_v48, %s6478_s11  ;;  %v3804_v0 = vmul.f32 1.442695, %v3773_v16 }
 0xbc0   : > { %v3753_v7 = vpop.xlane.xlu1 %3752 }
 0xbc1   : > { %v3771_v22 = vsub.f32 %v7769_v60, %v3753_v7  ;;  %v5143_v60 = vpack.c.bf16 %v7717_v53, %v7717_v53 }
 0xbc3   : > { %2631 = vrot.lane.b32.xlu1 %v5121_v23, %s6478_s11  ;;  %v3800_v4 = vmul.f32 1.442695, %v3771_v22  ;;  %v8375_v23 = vld [vmem:[#allocation41_spill] sm:$0xff] }
 0xbc4   : > { %v3923_v31 = vpop.permute.xlu1 %3922  ;;  %v5148_v22 = vpack.c.bf16 %v8375_v23, %v8375_v23 }
 0xbc5   : > { %5632 = vmatprep.subr.bf16.mxu0 %v3923_v31  ;;  %6212 = vpow2.f32 %v3800_v4 }
 0xbc6   : > { %5633 = vmatpush3.bf16.msra.mxu0 %v3923_v31  ;;  %6214 = vpow2.f32 %v3804_v0 }
 0xbc7   : > { %2647 = vrot.lane.b32.xlu1 %v5129_v21, %s6478_s11 }
 0xbcb   : > { %3358 = vrot.lane.b32.xlu1 %v5135_v1, %s6477_s28 }
 0xbcf   : > { %3374 = vrot.lane.b32.xlu1 %v5143_v60, %s6477_s28 }
 0xbd2   : > { %v7852_v56 = vpop.eup %6212 }
 0xbd3   : > { %3362 = vrot.lane.b32.xlu1 %v5137_v2, %s6477_s28  ;;  %v7858_v53 = vpop.eup %6214 }
 0xbd7   : > { %3378 = vrot.lane.b32.xlu1 %v5145_v42, %s6477_s28 }
 0xbd8   : > { %3832 = vadd.xlane.f32.xlu0 %v7852_v56 }
 0xbdb   : > { %2635 = vrot.lane.b32.xlu1 %v5123_v46, %s6478_s11 }
 0xbdc   : > { %3836 = vadd.xlane.f32.xlu0 %v7858_v53 }
 0xbdf   : > { %2651 = vrot.lane.b32.xlu1 %v5131_v9, %s6478_s11 }
 0xbe3   : > { %2639 = vrot.lane.b32.xlu1 %v5125_v14, %s6478_s11 }
 0xbe7   : > { %2655 = vrot.lane.b32.xlu1 %v5133_v38, %s6478_s11 }
 0xbeb   : > { %3366 = vrot.lane.b32.xlu1 %v5139_v25, %s6477_s28 }
 0xbef   : > { %3382 = vrot.lane.b32.xlu1 %v5147_v51, %s6477_s28 }
 0xbf2   : > { %2625 = vrot.lane.b32.xlu0 %v5118_v10, %s6478_s11 }
 0xbf3   : > { %3370 = vrot.lane.b32.xlu1 %v5141_v17, %s6477_s28 }
 0xbf6   : > { %2629 = vrot.lane.b32.xlu0 %v5120_v13, %s6478_s11 }
 0xbf7   : > { %3386 = vrot.lane.b32.xlu1 %v5149_v11, %s6477_s28 }
 0xbfa   : > { %2645 = vrot.lane.b32.xlu0 %v5128_v52, %s6478_s11 }
 0xbfe   : > { %3356 = vrot.lane.b32.xlu0 %v5134_v37, %s6477_s28 }
 0xc02   : > { %3372 = vrot.lane.b32.xlu0 %v5142_v27, %s6477_s28 }
 0xc06   : > { %3360 = vrot.lane.b32.xlu0 %v5136_v40, %s6477_s28 }
 0xc0a   : > { %3376 = vrot.lane.b32.xlu0 %v5144_v44, %s6477_s28 }
 0xc0b   : > { %v3811_v41 = vpop.xlane.xlu1 %3810 }
 0xc0e   : > { %2633 = vrot.lane.b32.xlu0 %v5122_v47, %s6478_s11 }
 0xc0f   : > { %v3807_v19 = vpop.xlane.xlu1 %3806 }
 0xc10   : > { %6216 = vrcp.f32 %v3807_v19 }
 0xc12   : > { %2649 = vrot.lane.b32.xlu0 %v5130_v12, %s6478_s11 }
 0xc13   : > { %v3813_v5 = vpop.xlane.xlu1 %3812 }
 0xc16   : > { %2637 = vrot.lane.b32.xlu0 %v5124_v49, %s6478_s11 }
 0xc17   : > { %v3809_v29 = vpop.xlane.xlu1 %3808  ;;  %v3819_v30 = vpop.xlane.xlu0 %3818 }
 0xc18   : > { %6218 = vrcp.f32 %v3809_v29 }
 0xc19   : > { %6220 = vrcp.f32 %v3813_v5 }
 0xc1a   : > { %2653 = vrot.lane.b32.xlu0 %v5132_v26, %s6478_s11 }
 0xc1b   : > { %v3817_v18 = vpop.xlane.xlu1 %3816 }
 0xc1c   : > { %v3815_v3 = vpop.xlane.xlu0 %3814  ;;  %6222 = vrcp.f32 %v3817_v18 }
 0xc1d   : > { %v6217_v54 = vpop.eup %6216  ;;  %6224 = vrcp.f32 %v3815_v3 }
 0xc1e   : > { %3364 = vrot.lane.b32.xlu0 %v5138_v20, %s6477_s28  ;;  %6226 = vrcp.f32 %v3811_v41  ;;  %v3854_v7 = vmul.f32 %v6217_v54, %v7778_v15 }
 0xc20   : > { %v3821_v57 = vpop.xlane.xlu0 %3820 }
 0xc21   : > { %6228 = vrcp.f32 %v3821_v57 }
 0xc22   : > { %3380 = vrot.lane.b32.xlu0 %v5146_v55, %s6477_s28  ;;  %6230 = vrcp.f32 %v3819_v30 }
 0xc23   : > { %v3823_v59 = vpop.xlane.xlu1 %3822 }
 0xc24   : > { %v3827_v48 = vpop.xlane.xlu0 %3826  ;;  %6232 = vrcp.f32 %v3823_v59 }
 0xc25   : > { %v6219_v63 = vpop.eup %6218 }
 0xc26   : > { %3368 = vrot.lane.b32.xlu0 %v5140_v32, %s6477_s28  ;;  %v3855_v50 = vmul.f32 %v6219_v63, %v7787_v35  ;;  %v6221_v15 = vpop.eup %6220 }
 0xc27   : > { %v7929_v31 = vpop.xlane.xlu1 %3834  ;;  %v3857_v46 = vmul.f32 %v6221_v15, %v7782_v62 }
 0xc28   : > { %v3829_v21 = vpop.xlane.xlu0 %3828  ;;  %v3870_v16 = vpack.c.bf16 %v3855_v50, %v3854_v7 }
 0xc29   : > { %v6223_v0 = vpop.eup %6222 }
 0xc2a   : > { %3384 = vrot.lane.b32.xlu0 %v5148_v22, %s6477_s28  ;;  %5638 = vmatprep.mubr.bf16.mxu0 %v3870_v16  ;;  %v6225_v2 = vpop.eup %6224  ;;  %v3859_v38 = vmul.f32 %v6223_v0, %v7795_v8 }
 0xc2b   : > { %v7932_v4 = vpop.xlane.xlu1 %3830  ;;  %v6227_v42 = vpop.eup %6226  ;;  %v3858_v14 = vmul.f32 %v6225_v2, %v7797_v36 }
 0xc2c   : > { %v3825_v1 = vpop.xlane.xlu0 %3824  ;;  %v3856_v25 = vmul.f32 %v6227_v42, %v7773_v34 }
 0xc2d   : > { %6234 = vrcp.f32 %v3825_v1  ;;  %v3872_v13 = vpack.c.bf16 %v3859_v38, %v3858_v14  ;;  %v5945_v14 = vld [vmem:[#allocation11 + $0x30] sm:$0xff]   ;;  %v5946_v38 = vld [vmem:[#allocation11 + $0x28] sm:$0xff]  }
 0xc2e   : > { %6236 = vrcp.f32 %v3829_v21  ;;  %v3871_v51 = vpack.c.bf16 %v3857_v46, %v3856_v25  ;;  %v6229_v10 = vpop.eup %6228  ;;  %v5947_v25 = vld [vmem:[#allocation11 + $0x20] sm:$0xff]  }
 0xc2f   : > { %v3919_v35 = vpop.permute.xlu1 %3918  ;;  %6238 = vrcp.f32 %v3827_v48  ;;  %v6231_v11 = vpop.eup %6230  ;;  %v3861_v36 = vmul.f32 %v6229_v10, %v7801_v58  ;;  %v5949_v10 = vld [vmem:[#allocation11 + $0x10] sm:$0xff]  }
 0xc30   : > { %v3921_v60 = vpop.permute.xlu0 %3920  ;;  %v3860_v34 = vmul.f32 %v6231_v11, %v7790_v39  ;;  %6240 = vrcp.f32 %v7932_v4 }
 0xc31   : > { %5634 = vmatprep.subr.bf16.mxu0 %v3921_v60  ;;  %v6233_v62 = vpop.eup %6232 }
 0xc32   : > { %5635 = vmatpush3.bf16.msra.mxu0 %v3921_v60  ;;  %v3862_v27 = vmul.f32 %v6233_v62, %v7806_v28  ;;  %v3873_v40 = vpack.c.bf16 %v3861_v36, %v3860_v34  ;;  %v5951_v36 = vld [vmem:[#allocation11] sm:$0xff]  }
 0xc33   : > { %5636 = vmatprep.subr.bf16.mxu0 %v3919_v35  ;;  %v2628_v9 = vpop.permute.xlu1 %2627 }
 0xc34   : > { %2675 = vst.msk [vmem:[#allocation3 + $0x4] sm:$0xf] %vm2673_vm2, %v2628_v9  ;;  %v5944_v9 = vld [vmem:[#allocation11 + $0x38] sm:$0xff]  }
 0xc35   : > { %5686 = vmatprep.subr.bf16.mxu1 %v5944_v9 }
 0xc36   : > { %5637 = vmatpush3.bf16.msra.mxu0 %v3919_v35  ;;  %5694 = vmatpush3.bf16.msra.mxu1 %v5944_v9 }
 0xc37   : > { %v2642_v17 = vpop.permute.xlu1 %2641  ;;  %5654 = vmatprep.subr.bf16.mxu0 %v5944_v9  ;;  %5687 = vmatprep.subr.bf16.mxu1 %v5945_v14 }
 0xc38   : > { %2682 = vst.msk [vmem:[#allocation3 + $0x20] sm:$0xf] %vm2673_vm2, %v2642_v17 }
 0xc39   : > { %5639 = vmatmul.mubr.bf16.vlgmr.msra.gmra.mxu0 %v3871_v51  ;;  %v5948_v51 = vld [vmem:[#allocation11 + $0x18] sm:$0xff]  }
 0xc3a   : > { %5642 = vmatprep.mubr.bf16.mxu0 %v3872_v13  ;;  %v6235_v52 = vpop.eup %6234  ;;  %5655 = vmatpush3.bf16.msra.mxu0 %v5944_v9  ;;  %v5950_v13 = vld [vmem:[#allocation11 + $0x8] sm:$0xff]   ;;  %v5045_v9 = vld [vmem:[%s8293_s5] ss:$0 sm:$0xff] }
 0xc3b   : > { %v2644_v8 = vpop.permute.xlu1 %2643  ;;  %v3863_v37 = vmul.f32 %v6235_v52, %v7818_v61  ;;  %v6237_v44 = vpop.eup %6236  ;;  %5656 = vmatprep.subr.bf16.mxu0 %v5945_v14  ;;  %5695 = vmatpush3.bf16.msra.mxu1 %v5945_v14 }
 0xc3c   : > { %2683 = vst.msk [vmem:[#allocation3 + $0x24] sm:$0xf] %vm2673_vm2, %v2644_v8  ;;  %v6239_v19 = vpop.eup %6238  ;;  %v3865_v58 = vmul.f32 %v6237_v44, %v7812_v24  ;;  %5688 = vmatprep.subr.bf16.mxu1 %v5946_v38 }
 0xc3d   : > { %v3874_v47 = vpack.c.bf16 %v3863_v37, %v3862_v27  ;;  %v3864_v61 = vmul.f32 %v6239_v19, %v7804_v6  ;;  %v6241_v54 = vpop.eup %6240 }
 0xc3e   : > { %v3866_v48 = vmul.f32 %v6241_v54, %v7816_v33  ;;  %5657 = vmatpush3.bf16.msra.mxu0 %v5945_v14 }
 0xc3f   : > { %v2632_v41 = vpop.permute.xlu1 %2631  ;;  %v3875_v39 = vpack.c.bf16 %v3865_v58, %v3864_v61  ;;  %5658 = vmatprep.subr.bf16.mxu0 %v5946_v38  ;;  %5696 = vmatpush3.bf16.msra.mxu1 %v5946_v38 }
 0xc40   : > { %2677 = vst.msk [vmem:[#allocation3 + $0xc] sm:$0xf] %vm2673_vm2, %v2632_v41  ;;  %5689 = vmatprep.subr.bf16.mxu1 %v5947_v25 }
 0xc41   : > { %5643 = vmatmul.mubr.bf16.gmra.mxu0 %v3873_v40 }
 0xc42   : > { %5646 = vmatprep.mubr.bf16.mxu0 %v3874_v47  ;;  %5659 = vmatpush3.bf16.msra.mxu0 %v5946_v38 }
 0xc43   : > { %v2648_v12 = vpop.permute.xlu1 %2647  ;;  %5660 = vmatprep.subr.bf16.mxu0 %v5947_v25  ;;  %5697 = vmatpush3.bf16.msra.mxu1 %v5947_v25 }
 0xc44   : > { %2685 = vst.msk [vmem:[#allocation3 + $0x2c] sm:$0xf] %vm2673_vm2, %v2648_v12  ;;  %5690 = vmatprep.subr.bf16.mxu1 %v5948_v51 }
 0xc46   : > { %5661 = vmatpush3.bf16.msra.mxu0 %v5947_v25 }
 0xc47   : > { %v3359_v5 = vpop.permute.xlu1 %3358  ;;  %5662 = vmatprep.subr.bf16.mxu0 %v5948_v51  ;;  %5698 = vmatpush3.bf16.msra.mxu1 %v5948_v51 }
 0xc48   : > { %3406 = vst.msk [vmem:[#allocation3 + $0x4] sm:$0xf] %vm3404_vm3, %v3359_v5  ;;  %5691 = vmatprep.subr.bf16.mxu1 %v5949_v10 }
 0xc49   : > { %5647 = vmatmul.mubr.bf16.gmra.mxu0 %v3875_v39 }
 0xc4a   : > { %5663 = vmatpush3.bf16.msra.mxu0 %v5948_v51  ;;  %v8376_v51 = vld [vmem:[#allocation26_spill] sm:$0xff] }
 0xc4b   : > { %v3375_v28 = vpop.permute.xlu1 %3374  ;;  %5664 = vmatprep.subr.bf16.mxu0 %v5949_v10  ;;  %5699 = vmatpush3.bf16.msra.mxu1 %v5949_v10 }
 0xc4c   : > { %3414 = vst.msk [vmem:[#allocation3 + $0x24] sm:$0xf] %vm3404_vm3, %v3375_v28  ;;  %5692 = vmatprep.subr.bf16.mxu1 %v5950_v13 }
 0xc4e   : > { %5665 = vmatpush3.bf16.msra.mxu0 %v5949_v10 }
 0xc4f   : > { %v3363_v49 = vpop.permute.xlu1 %3362  ;;  %5666 = vmatprep.subr.bf16.mxu0 %v5950_v13  ;;  %5700 = vmatpush3.bf16.msra.mxu1 %v5950_v13 }
 0xc50   : > { %3408 = vst.msk [vmem:[#allocation3 + $0xc] sm:$0xf] %vm3404_vm3, %v3363_v49  ;;  %5693 = vmatprep.subr.bf16.mxu1 %v5951_v36 }
 0xc52   : > { %5667 = vmatpush3.bf16.msra.mxu0 %v5950_v13 }
 0xc53   : > { %v3379_v29 = vpop.permute.xlu1 %3378  ;;  %5668 = vmatprep.subr.bf16.mxu0 %v5951_v36  ;;  %5701 = vmatpush3.bf16.msra.mxu1 %v5951_v36 }
 0xc54   : > { %3416 = vst.msk [vmem:[#allocation3 + $0x2c] sm:$0xf] %vm3404_vm3, %v3379_v29 }
 0xc56   : > { %5669 = vmatpush3.bf16.msra.mxu0 %v5951_v36 }
 0xc57   : > { %v2636_v24 = vpop.permute.xlu1 %2635 }
 0xc58   : > { %2679 = vst.msk [vmem:[#allocation3 + $0x14] sm:$0xf] %vm2673_vm2, %v2636_v24 }
 0xc5b   : > { %v2652_v26 = vpop.permute.xlu1 %2651 }
 0xc5c   : > { %2687 = vst.msk [vmem:[#allocation3 + $0x34] sm:$0xf] %vm2673_vm2, %v2652_v26 }
 0xc5f   : > { %v2640_v6 = vpop.permute.xlu1 %2639 }
 0xc60   : > { %2681 = vst.msk [vmem:[#allocation3 + $0x1c] sm:$0xf] %vm2673_vm2, %v2640_v6 }
 0xc61   : > { %v3833_v30 = vpop.xlane.xlu0 %3832 }
 0xc62   : > { %6242 = vrcp.f32 %v3833_v30 }
 0xc63   : > { %6244 = vrcp.f32 %v7929_v31  ;;  %v2656_v20 = vpop.permute.xlu1 %2655 }
 0xc64   : > { %2689 = vst.msk [vmem:[#allocation3 + $0x3c] sm:$0xf] %vm2673_vm2, %v2656_v20 }
 0xc65   : > { %v3837_v3 = vpop.xlane.xlu0 %3836 }
 0xc66   : > { %6246 = vrcp.f32 %v3837_v3 }
 0xc67   : > { %v3367_v55 = vpop.permute.xlu1 %3366 }
 0xc68   : > { %3410 = vst.msk [vmem:[#allocation3 + $0x14] sm:$0xf] %vm3404_vm3, %v3367_v55 }
 0xc69   : > { %v2626_v18 = vpop.permute.xlu0 %2625 }
 0xc6a   : > { %2674 = vst.msk [vmem:[#allocation3] sm:$0xf] %vm2673_vm2, %v2626_v18 }
 0xc6b   : > { %v3383_v57 = vpop.permute.xlu1 %3382 }
 0xc6c   : > { %3418 = vst.msk [vmem:[#allocation3 + $0x34] sm:$0xf] %vm3404_vm3, %v3383_v57 }
 0xc6d   : > { %v2630_v45 = vpop.permute.xlu0 %2629 }
 0xc6e   : > { %2676 = vst.msk [vmem:[#allocation3 + $0x8] sm:$0xf] %vm2673_vm2, %v2630_v45 }
 0xc6f   : > { %v6243_v32 = vpop.eup %6242  ;;  %v3371_v59 = vpop.permute.xlu1 %3370 }
 0xc70   : > { %v3867_v63 = vmul.f32 %v6243_v32, %v7852_v56  ;;  %v6245_v7 = vpop.eup %6244  ;;  %3412 = vst.msk [vmem:[#allocation3 + $0x1c] sm:$0xf] %vm3404_vm3, %v3371_v59 }
 0xc71   : > { %v2646_v50 = vpop.permute.xlu0 %2645  ;;  %v3868_v21 = vmul.f32 %v6245_v7, %v7810_v43 }
 0xc72   : > { %2684 = vst.msk [vmem:[#allocation3 + $0x28] sm:$0xf] %vm2673_vm2, %v2646_v50  ;;  %v3876_v23 = vpack.c.bf16 %v3867_v63, %v3866_v48 }
 0xc73   : > { %v6247_v22 = vpop.eup %6246  ;;  %v3387_v31 = vpop.permute.xlu1 %3386 }
 0xc74   : > { %5650 = vmatprep.mubr.bf16.mxu0 %v3876_v23  ;;  %v3869_v16 = vmul.f32 %v6247_v22, %v7858_v53  ;;  %3420 = vst.msk [vmem:[#allocation3 + $0x3c] sm:$0xf] %vm3404_vm3, %v3387_v31 }
 0xc75   : > { %v3357_v4 = vpop.permute.xlu0 %3356 }
 0xc76   : > { %3405 = vst.msk [vmem:[#allocation3] sm:$0xf] %vm3404_vm3, %v3357_v4  ;;  %v3877_v33 = vpack.c.bf16 %v3869_v16, %v3868_v21 }
 0xc78   : > { %5651 = vmatmul.mubr.bf16.gmra.mxu0 %v3877_v33 }
 0xc79   : > { %v3373_v56 = vpop.permute.xlu0 %3372 }
 0xc7a   : > { %3413 = vst.msk [vmem:[#allocation3 + $0x20] sm:$0xf] %vm3404_vm3, %v3373_v56 }
 0xc7d   : > { %v3361_v1 = vpop.permute.xlu0 %3360 }
 0xc7e   : > { %3407 = vst.msk [vmem:[#allocation3 + $0x8] sm:$0xf] %vm3404_vm3, %v3361_v1 }
 0xc81   : > { %v3377_v15 = vpop.permute.xlu0 %3376 }
 0xc82   : > { %3415 = vst.msk [vmem:[#allocation3 + $0x28] sm:$0xf] %vm3404_vm3, %v3377_v15 }
 0xc85   : > { %v2634_v0 = vpop.permute.xlu0 %2633 }
 0xc86   : > { %2678 = vst.msk [vmem:[#allocation3 + $0x10] sm:$0xf] %vm2673_vm2, %v2634_v0 }
 0xc89   : > { %v2650_v43 = vpop.permute.xlu0 %2649 }
 0xc8a   : > { %2686 = vst.msk [vmem:[#allocation3 + $0x30] sm:$0xf] %vm2673_vm2, %v2650_v43 }
 0xc8d   : > { %v2638_v53 = vpop.permute.xlu0 %2637 }
 0xc8e   : > { %2680 = vst.msk [vmem:[#allocation3 + $0x18] sm:$0xf] %vm2673_vm2, %v2638_v53 }
 0xc91   : > { %v2654_v35 = vpop.permute.xlu0 %2653 }
 0xc92   : > { %2688 = vst.msk [vmem:[#allocation3 + $0x38] sm:$0xf] %vm2673_vm2, %v2654_v35 }
 0xc95   : > { %v3365_v60 = vpop.permute.xlu0 %3364 }
 0xc96   : > { %3409 = vst.msk [vmem:[#allocation3 + $0x10] sm:$0xf] %vm3404_vm3, %v3365_v60 }
 0xc99   : > { %v3381_v2 = vpop.permute.xlu0 %3380 }
 0xc9a   : > { %3417 = vst.msk [vmem:[#allocation3 + $0x30] sm:$0xf] %vm3404_vm3, %v3381_v2 }
 0xc9d   : > { %v3369_v42 = vpop.permute.xlu0 %3368 }
 0xc9e   : > { %3411 = vst.msk [vmem:[#allocation3 + $0x18] sm:$0xf] %vm3404_vm3, %v3369_v42 }
 0xca1   : > { %v3385_v46 = vpop.permute.xlu0 %3384 }
 0xca2   : > { %3419 = vst.msk [vmem:[#allocation3 + $0x38] sm:$0xf] %vm3404_vm3, %v3385_v46 }
 0xcf9   : > { %v5640_v17 = vpop.f32.mrf.mxu0 }
 0xcfa   : > { %v5152_v11 = vpack.c.bf16 %v5640_v17, %v5640_v17 }
 0xcfb   : > { %v3976_v62 = vpop.f32.mrf.mxu0 }
 0xcfc   : > { %4091 = vrot.lane.b32.xlu0 %v5152_v11, %s6476_s18  ;;  %v5150_v8 = vpack.c.bf16 %v3976_v62, %v3976_v62  ;;  %v8377_v62 = vld [vmem:[#allocation24_spill] sm:$0xff] }
 0xcfd   : > { %v5641_v52 = vpop.f32.mrf.mxu0 }
 0xcfe   : > { %v5153_v37 = vpack.c.bf16 %v5641_v52, %v5641_v52 }
 0xcff   : > { %v3979_v34 = vpop.f32.mrf.mxu0 }
 0xd00   : > { %4087 = vrot.lane.b32.xlu0 %v5150_v8, %s6476_s18  ;;  %4093 = vrot.lane.b32.xlu1 %v5153_v37, %s6476_s18  ;;  %v5151_v40 = vpack.c.bf16 %v3979_v34, %v3979_v34  ;;  %v8378_v37 = vld [vmem:[#allocation25_spill] sm:$0xff] }
 0xd01   : > { %v5644_v27 = vpop.f32.mrf.mxu0 }
 0xd02   : > { %v5156_v24 = vpack.c.bf16 %v5644_v27, %v5644_v27  ;;  %v8379_v27 = vld [vmem:[#allocation27_spill] sm:$0xff] }
 0xd03   : > { %v3992_v44 = vpop.f32.mrf.mxu0 }
 0xd04   : > { %v5154_v41 = vpack.c.bf16 %v3992_v44, %v3992_v44  ;;  %4089 = vrot.lane.b32.xlu1 %v5151_v40, %s6476_s18 }
 0xd05   : > { %v5645_v47 = vpop.f32.mrf.mxu0 }
 0xd06   : > { %4095 = vrot.lane.b32.xlu0 %v5154_v41, %s6476_s18  ;;  %v5157_v6 = vpack.c.bf16 %v5645_v47, %v5645_v47 }
 0xd07   : > { %v3995_v19 = vpop.f32.mrf.mxu0 }
 0xd08   : > { %v5155_v58 = vpack.c.bf16 %v3995_v19, %v3995_v19 }
 0xd09   : > { %v5648_v12 = vpop.f32.mrf.mxu0 }
 0xd0a   : > { %v5160_v61 = vpack.c.bf16 %v5648_v12, %v5648_v12  ;;  %4097 = vrot.lane.b32.xlu1 %v5155_v58, %s6476_s18  ;;  %v8380_v58 = vld [vmem:[#allocation30_spill] sm:$0xff] }
 0xd0b   : > { %v4008_v39 = vpop.f32.mrf.mxu0 }
 0xd0c   : > { %4107 = vrot.lane.b32.xlu0 %v5160_v61, %s6476_s18  ;;  %v5158_v28 = vpack.c.bf16 %v4008_v39, %v4008_v39 }
 0xd0d   : > { %v5649_v5 = vpop.f32.mrf.mxu0 }
 0xd0e   : > { %v5161_v49 = vpack.c.bf16 %v5649_v5, %v5649_v5 }
 0xd0f   : > { %v4011_v29 = vpop.f32.mrf.mxu0 }
 0xd10   : > { %4103 = vrot.lane.b32.xlu0 %v5158_v28, %s6476_s18  ;;  %4109 = vrot.lane.b32.xlu1 %v5161_v49, %s6476_s18  ;;  %v5159_v26 = vpack.c.bf16 %v4011_v29, %v4011_v29 }
 0xd14   : > { %4099 = vrot.lane.b32.xlu0 %v5156_v24, %s6476_s18  ;;  %4105 = vrot.lane.b32.xlu1 %v5159_v26, %s6476_s18  ;;  %v8381_v24 = vld [vmem:[#allocation28_spill] sm:$0xff] }
 0xd18   : > { %4101 = vrot.lane.b32.xlu1 %v5157_v6, %s6476_s18  ;;  %v8382_v6 = vld [vmem:[#allocation31_spill] sm:$0xff] }
 0xd38   : > { %v5652_v30 = vpop.f32.mrf.mxu0 }
 0xd39   : > { %v5164_v57 = vpack.c.bf16 %v5652_v30, %v5652_v30 }
 0xd3a   : > { %v4024_v20 = vpop.f32.mrf.mxu0 }
 0xd3b   : > { %v5162_v3 = vpack.c.bf16 %v4024_v20, %v4024_v20 }
 0xd3c   : > { %v5653_v55 = vpop.f32.mrf.mxu0 }
 0xd3d   : > { %4111 = vrot.lane.b32.xlu0 %v5162_v3, %s6476_s18  ;;  %v5165_v45 = vpack.c.bf16 %v5653_v55, %v5653_v55  ;;  %v8383_v55 = vld [vmem:[#allocation34_spill] sm:$0xff] }
 0xd3e   : > { %v4027_v18 = vpop.f32.mrf.mxu0 }
 0xd3f   : > { %v5163_v54 = vpack.c.bf16 %v4027_v18, %v4027_v18 }
 0xd41   : > { %4115 = vrot.lane.b32.xlu0 %v5164_v57, %s6476_s18  ;;  %4113 = vrot.lane.b32.xlu1 %v5163_v54, %s6476_s18 }
 0xd45   : > { %4117 = vrot.lane.b32.xlu1 %v5165_v45, %s6476_s18  ;;  %v8384_v45 = vld [vmem:[#allocation29_spill] sm:$0xff]  ;;  %s6393_s18 = sshll.u32 %s6479_s12, 4  ;;  %s6394_s18 = int_to_ptr.vmem [resolvable:$false] %s6393_s18 }
 0xd46   : > { %s6395_s28 = scalar_lea.vmem %s6394_s18, 4096  ;;  %p6396_p5 = scmp.lt.s32.totalorder %s8243_s22, %s6394_s18 }
 0xd47   : > { %p6397_p1 = scmp.lt.s32.totalorder %s6395_s28, %s6389_s4 }
 0xd49   : > { %p6398_p4 = por %p6397_p1, %p6396_p5 }
 0xd4b   : > { %p6399_p7 = pnand %p6398_p4, %p6392_p13 }
 0xd6e   : > { %v4092_v32 = vpop.permute.xlu0 %4091 }
 0xd6f   : > { %4138 = vst.msk [vmem:[#allocation3 + $0x8] sm:$0xf] %vm4135_vm4, %v4092_v32 }
 0xd72   : > { %v4094_v59 = vpop.permute.xlu1 %4093  ;;  %v4088_v48 = vpop.permute.xlu0 %4087 }
 0xd73   : > { %4139 = vst.msk [vmem:[#allocation3 + $0xc] sm:$0xf] %vm4135_vm4, %v4094_v59  ;;  %4136 = vst.msk [vmem:[#allocation3] sm:$0xf] %vm4135_vm4, %v4088_v48  ;;  %v8385_v48 = vld [vmem:[#allocation32_spill] sm:$0xff] }
 0xd76   : > { %v4090_v63 = vpop.permute.xlu1 %4089 }
 0xd77   : > { %4137 = vst.msk [vmem:[#allocation3 + $0x4] sm:$0xf] %vm4135_vm4, %v4090_v63 }
 0xd78   : > { %v4096_v7 = vpop.permute.xlu0 %4095 }
 0xd79   : > { %4140 = vst.msk [vmem:[#allocation3 + $0x10] sm:$0xf] %vm4135_vm4, %v4096_v7  ;;  %v8386_v7 = vld [vmem:[#allocation35_spill] sm:$0xff] }
 0xd7a   : > { %v5953_v31 = vld [vmem:[#allocation3 + $0x8] sm:$0xff]  }
 0xd7c   : > { %v4098_v50 = vpop.permute.xlu1 %4097 }
 0xd7d   : > { %4141 = vst.msk [vmem:[#allocation3 + $0x14] sm:$0xf] %vm4135_vm4, %v4098_v50 }
 0xd7e   : > { %v4108_v23 = vpop.permute.xlu0 %4107  ;;  %v5952_v22 = vld [vmem:[#allocation3] sm:$0xff]  }
 0xd7f   : > { %4146 = vst.msk [vmem:[#allocation3 + $0x28] sm:$0xf] %vm4135_vm4, %v4108_v23  ;;  %5670 = vmatprep.mubr.bf16.mxu0 %v5952_v22  ;;  %v8387_v22 = vld [vmem:[#allocation33_spill] sm:$0xff] }
 0xd80   : > { %5671 = vmatmul.mubr.bf16.vlgmr.msra.gmra.mxu0 %v5953_v31 }
 0xd82   : > { %v4110_v21 = vpop.permute.xlu1 %4109  ;;  %v4104_v16 = vpop.permute.xlu0 %4103 }
 0xd83   : > { %4147 = vst.msk [vmem:[#allocation3 + $0x2c] sm:$0xf] %vm4135_vm4, %v4110_v21  ;;  %4144 = vst.msk [vmem:[#allocation3 + $0x20] sm:$0xf] %vm4135_vm4, %v4104_v16 }
 0xd84   : > { %v5954_v4 = vld [vmem:[#allocation3 + $0x10] sm:$0xff]  }
 0xd85   : > { %5674 = vmatprep.mubr.bf16.mxu0 %v5954_v4 }
 0xd86   : > { %v4106_v33 = vpop.permute.xlu1 %4105  ;;  %v4100_v56 = vpop.permute.xlu0 %4099 }
 0xd87   : > { %4145 = vst.msk [vmem:[#allocation3 + $0x24] sm:$0xf] %vm4135_vm4, %v4106_v33  ;;  %4142 = vst.msk [vmem:[#allocation3 + $0x18] sm:$0xf] %vm4135_vm4, %v4100_v56 }
 0xd8a   : > { %v4102_v1 = vpop.permute.xlu1 %4101  ;;  %v5956_v0 = vld [vmem:[#allocation3 + $0x28] sm:$0xff]  }
 0xd8b   : > { %4143 = vst.msk [vmem:[#allocation3 + $0x1c] sm:$0xf] %vm4135_vm4, %v4102_v1  ;;  %v8388_v1 = vld [vmem:[#allocation36_spill] sm:$0xff] }
 0xd8e   : > { %v5955_v15 = vld [vmem:[#allocation3 + $0x20] sm:$0xff]  }
 0xd8f   : > { %5678 = vmatprep.mubr.bf16.mxu1 %v5955_v15 }
 0xd90   : > { %5679 = vmatmul.mubr.bf16.vlgmr.msra.gmra.mxu1 %v5956_v0 }
 0xd92   : > { %v5957_v43 = vld [vmem:[#allocation3 + $0x18] sm:$0xff]  }
 0xd93   : > { %5675 = vmatmul.mubr.bf16.gmra.mxu0 %v5957_v43 }
 0xdaf   : > { %v4112_v53 = vpop.permute.xlu0 %4111 }
 0xdb0   : > { %4148 = vst.msk [vmem:[#allocation3 + $0x30] sm:$0xf] %vm4135_vm4, %v4112_v53  ;;  %v8389_v53 = vld [vmem:[#allocation38_spill] sm:$0xff] }
 0xdb3   : > { %v4114_v35 = vpop.permute.xlu1 %4113  ;;  %v4116_v60 = vpop.permute.xlu0 %4115 }
 0xdb4   : > { %4149 = vst.msk [vmem:[#allocation3 + $0x34] sm:$0xf] %vm4135_vm4, %v4114_v35  ;;  %4150 = vst.msk [vmem:[#allocation3 + $0x38] sm:$0xf] %vm4135_vm4, %v4116_v60 }
 0xdb7   : > { %v4118_v2 = vpop.permute.xlu1 %4117 }
 0xdb8   : > { %4151 = vst.msk [vmem:[#allocation3 + $0x3c] sm:$0xf] %vm4135_vm4, %v4118_v2  ;;  %v8390_v2 = vld [vmem:[#allocation37_spill] sm:$0xff] }
 0xdbb   : > { %v5958_v42 = vld [vmem:[#allocation3 + $0x30] sm:$0xff]  }
 0xdbc   : > { %5682 = vmatprep.mubr.bf16.mxu1 %v5958_v42 }
 0xdbf   : > { %v5959_v46 = vld [vmem:[#allocation3 + $0x38] sm:$0xff]  }
 0xdc0   : > { %5683 = vmatmul.mubr.bf16.gmra.mxu1 %v5959_v46  ;;  %v8391_v46 = vld [vmem:[#allocation39_spill] sm:$0xff] }
 0xe40   : > { %v5672_v14 = vpop.f32.mrf.mxu0 }
 0xe41   : > { %v4330_v38 = vadd.f32 %v5672_v14, %v5045_v9 }
 0xe42   : > { %v4321_v25 = vpop.f32.mrf.mxu0 }
 0xe43   : > { %v8018_v10 = vadd.f32 %v4330_v38, %v8376_v51  ;;  %v4322_v17 = vadd.f32 %v5045_v9, %v4321_v25 }
 0xe44   : > { %v5673_v13 = vpop.f32.mrf.mxu0 }
 0xe45   : > { %4422 = vadd.xlane.f32.xlu0 %v8018_v10  ;;  %v8022_v52 = vadd.f32 %v4322_v17, %v8377_v62  ;;  %v4333_v36 = vadd.f32 %v5673_v13, %v5045_v9 }
 0xe46   : > { %v4324_v11 = vpop.f32.mrf.mxu0 }
 0xe47   : > { %v4325_v8 = vadd.f32 %v5045_v9, %v4324_v11  ;;  %v8029_v40 = vadd.f32 %v4333_v36, %v8379_v27 }
 0xe49   : > { %v8025_v34 = vadd.f32 %v4325_v8, %v8378_v37  ;;  %4418 = vadd.xlane.f32.xlu0 %v8022_v52 }
 0xe4b   : > { %4420 = vadd.xlane.f32.xlu1 %v8025_v34 }
 0xe4d   : > { %4424 = vadd.xlane.f32.xlu0 %v8029_v40 }
 0xe50   : > { %v5680_v44 = vpop.f32.mrf.mxu1 }
 0xe51   : > { %v4362_v29 = vadd.f32 %v5680_v44, %v5045_v9 }
 0xe52   : > { %v4353_v39 = vpop.f32.mrf.mxu1 }
 0xe53   : > { %v5676_v41 = vpop.f32.mrf.mxu0  ;;  %v8046_v18 = vadd.f32 %v4362_v29, %v8383_v55  ;;  %v4354_v57 = vadd.f32 %v5045_v9, %v4353_v39 }
 0xe54   : > { %v4346_v47 = vadd.f32 %v5676_v41, %v5045_v9  ;;  %v5681_v3 = vpop.f32.mrf.mxu1 }
 0xe55   : > { %v4337_v19 = vpop.f32.mrf.mxu0  ;;  %v4365_v54 = vadd.f32 %v5681_v3, %v5045_v9  ;;  %v8054_v63 = vadd.f32 %v4354_v57, %v8385_v48 }
 0xe56   : > { %v8034_v12 = vadd.f32 %v4346_v47, %v8380_v58  ;;  %v4338_v61 = vadd.f32 %v5045_v9, %v4337_v19  ;;  %v4356_v59 = vpop.f32.mrf.mxu1 }
 0xe57   : > { %v5677_v5 = vpop.f32.mrf.mxu0  ;;  %v8057_v50 = vadd.f32 %v4365_v54, %v8386_v7  ;;  %v4357_v23 = vadd.f32 %v5045_v9, %v4356_v59 }
 0xe58   : > { %v4349_v28 = vadd.f32 %v5677_v5, %v5045_v9  ;;  %4430 = vadd.xlane.f32.xlu0 %v8034_v12  ;;  %v8038_v26 = vadd.f32 %v4338_v61, %v8381_v24 }
 0xe59   : > { %v4340_v49 = vpop.f32.mrf.mxu0  ;;  %v8062_v31 = vadd.f32 %v4357_v23, %v8387_v22 }
 0xe5a   : > { %v8041_v30 = vadd.f32 %v4349_v28, %v8382_v6  ;;  %v4341_v20 = vadd.f32 %v5045_v9, %v4340_v49 }
 0xe5c   : > { %4432 = vadd.xlane.f32.xlu1 %v8041_v30  ;;  %4426 = vadd.xlane.f32.xlu0 %v8038_v26  ;;  %v8049_v32 = vadd.f32 %v4341_v20, %v8384_v45 }
 0xe60   : > { %4428 = vadd.xlane.f32.xlu1 %v8049_v32  ;;  %4438 = vadd.xlane.f32.xlu0 %v8046_v18 }
 0xe64   : > { %4440 = vadd.xlane.f32.xlu1 %v8057_v50  ;;  %4434 = vadd.xlane.f32.xlu0 %v8054_v63 }
 0xe68   : > { %4436 = vadd.xlane.f32.xlu1 %v8062_v31 }
 0xe80   : > { %v5684_v21 = vpop.f32.mrf.mxu1 }
 0xe81   : > { %v4378_v56 = vadd.f32 %v5684_v21, %v5045_v9 }
 0xe82   : > { %v4369_v16 = vpop.f32.mrf.mxu1 }
 0xe83   : > { %v4370_v4 = vadd.f32 %v5045_v9, %v4369_v16  ;;  %v8070_v35 = vadd.f32 %v4378_v56, %v8389_v53 }
 0xe84   : > { %v5685_v33 = vpop.f32.mrf.mxu1 }
 0xe85   : > { %v8066_v15 = vadd.f32 %v4370_v4, %v8388_v1  ;;  %v4381_v60 = vadd.f32 %v5685_v33, %v5045_v9 }
 0xe86   : > { %v4372_v0 = vpop.f32.mrf.mxu1 }
 0xe87   : > { %v4373_v43 = vadd.f32 %v5045_v9, %v4372_v0  ;;  %4442 = vadd.xlane.f32.xlu0 %v8066_v15  ;;  %v8078_v14 = vadd.f32 %v4381_v60, %v8391_v46 }
 0xe89   : > { %v8073_v42 = vadd.f32 %v4373_v43, %v8390_v2 }
 0xe8b   : > { %4444 = vadd.xlane.f32.xlu1 %v8073_v42  ;;  %4446 = vadd.xlane.f32.xlu0 %v8070_v35 }
 0xe8f   : > { %4448 = vadd.xlane.f32.xlu1 %v8078_v14 }
 0xece   : > { %v4423_v38 = vpop.xlane.xlu0 %4422 }
 0xecf   : > { %v4452_v25 = vmul.f32 0.0078125, %v4423_v38 }
 0xed1   : > { %v8082_v51 = vsub.f32 %v8018_v10, %v4452_v25 }
 0xed2   : > { %v4419_v17 = vpop.xlane.xlu0 %4418 }
 0xed3   : > { %v4450_v13 = vmul.f32 0.0078125, %v4419_v17  ;;  %v4484_v9 = vmul.f32 %v8082_v51, %v8082_v51 }
 0xed4   : > { %v4421_v11 = vpop.xlane.xlu1 %4420 }
 0xed5   : > { %v8087_v62 = vsub.f32 %v8022_v52, %v4450_v13  ;;  %4502 = vadd.xlane.f32.xlu0 %v4484_v9  ;;  %v4451_v8 = vmul.f32 0.0078125, %v4421_v11 }
 0xed6   : > { %v4425_v36 = vpop.xlane.xlu0 %4424 }
 0xed7   : > { %v4453_v37 = vmul.f32 0.0078125, %v4425_v36  ;;  %v4482_v27 = vmul.f32 %v8087_v62, %v8087_v62  ;;  %v8095_v10 = vsub.f32 %v8025_v34, %v4451_v8 }
 0xed9   : > { %v8092_v44 = vsub.f32 %v8029_v40, %v4453_v37  ;;  %4498 = vadd.xlane.f32.xlu0 %v4482_v27  ;;  %v4483_v52 = vmul.f32 %v8095_v10, %v8095_v10 }
 0xedb   : > { %v4485_v41 = vmul.f32 %v8092_v44, %v8092_v44 }
 0xedd   : > { %4504 = vadd.xlane.f32.xlu1 %v4485_v41 }
 0xee1   : > { %4500 = vadd.xlane.f32.xlu1 %v4483_v52  ;;  %v4431_v47 = vpop.xlane.xlu0 %4430 }
 0xee2   : > { %v4456_v19 = vmul.f32 0.0078125, %v4431_v47 }
 0xee4   : > { %v8102_v58 = vsub.f32 %v8034_v12, %v4456_v19  ;;  %v8164_v19 = vld [vmem:[%s8296_s8] ss:$0 sm:$0xff] }
 0xee5   : > { %v4433_v61 = vpop.xlane.xlu1 %4432  ;;  %v4427_v40 = vpop.xlane.xlu0 %4426 }
 0xee6   : > { %v4457_v39 = vmul.f32 0.0078125, %v4433_v61  ;;  %v4454_v5 = vmul.f32 0.0078125, %v4427_v40  ;;  %v4488_v34 = vmul.f32 %v8102_v58, %v8102_v58 }
 0xee8   : > { %v8107_v28 = vsub.f32 %v8041_v30, %v4457_v39  ;;  %v8110_v49 = vsub.f32 %v8038_v26, %v4454_v5  ;;  %4510 = vadd.xlane.f32.xlu0 %v4488_v34  ;;  %v8171_v39 = vld [vmem:[%s8297_s9] ss:$0 sm:$0xff] }
 0xee9   : > { %v4429_v29 = vpop.xlane.xlu1 %4428  ;;  %v4439_v24 = vpop.xlane.xlu0 %4438 }
 0xeea   : > { %v4455_v6 = vmul.f32 0.0078125, %v4429_v29  ;;  %v4460_v20 = vmul.f32 0.0078125, %v4439_v24  ;;  %v4489_v12 = vmul.f32 %v8107_v28, %v8107_v28  ;;  %v4486_v3 = vmul.f32 %v8110_v49, %v8110_v49 }
 0xeec   : > { %v8117_v55 = vsub.f32 %v8049_v32, %v4455_v6  ;;  %v8120_v30 = vsub.f32 %v8046_v18, %v4460_v20  ;;  %4512 = vadd.xlane.f32.xlu1 %v4489_v12  ;;  %4506 = vadd.xlane.f32.xlu0 %v4486_v3 }
 0xeed   : > { %v4441_v26 = vpop.xlane.xlu1 %4440  ;;  %v4435_v57 = vpop.xlane.xlu0 %4434 }
 0xeee   : > { %v4461_v54 = vmul.f32 0.0078125, %v4441_v26  ;;  %v4458_v45 = vmul.f32 0.0078125, %v4435_v57  ;;  %v4487_v59 = vmul.f32 %v8117_v55, %v8117_v55  ;;  %v4492_v48 = vmul.f32 %v8120_v30, %v8120_v30 }
 0xef0   : > { %v8127_v7 = vsub.f32 %v8057_v50, %v4461_v54  ;;  %v8130_v32 = vsub.f32 %v8054_v63, %v4458_v45  ;;  %4508 = vadd.xlane.f32.xlu1 %v4487_v59  ;;  %4518 = vadd.xlane.f32.xlu0 %v4492_v48 }
 0xef1   : > { %v4437_v18 = vpop.xlane.xlu1 %4436 }
 0xef2   : > { %v4459_v23 = vmul.f32 0.0078125, %v4437_v18  ;;  %v4493_v22 = vmul.f32 %v8127_v7, %v8127_v7  ;;  %v4490_v21 = vmul.f32 %v8130_v32, %v8130_v32 }
 0xef4   : > { %v8137_v16 = vsub.f32 %v8062_v31, %v4459_v23  ;;  %4520 = vadd.xlane.f32.xlu1 %v4493_v22  ;;  %4514 = vadd.xlane.f32.xlu0 %v4490_v21 }
 0xef6   : > { %v4491_v50 = vmul.f32 %v8137_v16, %v8137_v16 }
 0xef8   : > { %4516 = vadd.xlane.f32.xlu1 %v4491_v50 }
 0xf10   : > { %v4443_v63 = vpop.xlane.xlu0 %4442 }
 0xf11   : > { %v4462_v4 = vmul.f32 0.0078125, %v4443_v63 }
 0xf13   : > { %v8142_v33 = vsub.f32 %v8066_v15, %v4462_v4 }
 0xf14   : > { %v4445_v56 = vpop.xlane.xlu1 %4444  ;;  %v4447_v1 = vpop.xlane.xlu0 %4446 }
 0xf15   : > { %v4463_v0 = vmul.f32 0.0078125, %v4445_v56  ;;  %v4464_v43 = vmul.f32 0.0078125, %v4447_v1  ;;  %v4494_v53 = vmul.f32 %v8142_v33, %v8142_v33 }
 0xf17   : > { %v8147_v31 = vsub.f32 %v8073_v42, %v4463_v0  ;;  %v8150_v60 = vsub.f32 %v8070_v35, %v4464_v43  ;;  %4522 = vadd.xlane.f32.xlu0 %v4494_v53 }
 0xf18   : > { %v4449_v2 = vpop.xlane.xlu1 %4448 }
 0xf19   : > { %v4465_v46 = vmul.f32 0.0078125, %v4449_v2  ;;  %v4495_v15 = vmul.f32 %v8147_v31, %v8147_v31  ;;  %v4496_v38 = vmul.f32 %v8150_v60, %v8150_v60 }
 0xf1b   : > { %v8157_v25 = vsub.f32 %v8078_v14, %v4465_v46  ;;  %4524 = vadd.xlane.f32.xlu1 %v4495_v15  ;;  %4526 = vadd.xlane.f32.xlu0 %v4496_v38 }
 0xf1d   : > { %v4497_v42 = vmul.f32 %v8157_v25, %v8157_v25 }
 0xf1f   : > { %4528 = vadd.xlane.f32.xlu1 %v4497_v42 }
 0xf5e   : > { %v4503_v35 = vpop.xlane.xlu0 %4502 }
 0xf5f   : > { %v4532_v17 = vmul.f32 0.0078125, %v4503_v35 }
 0xf61   : > { %v4548_v13 = vadd.f32 1e-12, %v4532_v17 }
 0xf62   : > { %v4499_v9 = vpop.xlane.xlu0 %4498 }
 0xf63   : > { %6248 = vrsqrt.f32 %v4548_v13  ;;  %v4530_v11 = vmul.f32 0.0078125, %v4499_v9 }
 0xf65   : > { %v4546_v36 = vadd.f32 1e-12, %v4530_v11 }
 0xf66   : > { %v4505_v8 = vpop.xlane.xlu1 %4504 }
 0xf67   : > { %6250 = vrsqrt.f32 %v4546_v36  ;;  %v4533_v37 = vmul.f32 0.0078125, %v4505_v8 }
 0xf69   : > { %v4549_v27 = vadd.f32 1e-12, %v4533_v37 }
 0xf6a   : > { %v4501_v14 = vpop.xlane.xlu1 %4500 }
 0xf6b   : > { %6252 = vrsqrt.f32 %v4549_v27  ;;  %v4531_v41 = vmul.f32 0.0078125, %v4501_v14 }
 0xf6d   : > { %v4547_v52 = vadd.f32 1e-12, %v4531_v41 }
 0xf6f   : > { %6254 = vrsqrt.f32 %v4547_v52 }
 0xf70   : > { %v6249_v47 = vpop.eup %6248 }
 0xf71   : > { %v4580_v61 = vmul.f32 %v6249_v47, %v8082_v51  ;;  %v4511_v40 = vpop.xlane.xlu0 %4510 }
 0xf72   : > { %v4536_v5 = vmul.f32 0.0078125, %v4511_v40 }
 0xf73   : > { %v4602_v34 = vmul.f32 %v8164_v19, %v4580_v61 }
 0xf74   : > { %v6251_v29 = vpop.eup %6250  ;;  %v4552_v24 = vadd.f32 1e-12, %v4536_v5 }
 0xf75   : > { %v4624_v6 = vadd.f32 %v8171_v39, %v4602_v34  ;;  %v4578_v20 = vmul.f32 %v6251_v29, %v8087_v62  ;;  %v4513_v12 = vpop.xlane.xlu1 %4512  ;;  %v4507_v3 = vpop.xlane.xlu0 %4506 }
 0xf76   : > { %6256 = vrsqrt.f32 %v4552_v24  ;;  %v4537_v26 = vmul.f32 0.0078125, %v4513_v12  ;;  %v4534_v51 = vmul.f32 0.0078125, %v4507_v3 }
 0xf77   : > { %4640 = vst [vmem:[%s8176_s0 + $0x10] sm:$0xff] %v4624_v6  ;;  %v4600_v57 = vmul.f32 %v8164_v19, %v4578_v20 }
 0xf78   : > { %v6253_v54 = vpop.eup %6252  ;;  %v4553_v45 = vadd.f32 1e-12, %v4537_v26  ;;  %v4550_v59 = vadd.f32 1e-12, %v4534_v51 }
 0xf79   : > { %v4622_v48 = vadd.f32 %v8171_v39, %v4600_v57  ;;  %v4581_v18 = vmul.f32 %v6253_v54, %v8092_v44  ;;  %v4509_v62 = vpop.xlane.xlu1 %4508  ;;  %v4519_v23 = vpop.xlane.xlu0 %4518 }
 0xf7a   : > { %6258 = vrsqrt.f32 %v4553_v45  ;;  %v4535_v22 = vmul.f32 0.0078125, %v4509_v62  ;;  %v4540_v21 = vmul.f32 0.0078125, %v4519_v23 }
 0xf7b   : > { %4638 = vst [vmem:[%s8176_s0] sm:$0xff] %v4622_v48  ;;  %v4603_v50 = vmul.f32 %v8164_v19, %v4581_v18  ;;  %6260 = vrsqrt.f32 %v4550_v59 }
 0xf7c   : > { %v6255_v63 = vpop.eup %6254  ;;  %v4551_v4 = vadd.f32 1e-12, %v4535_v22  ;;  %v4556_v56 = vadd.f32 1e-12, %v4540_v21 }
 0xf7d   : > { %v4625_v1 = vadd.f32 %v8171_v39, %v4603_v50  ;;  %v4579_v0 = vmul.f32 %v6255_v63, %v8095_v10  ;;  %v4521_v43 = vpop.xlane.xlu1 %4520  ;;  %v4515_v44 = vpop.xlane.xlu0 %4514 }
 0xf7e   : > { %6262 = vrsqrt.f32 %v4551_v4  ;;  %v4541_v53 = vmul.f32 0.0078125, %v4521_v43  ;;  %v4538_v2 = vmul.f32 0.0078125, %v4515_v44 }
 0xf7f   : > { %4641 = vst [vmem:[%s8176_s0 + $0x18] sm:$0xff] %v4625_v1  ;;  %v4601_v46 = vmul.f32 %v8164_v19, %v4579_v0  ;;  %6264 = vrsqrt.f32 %v4556_v56 }
 0xf80   : > { %v4557_v15 = vadd.f32 1e-12, %v4541_v53  ;;  %v4554_v38 = vadd.f32 1e-12, %v4538_v2 }
 0xf81   : > { %v4623_v42 = vadd.f32 %v8171_v39, %v4601_v46  ;;  %v4517_v35 = vpop.xlane.xlu1 %4516 }
 0xf82   : > { %6266 = vrsqrt.f32 %v4557_v15  ;;  %v4539_v17 = vmul.f32 0.0078125, %v4517_v35 }
 0xf83   : > { %v6257_v13 = vpop.eup %6256  ;;  %4639 = vst [vmem:[%s8176_s0 + $0x8] sm:$0xff] %v4623_v42  ;;  %6268 = vrsqrt.f32 %v4554_v38 }
 0xf84   : > { %v4584_v10 = vmul.f32 %v6257_v13, %v8102_v58  ;;  %v4555_v9 = vadd.f32 1e-12, %v4539_v17 }
 0xf86   : > { %v4606_v11 = vmul.f32 %v8164_v19, %v4584_v10  ;;  %6270 = vrsqrt.f32 %v4555_v9 }
 0xf87   : > { %v6259_v36 = vpop.eup %6258 }
 0xf88   : > { %v6261_v8 = vpop.eup %6260  ;;  %v4628_v37 = vadd.f32 %v8171_v39, %v4606_v11  ;;  %v4585_v27 = vmul.f32 %v6259_v36, %v8107_v28 }
 0xf89   : > { %v4582_v14 = vmul.f32 %v6261_v8, %v8110_v49 }
 0xf8a   : > { %4644 = vst [vmem:[%s8176_s0 + $0x30] sm:$0xff] %v4628_v37  ;;  %v4607_v41 = vmul.f32 %v8164_v19, %v4585_v27 }
 0xf8b   : > { %v6263_v52 = vpop.eup %6262  ;;  %v4604_v58 = vmul.f32 %v8164_v19, %v4582_v14 }
 0xf8c   : > { %v6265_v47 = vpop.eup %6264  ;;  %v4629_v61 = vadd.f32 %v8171_v39, %v4607_v41  ;;  %v4583_v40 = vmul.f32 %v6263_v52, %v8117_v55 }
 0xf8d   : > { %v4626_v5 = vadd.f32 %v8171_v39, %v4604_v58  ;;  %v4588_v34 = vmul.f32 %v6265_v47, %v8120_v30 }
 0xf8e   : > { %4645 = vst [vmem:[%s8176_s0 + $0x38] sm:$0xff] %v4629_v61  ;;  %v4605_v28 = vmul.f32 %v8164_v19, %v4583_v40 }
 0xf8f   : > { %v6267_v49 = vpop.eup %6266  ;;  %4642 = vst [vmem:[%s8176_s0 + $0x20] sm:$0xff] %v4626_v5  ;;  %v4610_v29 = vmul.f32 %v8164_v19, %v4588_v34 }
 0xf90   : > { %v6269_v24 = vpop.eup %6268  ;;  %v4627_v6 = vadd.f32 %v8171_v39, %v4605_v28  ;;  %v4589_v55 = vmul.f32 %v6267_v49, %v8127_v7 }
 0xf91   : > { %v4632_v20 = vadd.f32 %v8171_v39, %v4610_v29  ;;  %v4586_v12 = vmul.f32 %v6269_v24, %v8130_v32 }
 0xf92   : > { %4643 = vst [vmem:[%s8176_s0 + $0x28] sm:$0xff] %v4627_v6  ;;  %v4611_v30 = vmul.f32 %v8164_v19, %v4589_v55 }
 0xf93   : > { %v6271_v3 = vpop.eup %6270  ;;  %4648 = vst [vmem:[%s8176_s0 + $0x50] sm:$0xff] %v4632_v20  ;;  %v4608_v26 = vmul.f32 %v8164_v19, %v4586_v12 }
 0xf94   : > { %v4633_v51 = vadd.f32 %v8171_v39, %v4611_v30  ;;  %v4587_v57 = vmul.f32 %v6271_v3, %v8137_v16 }
 0xf95   : > { %v4630_v54 = vadd.f32 %v8171_v39, %v4608_v26 }
 0xf96   : > { %4649 = vst [vmem:[%s8176_s0 + $0x58] sm:$0xff] %v4633_v51  ;;  %v4609_v7 = vmul.f32 %v8164_v19, %v4587_v57 }
 0xf97   : > { %4646 = vst [vmem:[%s8176_s0 + $0x40] sm:$0xff] %v4630_v54 }
 0xf98   : > { %v4631_v45 = vadd.f32 %v8171_v39, %v4609_v7 }
 0xf9a   : > { %4647 = vst [vmem:[%s8176_s0 + $0x48] sm:$0xff] %v4631_v45 }
 0xfa0   : > { %v4523_v32 = vpop.xlane.xlu0 %4522 }
 0xfa1   : > { %v4542_v59 = vmul.f32 0.0078125, %v4523_v32 }
 0xfa3   : > { %v4558_v48 = vadd.f32 1e-12, %v4542_v59 }
 0xfa4   : > { %v4525_v18 = vpop.xlane.xlu1 %4524  ;;  %v4527_v62 = vpop.xlane.xlu0 %4526 }
 0xfa5   : > { %6272 = vrsqrt.f32 %v4558_v48  ;;  %v4543_v23 = vmul.f32 0.0078125, %v4525_v18  ;;  %v4544_v22 = vmul.f32 0.0078125, %v4527_v62 }
 0xfa7   : > { %v4559_v21 = vadd.f32 1e-12, %v4543_v23  ;;  %v4560_v16 = vadd.f32 1e-12, %v4544_v22 }
 0xfa8   : > { %v4529_v50 = vpop.xlane.xlu1 %4528 }
 0xfa9   : > { %6274 = vrsqrt.f32 %v4559_v21  ;;  %v4545_v63 = vmul.f32 0.0078125, %v4529_v50 }
 0xfaa   : > { %6276 = vrsqrt.f32 %v4560_v16 }
 0xfab   : > { %v4561_v4 = vadd.f32 1e-12, %v4545_v63 }
 0xfad   : > { %6278 = vrsqrt.f32 %v4561_v4 }
 0xfb2   : > { %v6273_v56 = vpop.eup %6272 }
 0xfb3   : > { %v4590_v1 = vmul.f32 %v6273_v56, %v8142_v33 }
 0xfb5   : > { %v4612_v0 = vmul.f32 %v8164_v19, %v4590_v1 }
 0xfb6   : > { %v6275_v43 = vpop.eup %6274 }
 0xfb7   : > { %v6277_v44 = vpop.eup %6276  ;;  %v4634_v53 = vadd.f32 %v8171_v39, %v4612_v0  ;;  %v4591_v2 = vmul.f32 %v6275_v43, %v8147_v31 }
 0xfb8   : > { %v4592_v46 = vmul.f32 %v6277_v44, %v8150_v60 }
 0xfb9   : > { %4650 = vst [vmem:[%s8176_s0 + $0x60] sm:$0xff] %v4634_v53  ;;  %v4613_v15 = vmul.f32 %v8164_v19, %v4591_v2 }
 0xfba   : > { %v6279_v38 = vpop.eup %6278  ;;  %v4614_v33 = vmul.f32 %v8164_v19, %v4592_v46 }
 0xfbb   : > { %v4635_v42 = vadd.f32 %v8171_v39, %v4613_v15  ;;  %v4593_v35 = vmul.f32 %v6279_v38, %v8157_v25 }
 0xfbc   : > { %v4636_v17 = vadd.f32 %v8171_v39, %v4614_v33 }
 0xfbd   : > { %4651 = vst [vmem:[%s8176_s0 + $0x68] sm:$0xff] %v4635_v42  ;;  %v4615_v31 = vmul.f32 %v8164_v19, %v4593_v35 }
 0xfbe   : > { %4652 = vst [vmem:[%s8176_s0 + $0x70] sm:$0xff] %v4636_v17 }
 0xfbf   : > { %v4637_v60 = vadd.f32 %v8171_v39, %v4615_v31 }
 0xfc1   : > { %4653 = vst [vmem:[%s8176_s0 + $0x78] sm:$0xff] %v4637_v60 }
 0xfc2   : > { %6402 = shalt.err (!%p6399_p7)
}
 0xfc3   : > { %s6403_s11 = scalar_lea.hbm %s8241_s2, 2048  ;;  %s6407_s23 = scalar_lea.hbm %s8392_s26, 4096 }
 0xfc4   : > { %p6404_p10 = scmp.ne.s32.totalorder %s8241_s2, %s6403_s11  ;;  %p6408_p11 = scmp.lt.s32.totalorder %s8241_s2, %s8392_s26 }
 0xfc5   : > { %p6409_p2 = scmp.lt.s32.totalorder %s6407_s23, %s6403_s11 }
 0xfc6   : > { %p6405_p0 = pnand %p6404_p10, %p8393_p3 }
 0xfc7   : > { %p6410_p6 = por %p6409_p2, %p6408_p11 }
 0xfc8   : > { %p6406_p8 = pneg %p6405_p0 }
 0xfca   : > { %p6411_p12 = pnand %p6410_p6, %p6406_p8 }
 0xfcc   : > { %6414 = shalt.err (!%p6411_p12)
}
 0xfcd   : > { %s6480_s25 = smov 128   ;;  %s6481_s29 = smov 8  }
 0xfce   : > { %5746 = dma.vmem_to_hbm [thread:$0]  (%p8393_p3), %s8243_s22, 2048, %s8241_s2, %s4655_s17, %s6480_s25, %s6480_s25, %s6481_s29  }
 0xfcf PF: > { %s8394_s0 = sld [smem:[#allocation19_spill]]  ;;  %p8397_p13 = scmp.ge.s32.totalorder %s6465_s16, 2 }
 0xfd0   : > { %s8395_s21 = sld [smem:[#allocation21_spill]] }
 0xfd5   : > { %s4683_s19 = sand.u32 1, %s8394_s0  }
 0xfd6   : > { %p8396_p9 = scmp.ne.s32.totalorder %s8395_s21, 0  ;;  %s4684_s27 = scalar_lea.sflag [#allocation7], %s4683_s19 }
 0xfd8   : > { %p5763_p5 = pnand %p8397_p13, %p8396_p9 }
 0xfda   : > { %p5764_p1 = pneg %p5763_p5 }
 0xfdc   : > { %6448 = dma.done.wait (%p5764_p1), %s4684_s27, 2048  }
 0xfdd   : > { %6450 = vsyncadd (%p5764_p1), %s4684_s27, 4294965248  ;;  %s8398_s16 = sld [smem:[#allocation22_spill]]  ;;  %s8401_s13 = smov %s6457_s14 }
 0xfde   : > { %s8399_s4 = sld [smem:[#allocation20_spill]] }
 0xfdf   : > { %s8400_s15 = sld [smem:[#allocation23_spill]] }
 0xfe3   : > { %p27_p4 = scmp.ge.s32.totalorder %s8398_s16, 4  }
 0xfe4   : > { %s8402_s14 = smov %s8399_s4 }
 0xfe5   :  { %29 = sbr.rel (!%p27_p4) target bundleno = 13 (0xd), region = 126 }
 0xfea   :  { %4689 = vsyncpa [#allocation6], 1 }
 0xfeb   :  { %4691 = vsyncpa [#allocation6 + $0x1], 1 }
 0xfec   :  { %4692 = vsyncpa [#allocation9], 1 }
 0xfed   :  { %4694 = vsyncpa [#allocation9 + $0x1], 1 }
 0xfee   :  { %4695 = vsyncpa [#allocation12], 1 }
 0xfef   :  { %4696 = vsyncpa [#allocation7], 1 }
 0xff0   :  { %4698 = vsyncpa [#allocation7 + $0x1], 1 }

</bundles_post_ra>
